<compile_context>
chip_gen: v7x
topology: tpu7x:2x2x1
jax: 0.10.0
libtpu: 0.0.40
codegen_flags: <defaults>
</compile_context>

<pallas_src>
import jax
import jax.numpy as jnp
from jax.experimental import pallas as pl
from jax.experimental.pallas import tpu as pltpu


def _round_up(x, m):
    return ((x + m - 1) // m) * m


def fused_mbconv_forward(x, weight, gamma, beta, running_mean, running_var,
                         *, stride=1, eps=1e-5):
    """Forward of FusedMBConvBlock: Conv2d(K, stride, pad=K//2, no bias) -> BN -> SiLU.

    x:      (B, Cin, H, W)      NCHW (PyTorch layout)
    weight: (Cout, Cin, K, K)   OIHW (PyTorch layout)
    gamma / beta / running_mean / running_var: (Cout,)
    """
    B, Cin, H, W = x.shape
    Cout, Cin_w, K, K2 = weight.shape
    assert Cin == Cin_w and K == K2
    pad = K // 2
    Hout = (H + 2 * pad - K) // stride + 1
    Wout = (W + 2 * pad - K) // stride + 1

    # ---- wrapper-side layout plumbing (no im2col materialization) ----
    # Pad the *computed* output width up to a multiple of 8 so in-kernel slices / reshapes
    # stay sublane-aligned; the extra columns only read zero padding and are stripped after.
    Wout_p = _round_up(Wout, 8)
    Hp = H + 2 * pad
    Wp = max(W + 2 * pad, (Wout_p - 1) * stride + K)

    x_nhwc = jnp.transpose(x, (0, 2, 3, 1)).astype(jnp.bfloat16)
    xp = jnp.pad(x_nhwc, ((0, 0), (pad, Hp - H - pad), (pad, Wp - W - pad), (0, 0)))

    # Weights: (Cout, Cin, K, K) -> (K*K, Cin, Cout_padded), bf16, lane dim = Cout.
    Np = _round_up(Cout, 128)
    w_taps = jnp.transpose(weight, (2, 3, 1, 0)).reshape(K * K, Cin, Cout)
    w_taps = jnp.pad(w_taps, ((0, 0), (0, 0), (0, Np - Cout))).astype(jnp.bfloat16)

    # Folded (inference) BatchNorm -> per-output-channel scale / bias, f32.
    scale = (gamma / jnp.sqrt(running_var + eps)).astype(jnp.float32)
    bias = (beta - running_mean * scale).astype(jnp.float32)
    scale_p = jnp.pad(scale, (0, Np - Cout)).reshape(1, Np)
    bias_p = jnp.pad(bias, (0, Np - Cout)).reshape(1, Np)

    Mp = Hout * Wout_p
    out_dtype = x.dtype

    # Cout tiling: a multiple-of-128 divisor of Np.  Make sure the parallel grid has >= 2
    # blocks when possible so both v7x TensorCores get work.
    tn = min(Np, 256)
    if B * (Np // tn) < 2 and Np > 128:
        tn = 128
    grid = (B, Np // tn)

    def kernel(x_ref, w_ref, scale_ref, bias_ref, o_ref):
        # x_ref:     (Hp, Wp, Cin)      bf16  (whole padded image for this batch element)
        # w_ref:     (K*K, Cin, tn)     bf16  (resident weight panel)
        # scale/bias:(1, tn)            f32
        # o_ref:     (Mp, tn) = (Hout*Wout_p, tn)
        acc = jnp.zeros((Mp, tn), jnp.float32)
        for dy in range(K):
            for dx in range(K):
                if stride == 1:
                    a = x_ref[pl.ds(dy, Hout), pl.ds(dx, Wout_p), :]
                else:
                    a = x_ref[pl.ds(dy, Hout, stride=stride),
                              pl.ds(dx, Wout_p, stride=stride), :]
                a = a.reshape(Hout * Wout_p, Cin)
                acc = acc + jnp.dot(a, w_ref[dy * K + dx],
                                    preferred_element_type=jnp.float32)
        # Epilogue: folded BN (scale * acc + bias) + SiLU, all in f32; sigmoid -> EUP.
        y = acc * scale_ref[...] + bias_ref[...]
        y = y * jax.nn.sigmoid(y)
        o_ref[...] = y.astype(o_ref.dtype)

    out = pl.pallas_call(
        kernel,
        out_shape=jax.ShapeDtypeStruct((B, Mp, Np), out_dtype),
        grid=grid,
        in_specs=[
            # Whole padded image; index depends only on b, so it is not re-fetched across j.
            pl.BlockSpec((None, Hp, Wp, Cin), lambda b, j: (b, 0, 0, 0)),
            # Resident weight panel; index depends only on j.
            pl.BlockSpec((K * K, Cin, tn), lambda b, j: (0, 0, j)),
            pl.BlockSpec((1, tn), lambda b, j: (0, j)),
            pl.BlockSpec((1, tn), lambda b, j: (0, j)),
        ],
        out_specs=pl.BlockSpec((None, Mp, tn), lambda b, j: (b, 0, j)),
        compiler_params=pltpu.CompilerParams(
            dimension_semantics=("parallel", "parallel"),
        ),
    )(xp, w_taps, scale_p, bias_p)

    # Strip padding, restore NCHW.
    out = out.reshape(B, Hout, Wout_p, Np)[:, :, :Wout, :Cout]
    return jnp.transpose(out, (0, 3, 1, 2))


class FusedMBConvBlock:
    """JAX/Pallas mirror of the PyTorch FusedMBConvBlock (Conv -> BN -> SiLU)."""

    def __init__(self, in_channels, out_channels, kernel_size=3, stride=1,
                 eps=1e-5, *, key):
        fan_in = in_channels * kernel_size * kernel_size
        self.weight = jax.random.normal(
            key, (out_channels, in_channels, kernel_size, kernel_size),
            dtype=jnp.float32) * (1.0 / fan_in) ** 0.5
        self.gamma = jnp.ones((out_channels,), jnp.float32)
        self.beta = jnp.zeros((out_channels,), jnp.float32)
        self.running_mean = jnp.zeros((out_channels,), jnp.float32)
        self.running_var = jnp.ones((out_channels,), jnp.float32)
        self.stride = stride
        self.eps = eps

    def __call__(self, x):
        return fused_mbconv_forward(
            x, self.weight, self.gamma, self.beta,
            self.running_mean, self.running_var,
            stride=self.stride, eps=self.eps,
        )


if __name__ == "__main__":
    key = jax.random.PRNGKey(0)
    kx, kp, kg, kb, km, kv = jax.random.split(key, 6)

    B, Cin, H, W = 2, 4, 16, 16
    Cout, K, stride = 8, 3, 1

    x = jax.random.normal(kx, (B, Cin, H, W), dtype=jnp.float32)

    block = FusedMBConvBlock(Cin, Cout, kernel_size=K, stride=stride, key=kp)
    # Non-trivial BN statistics so the fused scale/bias epilogue is exercised.
    block.gamma = jax.random.uniform(kg, (Cout,), minval=0.5, maxval=1.5)
    block.beta = 0.1 * jax.random.normal(kb, (Cout,))
    block.running_mean = 0.1 * jax.random.normal(km, (Cout,))
    block.running_var = jax.random.uniform(kv, (Cout,), minval=0.5, maxval=1.5)

    y = block(x)
    jax.block_until_ready(y)

    # Pure-JAX f32 reference: conv -> BN (inference) -> SiLU
    conv = jax.lax.conv_general_dilated(
        x, block.weight, window_strides=(stride, stride),
        padding=((K // 2, K // 2), (K // 2, K // 2)),
        dimension_numbers=("NCHW", "OIHW", "NCHW"),
    )
    s = block.gamma / jnp.sqrt(block.running_var + block.eps)
    b = block.beta - block.running_mean * s
    ref = conv * s[None, :, None, None] + b[None, :, None, None]
    ref = ref * jax.nn.sigmoid(ref)

    assert y.shape == (B, Cout, H, W), y.shape
    max_err = float(jnp.max(jnp.abs(y - ref)))
    # bf16 MXU operands (with f32 accumulation) => ~1e-2-level deviation vs. the f32 reference.
    assert max_err < 1e-1, f"max abs err {max_err}"
    print("KERNEL_OK")
</pallas_src>

<mosaic_0001>
module attributes {stable_mosaic.version = 11 : i64} {
  func.func @kernel(%arg0: i32, %arg1: i32, %arg2: memref<1x18x18x4xbf16, #tpu.memory_space<vmem>>, %arg3: memref<9x4x128xbf16, #tpu.memory_space<vmem>>, %arg4: memref<1x128xf32, #tpu.memory_space<vmem>>, %arg5: memref<1x128xf32, #tpu.memory_space<vmem>>, %arg6: memref<1x256x128xf32, #tpu.memory_space<vmem>>) attributes {dimension_semantics = [#tpu.dimension_semantics<parallel>, #tpu.dimension_semantics<parallel>], iteration_bounds = array<i64: 2, 1>, scalar_prefetch = 0 : i64, scratch_operands = 0 : i64, tpu.core_type = #tpu.core_type<tc>, window_params = [{transform_indices = @transform_0, window_bounds = array<i64: 1, 18, 18, 4>}, {transform_indices = @transform_1, window_bounds = array<i64: 9, 4, 128>}, {transform_indices = @transform_2, window_bounds = array<i64: 1, 128>}, {transform_indices = @transform_3, window_bounds = array<i64: 1, 128>}, {transform_indices = @transform_4, window_bounds = array<i64: 1, 256, 128>}]} {
    %cst = arith.constant 0.000000e+00 : f32
    %0 = vector.broadcast %cst : f32 to vector<256x128xf32>
    %c0 = arith.constant 0 : index
    %c0_0 = arith.constant 0 : index
    %c0_1 = arith.constant 0 : index
    %c0_2 = arith.constant 0 : index
    %1 = vector.load %arg2[%c0, %c0_0, %c0_1, %c0_2] : memref<1x18x18x4xbf16, #tpu.memory_space<vmem>>, vector<1x16x16x4xbf16>
    %2 = vector.shape_cast %1 : vector<1x16x16x4xbf16> to vector<16x16x4xbf16>
    %3 = vector.shape_cast %2 : vector<16x16x4xbf16> to vector<256x4xbf16>
    %c0_3 = arith.constant 0 : index
    %c0_4 = arith.constant 0 : index
    %c0_5 = arith.constant 0 : index
    %4 = vector.load %arg3[%c0_3, %c0_4, %c0_5] : memref<9x4x128xbf16, #tpu.memory_space<vmem>>, vector<1x4x128xbf16>
    %5 = vector.shape_cast %4 : vector<1x4x128xbf16> to vector<4x128xbf16>
    %cst_6 = arith.constant dense<0.000000e+00> : vector<256x128xf32>
    %6 = tpu.matmul %3, %5, %cst_6 {dimension_numbers = #tpu.dot_dimension_numbers<[1], [0], [0], [1], [0, 0, 1, 1], [], []>} : vector<256x4xbf16>, vector<4x128xbf16>, vector<256x128xf32> -> vector<256x128xf32>
    %7 = arith.addf %0, %6 : vector<256x128xf32>
    %c0_7 = arith.constant 0 : index
    %c0_8 = arith.constant 0 : index
    %c1 = arith.constant 1 : index
    %c0_9 = arith.constant 0 : index
    %8 = vector.load %arg2[%c0_7, %c0_8, %c1, %c0_9] : memref<1x18x18x4xbf16, #tpu.memory_space<vmem>>, vector<1x16x16x4xbf16>
    %9 = vector.shape_cast %8 : vector<1x16x16x4xbf16> to vector<16x16x4xbf16>
    %10 = vector.shape_cast %9 : vector<16x16x4xbf16> to vector<256x4xbf16>
    %c1_10 = arith.constant 1 : index
    %c0_11 = arith.constant 0 : index
    %c0_12 = arith.constant 0 : index
    %11 = vector.load %arg3[%c1_10, %c0_11, %c0_12] : memref<9x4x128xbf16, #tpu.memory_space<vmem>>, vector<1x4x128xbf16>
    %12 = vector.shape_cast %11 : vector<1x4x128xbf16> to vector<4x128xbf16>
    %cst_13 = arith.constant dense<0.000000e+00> : vector<256x128xf32>
    %13 = tpu.matmul %10, %12, %cst_13 {dimension_numbers = #tpu.dot_dimension_numbers<[1], [0], [0], [1], [0, 0, 1, 1], [], []>} : vector<256x4xbf16>, vector<4x128xbf16>, vector<256x128xf32> -> vector<256x128xf32>
    %14 = arith.addf %7, %13 : vector<256x128xf32>
    %c0_14 = arith.constant 0 : index
    %c0_15 = arith.constant 0 : index
    %c2 = arith.constant 2 : index
    %c0_16 = arith.constant 0 : index
    %15 = vector.load %arg2[%c0_14, %c0_15, %c2, %c0_16] : memref<1x18x18x4xbf16, #tpu.memory_space<vmem>>, vector<1x16x16x4xbf16>
    %16 = vector.shape_cast %15 : vector<1x16x16x4xbf16> to vector<16x16x4xbf16>
    %17 = vector.shape_cast %16 : vector<16x16x4xbf16> to vector<256x4xbf16>
    %c2_17 = arith.constant 2 : index
    %c0_18 = arith.constant 0 : index
    %c0_19 = arith.constant 0 : index
    %18 = vector.load %arg3[%c2_17, %c0_18, %c0_19] : memref<9x4x128xbf16, #tpu.memory_space<vmem>>, vector<1x4x128xbf16>
    %19 = vector.shape_cast %18 : vector<1x4x128xbf16> to vector<4x128xbf16>
    %cst_20 = arith.constant dense<0.000000e+00> : vector<256x128xf32>
    %20 = tpu.matmul %17, %19, %cst_20 {dimension_numbers = #tpu.dot_dimension_numbers<[1], [0], [0], [1], [0, 0, 1, 1], [], []>} : vector<256x4xbf16>, vector<4x128xbf16>, vector<256x128xf32> -> vector<256x128xf32>
    %21 = arith.addf %14, %20 : vector<256x128xf32>
    %c0_21 = arith.constant 0 : index
    %c1_22 = arith.constant 1 : index
    %c0_23 = arith.constant 0 : index
    %c0_24 = arith.constant 0 : index
    %22 = vector.load %arg2[%c0_21, %c1_22, %c0_23, %c0_24] : memref<1x18x18x4xbf16, #tpu.memory_space<vmem>>, vector<1x16x16x4xbf16>
    %23 = vector.shape_cast %22 : vector<1x16x16x4xbf16> to vector<16x16x4xbf16>
    %24 = vector.shape_cast %23 : vector<16x16x4xbf16> to vector<256x4xbf16>
    %c3 = arith.constant 3 : index
    %c0_25 = arith.constant 0 : index
    %c0_26 = arith.constant 0 : index
    %25 = vector.load %arg3[%c3, %c0_25, %c0_26] : memref<9x4x128xbf16, #tpu.memory_space<vmem>>, vector<1x4x128xbf16>
    %26 = vector.shape_cast %25 : vector<1x4x128xbf16> to vector<4x128xbf16>
    %cst_27 = arith.constant dense<0.000000e+00> : vector<256x128xf32>
    %27 = tpu.matmul %24, %26, %cst_27 {dimension_numbers = #tpu.dot_dimension_numbers<[1], [0], [0], [1], [0, 0, 1, 1], [], []>} : vector<256x4xbf16>, vector<4x128xbf16>, vector<256x128xf32> -> vector<256x128xf32>
    %28 = arith.addf %21, %27 : vector<256x128xf32>
    %c0_28 = arith.constant 0 : index
    %c1_29 = arith.constant 1 : index
    %c1_30 = arith.constant 1 : index
    %c0_31 = arith.constant 0 : index
    %29 = vector.load %arg2[%c0_28, %c1_29, %c1_30, %c0_31] : memref<1x18x18x4xbf16, #tpu.memory_space<vmem>>, vector<1x16x16x4xbf16>
    %30 = vector.shape_cast %29 : vector<1x16x16x4xbf16> to vector<16x16x4xbf16>
    %31 = vector.shape_cast %30 : vector<16x16x4xbf16> to vector<256x4xbf16>
    %c4 = arith.constant 4 : index
    %c0_32 = arith.constant 0 : index
    %c0_33 = arith.constant 0 : index
    %32 = vector.load %arg3[%c4, %c0_32, %c0_33] : memref<9x4x128xbf16, #tpu.memory_space<vmem>>, vector<1x4x128xbf16>
    %33 = vector.shape_cast %32 : vector<1x4x128xbf16> to vector<4x128xbf16>
    %cst_34 = arith.constant dense<0.000000e+00> : vector<256x128xf32>
    %34 = tpu.matmul %31, %33, %cst_34 {dimension_numbers = #tpu.dot_dimension_numbers<[1], [0], [0], [1], [0, 0, 1, 1], [], []>} : vector<256x4xbf16>, vector<4x128xbf16>, vector<256x128xf32> -> vector<256x128xf32>
    %35 = arith.addf %28, %34 : vector<256x128xf32>
    %c0_35 = arith.constant 0 : index
    %c1_36 = arith.constant 1 : index
    %c2_37 = arith.constant 2 : index
    %c0_38 = arith.constant 0 : index
    %36 = vector.load %arg2[%c0_35, %c1_36, %c2_37, %c0_38] : memref<1x18x18x4xbf16, #tpu.memory_space<vmem>>, vector<1x16x16x4xbf16>
    %37 = vector.shape_cast %36 : vector<1x16x16x4xbf16> to vector<16x16x4xbf16>
    %38 = vector.shape_cast %37 : vector<16x16x4xbf16> to vector<256x4xbf16>
    %c5 = arith.constant 5 : index
    %c0_39 = arith.constant 0 : index
    %c0_40 = arith.constant 0 : index
    %39 = vector.load %arg3[%c5, %c0_39, %c0_40] : memref<9x4x128xbf16, #tpu.memory_space<vmem>>, vector<1x4x128xbf16>
    %40 = vector.shape_cast %39 : vector<1x4x128xbf16> to vector<4x128xbf16>
    %cst_41 = arith.constant dense<0.000000e+00> : vector<256x128xf32>
    %41 = tpu.matmul %38, %40, %cst_41 {dimension_numbers = #tpu.dot_dimension_numbers<[1], [0], [0], [1], [0, 0, 1, 1], [], []>} : vector<256x4xbf16>, vector<4x128xbf16>, vector<256x128xf32> -> vector<256x128xf32>
    %42 = arith.addf %35, %41 : vector<256x128xf32>
    %c0_42 = arith.constant 0 : index
    %c2_43 = arith.constant 2 : index
    %c0_44 = arith.constant 0 : index
    %c0_45 = arith.constant 0 : index
    %43 = vector.load %arg2[%c0_42, %c2_43, %c0_44, %c0_45] : memref<1x18x18x4xbf16, #tpu.memory_space<vmem>>, vector<1x16x16x4xbf16>
    %44 = vector.shape_cast %43 : vector<1x16x16x4xbf16> to vector<16x16x4xbf16>
    %45 = vector.shape_cast %44 : vector<16x16x4xbf16> to vector<256x4xbf16>
    %c6 = arith.constant 6 : index
    %c0_46 = arith.constant 0 : index
    %c0_47 = arith.constant 0 : index
    %46 = vector.load %arg3[%c6, %c0_46, %c0_47] : memref<9x4x128xbf16, #tpu.memory_space<vmem>>, vector<1x4x128xbf16>
    %47 = vector.shape_cast %46 : vector<1x4x128xbf16> to vector<4x128xbf16>
    %cst_48 = arith.constant dense<0.000000e+00> : vector<256x128xf32>
    %48 = tpu.matmul %45, %47, %cst_48 {dimension_numbers = #tpu.dot_dimension_numbers<[1], [0], [0], [1], [0, 0, 1, 1], [], []>} : vector<256x4xbf16>, vector<4x128xbf16>, vector<256x128xf32> -> vector<256x128xf32>
    %49 = arith.addf %42, %48 : vector<256x128xf32>
    %c0_49 = arith.constant 0 : index
    %c2_50 = arith.constant 2 : index
    %c1_51 = arith.constant 1 : index
    %c0_52 = arith.constant 0 : index
    %50 = vector.load %arg2[%c0_49, %c2_50, %c1_51, %c0_52] : memref<1x18x18x4xbf16, #tpu.memory_space<vmem>>, vector<1x16x16x4xbf16>
    %51 = vector.shape_cast %50 : vector<1x16x16x4xbf16> to vector<16x16x4xbf16>
    %52 = vector.shape_cast %51 : vector<16x16x4xbf16> to vector<256x4xbf16>
    %c7 = arith.constant 7 : index
    %c0_53 = arith.constant 0 : index
    %c0_54 = arith.constant 0 : index
    %53 = vector.load %arg3[%c7, %c0_53, %c0_54] : memref<9x4x128xbf16, #tpu.memory_space<vmem>>, vector<1x4x128xbf16>
    %54 = vector.shape_cast %53 : vector<1x4x128xbf16> to vector<4x128xbf16>
    %cst_55 = arith.constant dense<0.000000e+00> : vector<256x128xf32>
    %55 = tpu.matmul %52, %54, %cst_55 {dimension_numbers = #tpu.dot_dimension_numbers<[1], [0], [0], [1], [0, 0, 1, 1], [], []>} : vector<256x4xbf16>, vector<4x128xbf16>, vector<256x128xf32> -> vector<256x128xf32>
    %56 = arith.addf %49, %55 : vector<256x128xf32>
    %c0_56 = arith.constant 0 : index
    %c2_57 = arith.constant 2 : index
    %c2_58 = arith.constant 2 : index
    %c0_59 = arith.constant 0 : index
    %57 = vector.load %arg2[%c0_56, %c2_57, %c2_58, %c0_59] : memref<1x18x18x4xbf16, #tpu.memory_space<vmem>>, vector<1x16x16x4xbf16>
    %58 = vector.shape_cast %57 : vector<1x16x16x4xbf16> to vector<16x16x4xbf16>
    %59 = vector.shape_cast %58 : vector<16x16x4xbf16> to vector<256x4xbf16>
    %c8 = arith.constant 8 : index
    %c0_60 = arith.constant 0 : index
    %c0_61 = arith.constant 0 : index
    %60 = vector.load %arg3[%c8, %c0_60, %c0_61] : memref<9x4x128xbf16, #tpu.memory_space<vmem>>, vector<1x4x128xbf16>
    %61 = vector.shape_cast %60 : vector<1x4x128xbf16> to vector<4x128xbf16>
    %cst_62 = arith.constant dense<0.000000e+00> : vector<256x128xf32>
    %62 = tpu.matmul %59, %61, %cst_62 {dimension_numbers = #tpu.dot_dimension_numbers<[1], [0], [0], [1], [0, 0, 1, 1], [], []>} : vector<256x4xbf16>, vector<4x128xbf16>, vector<256x128xf32> -> vector<256x128xf32>
    %63 = arith.addf %56, %62 : vector<256x128xf32>
    %c0_63 = arith.constant 0 : index
    %c0_64 = arith.constant 0 : index
    %64 = vector.load %arg4[%c0_63, %c0_64] : memref<1x128xf32, #tpu.memory_space<vmem>>, vector<1x128xf32>
    %65 = vector.broadcast %64 : vector<1x128xf32> to vector<256x128xf32>
    %66 = arith.mulf %63, %65 : vector<256x128xf32>
    %c0_65 = arith.constant 0 : index
    %c0_66 = arith.constant 0 : index
    %67 = vector.load %arg5[%c0_65, %c0_66] : memref<1x128xf32, #tpu.memory_space<vmem>>, vector<1x128xf32>
    %68 = vector.broadcast %67 : vector<1x128xf32> to vector<256x128xf32>
    %69 = arith.addf %66, %68 : vector<256x128xf32>
    %70 = arith.negf %69 : vector<256x128xf32>
    %71 = math.exp %70 : vector<256x128xf32>
    %cst_67 = arith.constant 1.000000e+00 : f32
    %72 = vector.broadcast %cst_67 : f32 to vector<256x128xf32>
    %73 = arith.addf %72, %71 : vector<256x128xf32>
    %74 = arith.divf %72, %73 : vector<256x128xf32>
    %75 = arith.mulf %69, %74 : vector<256x128xf32>
    %c0_68 = arith.constant 0 : index
    %c0_69 = arith.constant 0 : index
    %c0_70 = arith.constant 0 : index
    %76 = vector.load %arg6[%c0_68, %c0_69, %c0_70] : memref<1x256x128xf32, #tpu.memory_space<vmem>>, vector<1x256x128xf32>
    %77 = vector.shape_cast %76 : vector<1x256x128xf32> to vector<256x128xf32>
    %78 = vector.shape_cast %75 : vector<256x128xf32> to vector<1x256x128xf32>
    tpu.vector_store %arg6[%c0_68, %c0_69, %c0_70], %78 {strides = array<i32>} : memref<1x256x128xf32, #tpu.memory_space<vmem>>, vector<1x256x128xf32>,
    return
  }
  func.func @transform_0(%arg0: i32, %arg1: i32) -> (i32, i32, i32, i32) {
    %c0_i32 = arith.constant 0 : i32
    %c0_i32_0 = arith.constant 0 : i32
    %c0_i32_1 = arith.constant 0 : i32
    %c0_i32_2 = arith.constant 0 : i32
    return %arg0, %c0_i32, %c0_i32_0, %c0_i32_1 : i32, i32, i32, i32
  }
  func.func @transform_1(%arg0: i32, %arg1: i32) -> (i32, i32, i32) {
    %c0_i32 = arith.constant 0 : i32
    %c0_i32_0 = arith.constant 0 : i32
    %c0_i32_1 = arith.constant 0 : i32
    return %c0_i32, %c0_i32_0, %arg1 : i32, i32, i32
  }
  func.func @transform_2(%arg0: i32, %arg1: i32) -> (i32, i32) {
    %c0_i32 = arith.constant 0 : i32
    %c0_i32_0 = arith.constant 0 : i32
    return %c0_i32, %arg1 : i32, i32
  }
  func.func @transform_3(%arg0: i32, %arg1: i32) -> (i32, i32) {
    %c0_i32 = arith.constant 0 : i32
    %c0_i32_0 = arith.constant 0 : i32
    return %c0_i32, %arg1 : i32, i32
  }
  func.func @transform_4(%arg0: i32, %arg1: i32) -> (i32, i32, i32) {
    %c0_i32 = arith.constant 0 : i32
    %c0_i32_0 = arith.constant 0 : i32
    return %arg0, %c0_i32, %arg1 : i32, i32, i32
  }
}

</mosaic_0001>

<bundles_post_ra>
// kernel: tpu_custom_call.1
= control target key start
LH: loop header
LB: loop body
LE: loop exit
PB: predicated region body
PF: predicated region fallthrough
CT: control target
= control target key end

     0   :  { %9 = vsyncpa [#allocation3], 0  ;;  %s9058_s0 = inlined_call_operand.vmem [shape: bf16[2,18,18,4], index: 0, kind: input, shape index: {}]   ;;  %s9059_s1 = inlined_call_operand.vmem [shape: bf16[9,4,128], index: 1, kind: input, shape index: {}]   ;;  %s9060_s2 = inlined_call_operand.vmem [shape: f32[1,128], index: 2, kind: input, shape index: {}]   ;;  %s9061_s3 = inlined_call_operand.vmem [shape: f32[1,128], index: 3, kind: input, shape index: {}]   ;;  %s9062_s4 = inlined_call_operand.hbm [shape: f32[2,256,128], index: 4, kind: output, shape index: {}]  }
   0x1   :  { %11 = vsyncpa [#allocation3 + $0x1], 0  ;;  %s6987_s15 = smov 0   ;;  %s6989_s16 = smov 0  }
   0x2   :  { %s6991_s17 = smov 0   ;;  %s6993_s18 = smov 0  }
   0x3   :  { %s6995_s19 = smov 0   ;;  %s6997_s20 = smov 0  }
   0x4 LB: > { %s5275_s21 = sadd.s32 4294967295, %s6957_s20   ;;  %s5276_s22 = sadd.s32 4294967294, %s6957_s20   ;;  %s6957_s20 = sphi %s6997_s20, %s17_s20   ;;  %s6953_s19 = sphi %s6995_s19, %s9136_s19   ;;  %s6949_s18 = sphi %s6993_s18, %s9135_s18   ;;  %s6945_s17 = sphi %s6991_s17, %s9134_s17   ;;  %s6941_s16 = sphi %s6989_s16, %s9133_s16   ;;  %s6937_s15 = sphi %s6987_s15, %s9132_s15  }
   0x5   : > { %s29_s23 = sadd.s32 1, %s6953_s19  ;;  %s142_s24 = sadd.s32 1, %s6945_s17 }
   0x6   : > { %p31_p0 = scmp.ge.s32.totalorder %s29_s23, 2  ;;  %p152_p1 = scmp.ne.s32.totalorder %s6945_s17, %s6941_s16 }
   0x7   : > { %p153_p2 = scmp.eq.s32.totalorder %s5275_s21, 1  ;;  %p158_p3 = scmp.ne.s32.totalorder %s6941_s16, %s6937_s15 }
   0x8   : > { %s9138_s23 = smov (%p31_p0, %s29_s23), 0  ;;  %p159_p5 = scmp.eq.s32.totalorder %s5276_s22, 1 }
   0x9   : > { %p7027_p4 = por %p153_p2, %p152_p1  ;;  %s137_s26 = ssub.s32 %s6953_s19, %s9138_s23 }
   0xa   : > { %p5282_p6 = scmp.ge.s32.totalorder %s6957_s20, 1  ;;  %p140_p7 = scmp.eq.s32.totalorder %s137_s26, 0 }
   0xb   : > { %p7034_p8 = por %p159_p5, %p158_p3  ;;  %p204_p9 = scmp.lt.s32.totalorder %s6957_s20, 3 }
   0xc   : > { %s7040_s28 = scalar_select %p140_p7, %s6945_s17, %s142_s24  }
   0xd   : > { %p205_p10 = pnand %p5282_p6, %p204_p9 }
   0xf   : > { %208 = sbr.rel (%p205_p10) target bundleno = 643 (0x283), region = 36 }
  0x16   : > { %v5285_v0 = vld [vmem:[%s9059_s1 + $0x2] sm:$0x3]  ;;  %vm791_vm0 = vcmask 1041408   ;;  %v5512_v1 = vld [vmem:[%s9059_s1 + $0x8] sm:$0x3]  ;;  %p240_p11 = scmp.lt.s32.totalorder %s6949_s18, 1 }
  0x17   : > { %6578 = vmatprep.subr.msk.bf16.mxu1 %vm791_vm0, %v5285_v0  ;;  %6582 = vmatprep.subr.msk.bf16.mxu0 %vm791_vm0, %v5512_v1  ;;  %v793_v2 = vsel %vm791_vm0, %v5285_v0, 0  ;;  %v7053_v3 = vsel %vm791_vm0, %v5512_v1, 0  ;;  %v288_v4 = vld [vmem:[%s9059_s1] sm:$0x3]  ;;  %v5577_v5 = vld [vmem:[%s9059_s1 + $0xa] sm:$0x3] }
  0x18   : > { %9078 = vst [vmem:[#allocation5_spill] sm:$0xff] %v7053_v3  ;;  %6015 = vmatpush3.bf16.msra.mxu1 %v793_v2  ;;  %6151 = vmatpush3.bf16.msra.mxu0 %v7053_v3  ;;  %s241_s7 = scalar_select %p240_p11, %s6949_s18, 1  ;;  %vm305_vm1 = vsmask.f32 3328  ;;  %vm306_vm2 = vsmask.f32 7440 }
  0x19   : > { %6579 = vmatprep.subr.msk.bf16.mxu1 %vm791_vm0, %v288_v4  ;;  %6584 = vmatprep.subr.msk.bf16.mxu0 %vm791_vm0, %v5577_v5  ;;  %vm742_vm3 = vcmask 31744   ;;  %v7081_v17 = vsel %vm791_vm0, %v288_v4, 0  ;;  %v7087_v26 = vld [vmem:[%s9059_s1 + $0xc] sm:$0x3]  ;;  %vm7094_vm4 = vmor %vm305_vm1, %vm306_vm2  ;;  %v7100_v37 = vsel %vm791_vm0, %v5577_v5, 0  ;;  %vm1296_vm5 = vcmask 1042432  }
  0x1a   : > { %s6588_s12 = smul.u32 216, %s241_s7  ;;  %v7104_v41 = vsel %vm791_vm0, %v7087_v26, 0  ;;  %vm1297_vm6 = vcmask 1046532   ;;  %s237_s26 = sand.u32 1, %s6941_s16  }
  0x1b   : > { %vm7320_vm7 = vmor %vm1296_vm5, %vm1297_vm6  ;;  %s8834_s29 = sshll.u32 %s237_s26, 8  ;;  %s5860_s5 = sshll.u32 %s6949_s18, 12 }
  0x1c   : > { %s7068_s21 = scalar_lea.vmem %s9058_s0, %s6588_s12  ;;  %s8857_s30 = scalar_lea.vmem [#allocation2], %s8834_s29 }
  0x1d   : > { %v256_v6 = vld [vmem:[%s7068_s21] sm:$0xf]  ;;  %v257_v7 = vld [vmem:[%s7068_s21 + $0x4] sm:$0xf]  ;;  %v289_v8 = vld [vmem:[%s7068_s21 + $0x8] sm:$0x1]  ;;  %s9002_s9 = scalar_lea.hbm %s9062_s4, %s5860_s5 }
  0x1e   : > { %v309_v9 = vshrl.u32 %v256_v6, 16  ;;  %v312_v10 = vshll.u32 %v256_v6, 16  ;;  %v318_v11 = vshll.u32 %v257_v7, 16  ;;  %v322_v12 = vshrl.u32 %v257_v7, 16  ;;  %v5464_v13 = vld [vmem:[%s7068_s21 + $0xc] sm:$0xf] }
  0x1f   : > { %v328_v14 = vshll.u32 %v289_v8, 16  ;;  %v7075_v15 = vld [vmem:[%s7068_s21 + $0x10] sm:$0xf]  ;;  %v7078_v16 = vld [vmem:[%s7068_s21 + $0x14] sm:$0x1]  ;;  %v2113_v23 = vshrl.u32 %v5464_v13, 16 }
  0x20   : > { %v311_v18 = vrot.slane %v309_v9, 4  ;;  %v314_v19 = vrot.slane %v312_v10, 5  ;;  %v320_v20 = vrot.slane %v318_v11, 5  ;;  %v324_v21 = vrot.slane %v322_v12, 4  ;;  %v258_v31 = vld [vmem:[%s7068_s21 + $0xc] sm:$0xf] }
  0x21   : > { %v330_v22 = vrot.slane %v328_v14, 5  ;;  %v2116_v24 = vshll.u32 %v5464_v13, 16  ;;  %v2122_v25 = vshll.u32 %v7075_v15, 16  ;;  %v2126_v29 = vshrl.u32 %v7075_v15, 16  ;;  %v259_v36 = vld [vmem:[%s7068_s21 + $0x10] sm:$0xf] }
  0x22   : > { %v315_v27 = vor.u32 %v314_v19, %v311_v18  ;;  %v325_v28 = vor.u32 %v324_v21, %v320_v20  ;;  %v2132_v30 = vshll.u32 %v7078_v16, 16  ;;  %v2115_v33 = vrot.slane %v2113_v23, 4  ;;  %v290_v44 = vld [vmem:[%s7068_s21 + $0x14] sm:$0x1]  ;;  %v5467_v55 = vld [vmem:[%s7068_s21 + $0x18] sm:$0xf] }
  0x23   : > { %v2118_v34 = vrot.slane %v2116_v24, 5  ;;  %v2124_v35 = vrot.slane %v2122_v25, 5  ;;  %v2128_v40 = vrot.slane %v2126_v29, 4  ;;  %v333_v45 = vshrl.u32 %v258_v31, 16  ;;  %v7113_v60 = vld [vmem:[%s7068_s21 + $0x1c] sm:$0xf] }
  0x24   : > { %v316_v38 = vrot.slane %v315_v27, 4  ;;  %v326_v39 = vrot.slane %v325_v28, 4  ;;  %v2134_v43 = vrot.slane %v2132_v30, 5  ;;  %v336_v46 = vshll.u32 %v258_v31, 16  ;;  %v7121_v1 = vld [vmem:[%s7068_s21 + $0x20] sm:$0x1] }
  0x25   : > { %v2119_v42 = vor.u32 %v2118_v34, %v2115_v33  ;;  %v2129_v49 = vor.u32 %v2128_v40, %v2124_v35  ;;  %v342_v50 = vshll.u32 %v259_v36, 16  ;;  %v335_v53 = vrot.slane %v333_v45, 4  ;;  %v260_v18 = vld [vmem:[%s7068_s21 + $0x18] sm:$0xf]  ;;  %v261_v23 = vld [vmem:[%s7068_s21 + $0x1c] sm:$0xf] }
  0x26   : > { %v321_v47 = vsel %vm7094_vm4, %v316_v38, %v320_v20  ;;  %v331_v48 = vsel %vm7094_vm4, %v326_v39, %v330_v22  ;;  %v338_v54 = vrot.slane %v336_v46, 5  ;;  %v346_v58 = vshrl.u32 %v259_v36, 16  ;;  %v291_v31 = vld [vmem:[%s7068_s21 + $0x20] sm:$0x1]  ;;  %v5470_v40 = vld [vmem:[%s7068_s21 + $0x24] sm:$0xf] }
  0x27   : > { %v5286_v51 = vcombine.low %v321_v47, %v331_v48  ;;  %v2120_v52 = vrot.slane %v2119_v42, 4  ;;  %v2130_v56 = vrot.slane %v2129_v49, 4  ;;  %v344_v57 = vrot.slane %v342_v50, 5  ;;  %v7144_v46 = vld [vmem:[%s7068_s21 + $0x28] sm:$0xf]  ;;  %s5164_s6 = sshll.u32 %s8857_s30, 4  ;;  %s9004_s6 = int_to_ptr.vmem [resolvable:$true] %s5164_s6 }
  0x28   : > { %v352_v59 = vshll.u32 %v290_v44, 16  ;;  %v2856_v62 = vrot.slane %v7075_v15, 5  ;;  %v2859_v63 = vrot.slane %v7078_v16, 5  ;;  %v339_v0 = vor.u32 %v338_v54, %v335_v53  ;;  %v7153_v54 = vld [vmem:[%s7068_s21 + $0x2c] sm:$0x1]  ;;  %s9012_s18 = scalar_lea.sflag [#allocation3], %s237_s26 }
  0x29   : > { %6016 = vmatprep.mubr.msk.bf16.mxu1 %vm742_vm3, %v5286_v51  ;;  %v2125_v61 = vsel %vm7094_vm4, %v2120_v52, %v2124_v35  ;;  %v2135_v2 = vsel %vm7094_vm4, %v2130_v56, %v2134_v43  ;;  %v348_v4 = vrot.slane %v346_v58, 4  ;;  %v2137_v6 = vshrl.u32 %v5467_v55, 16  ;;  %v5366_v51 = vld [vmem:[%s9059_s1 + $0x4] sm:$0x3]  ;;  %v7353_v16 = vld [vmem:[%s7068_s21 + $0x7c] sm:$0xf] }
  0x2a   : > { %v354_v5 = vrot.slane %v352_v59, 5  ;;  %v5513_v7 = vcombine.low %v2125_v61, %v2135_v2  ;;  %v340_v8 = vrot.slane %v339_v0, 4  ;;  %v2140_v9 = vshll.u32 %v5467_v55, 16  ;;  %v262_v0 = vld [vmem:[%s7068_s21 + $0x24] sm:$0xf]  ;;  %s6879_s10 = scalar_lea.vmem %s9004_s6, 4096 }
  0x2b   : > { %v2146_v10 = vshll.u32 %v7113_v60, 16  ;;  %v349_v11 = vor.u32 %v348_v4, %v344_v57  ;;  %v2139_v12 = vrot.slane %v2137_v6, 4  ;;  %v2150_v13 = vshrl.u32 %v7113_v60, 16  ;;  %p6880_p12 = scmp.ne.s32.totalorder %s9004_s6, %s6879_s10  ;;  %s6959_s11 = smov [#allocation2]  }
  0x2c   : > { %v2156_v14 = vshll.u32 %v7121_v1, 16  ;;  %6152 = vmatprep.mubr.msk.bf16.mxu0 %vm742_vm3, %v5513_v7  ;;  %v345_v19 = vsel %vm7094_vm4, %v340_v8, %v344_v57  ;;  %v2142_v20 = vrot.slane %v2140_v9, 5  ;;  %v2863_v22 = vrot.slane %v7113_v60, 5  ;;  %v263_v7 = vld [vmem:[%s7068_s21 + $0x28] sm:$0xf]  ;;  %s6883_s12 = sshll.u32 %s6959_s11, 4  ;;  %s6884_s12 = int_to_ptr.vmem [resolvable:$false] %s6883_s12 }
  0x2d   : > { %v2148_v21 = vrot.slane %v2146_v10, 5  ;;  %v350_v24 = vrot.slane %v349_v11, 4  ;;  %v2152_v25 = vrot.slane %v2150_v13, 4  ;;  %v2866_v28 = vrot.slane %v7121_v1, 5  ;;  %v292_v13 = vld [vmem:[%s7068_s21 + $0x2c] sm:$0x1]  ;;  %p6881_p13 = pnand %p6880_p12, %p7027_p4  ;;  %p6886_p1 = scmp.lt.s32.totalorder %s9004_s6, %s6884_s12 }
  0x2e   : > { %v2158_v27 = vrot.slane %v2156_v14, 5  ;;  %v2143_v29 = vor.u32 %v2142_v20, %v2139_v12  ;;  %v7137_v30 = vrot.slane %v2863_v22, 4  ;;  %v357_v33 = vshrl.u32 %v260_v18, 16  ;;  %s6885_s13 = scalar_lea.vmem %s6884_s12, 8192 }
  0x2f   : > { %v360_v34 = vshll.u32 %v260_v18, 16  ;;  %v355_v35 = vsel %vm7094_vm4, %v350_v24, %v354_v5  ;;  %v2153_v36 = vor.u32 %v2152_v25, %v2148_v21  ;;  %v366_v38 = vshll.u32 %v261_v23, 16  ;;  %v5473_v24 = vld [vmem:[%s7068_s21 + $0x30] sm:$0xf]  ;;  %p6882_p0 = pneg %p6881_p13  ;;  %p6887_p2 = scmp.lt.s32.totalorder %s6885_s13, %s6879_s10 }
  0x30   : > { %v370_v39 = vshrl.u32 %v261_v23, 16  ;;  %v5287_v42 = vcombine.low %v345_v19, %v355_v35  ;;  %v2144_v43 = vrot.slane %v2143_v29, 4  ;;  %v359_v44 = vrot.slane %v357_v33, 4  ;;  %v7173_v33 = vld [vmem:[%s7068_s21 + $0x34] sm:$0xf] }
  0x31   : > { %v362_v45 = vrot.slane %v360_v34, 5  ;;  %v2154_v47 = vrot.slane %v2153_v36, 4  ;;  %v368_v48 = vrot.slane %v366_v38, 5  ;;  %v376_v50 = vshll.u32 %v291_v31, 16  ;;  %p6888_p3 = por %p6887_p2, %p6886_p1 }
  0x32   : > { %v372_v49 = vrot.slane %v370_v39, 4  ;;  %6017 = vmatmul.mubr.msk.bf16.vlgmr.msra.gmra.mrb[0].mxu1 %vm742_vm3, %v5287_v42  ;;  %v2149_v52 = vsel %vm7094_vm4, %v2144_v43, %v2148_v21  ;;  %v2161_v55 = vshrl.u32 %v5470_v40, 16  ;;  %v2164_v56 = vshll.u32 %v5470_v40, 16  ;;  %v7181_v40 = vld [vmem:[%s7068_s21 + $0x38] sm:$0x1] }
  0x33   : > { %v363_v53 = vor.u32 %v362_v45, %v359_v44  ;;  %6049 = vmatpush3.bf16.msra.mxu1 %v7081_v17  ;;  %v2159_v57 = vsel %vm7094_vm4, %v2154_v47, %v2158_v27  ;;  %v378_v59 = vrot.slane %v376_v50, 5  ;;  %v2170_v61 = vshll.u32 %v7144_v46, 16  ;;  %p6889_p5 = pnand %p6888_p3, %p6882_p0 }
  0x34   : > { %v373_v58 = vor.u32 %v372_v49, %v368_v48  ;;  %v5514_v2 = vcombine.low %v2149_v52, %v2159_v57  ;;  %v2163_v5 = vrot.slane %v2161_v55, 4  ;;  %v2166_v6 = vrot.slane %v2164_v56, 5  ;;  %6580 = vmatprep.subr.msk.bf16.mxu1 %vm791_vm0, %v5366_v51  ;;  %v264_v52 = vld [vmem:[%s7068_s21 + $0x30] sm:$0xf] }
  0x35   : > { %v364_v4 = vrot.slane %v363_v53, 4  ;;  %v2172_v9 = vrot.slane %v2170_v61, 5  ;;  %v2174_v17 = vshrl.u32 %v7144_v46, 16  ;;  %v2180_v10 = vshll.u32 %v7153_v54, 16 }
  0x36   : > { %v374_v8 = vrot.slane %v373_v58, 4  ;;  %6153 = vmatmul.mubr.msk.bf16.vlgmr.msra.gmra.mrb[0].mxu0 %vm742_vm3, %v5514_v2  ;;  %v2167_v12 = vor.u32 %v2166_v6, %v2163_v5  ;;  %v381_v14 = vshrl.u32 %v262_v0, 16  ;;  %v384_v18 = vshll.u32 %v262_v0, 16  ;;  %v265_v58 = vld [vmem:[%s7068_s21 + $0x34] sm:$0xf] }
  0x37   : > { %v369_v11 = vsel %vm7094_vm4, %v364_v4, %v368_v48  ;;  %6185 = vmatpush3.bf16.msra.mxu0 %v7100_v37  ;;  %v2176_v20 = vrot.slane %v2174_v17, 4  ;;  %v2182_v21 = vrot.slane %v2180_v10, 5  ;;  %v390_v23 = vshll.u32 %v263_v7, 16  ;;  %v293_v4 = vld [vmem:[%s7068_s21 + $0x38] sm:$0x1] }
  0x38   : > { %v379_v19 = vsel %vm7094_vm4, %v374_v8, %v378_v59  ;;  %v2168_v27 = vrot.slane %v2167_v12, 4  ;;  %v383_v29 = vrot.slane %v381_v14, 4  ;;  %v386_v31 = vrot.slane %v384_v18, 5  ;;  %6585 = vmatprep.subr.msk.bf16.mxu0 %vm791_vm0, %v7087_v26  ;;  %v5476_v12 = vld [vmem:[%s7068_s21 + $0x3c] sm:$0xf] }
  0x39   : > { %v5288_v25 = vcombine.low %v369_v11, %v379_v19  ;;  %v2177_v34 = vor.u32 %v2176_v20, %v2172_v9  ;;  %v392_v35 = vrot.slane %v390_v23, 5  ;;  %v394_v37 = vshrl.u32 %v263_v7, 16  ;;  %v7198_v20 = vld [vmem:[%s7068_s21 + $0x40] sm:$0xf] }
  0x3a   : > { %v400_v36 = vshll.u32 %v292_v13, 16  ;;  %v2173_v38 = vsel %vm7094_vm4, %v2168_v27, %v2172_v9  ;;  %v387_v39 = vor.u32 %v386_v31, %v383_v29  ;;  %v2185_v42 = vshrl.u32 %v5473_v24, 16 }
  0x3b   : > { %6020 = vmatprep.mubr.msk.bf16.mxu1 %vm742_vm3, %v5288_v25  ;;  %v2188_v43 = vshll.u32 %v5473_v24, 16  ;;  %v2178_v44 = vrot.slane %v2177_v34, 4  ;;  %v396_v45 = vrot.slane %v394_v37, 4  ;;  %v2194_v26 = vshll.u32 %v7173_v33, 16  ;;  %v7203_v34 = vld [vmem:[%s7068_s21 + $0x44] sm:$0x1] }
  0x3c   : > { %v402_v47 = vrot.slane %v400_v36, 5  ;;  %v388_v48 = vrot.slane %v387_v39, 4  ;;  %v2187_v49 = vrot.slane %v2185_v42, 4  ;;  %v2198_v51 = vshrl.u32 %v7173_v33, 16  ;;  %v266_v42 = vld [vmem:[%s7068_s21 + $0x3c] sm:$0xf] }
  0x3d   : > { %v2190_v50 = vrot.slane %v2188_v43, 5  ;;  %v2183_v53 = vsel %vm7094_vm4, %v2178_v44, %v2182_v21  ;;  %v397_v55 = vor.u32 %v396_v45, %v392_v35  ;;  %v2196_v56 = vrot.slane %v2194_v26, 5  ;;  %v267_v26 = vld [vmem:[%s7068_s21 + $0x40] sm:$0xf] }
  0x3e   : > { %v2204_v57 = vshll.u32 %v7181_v40, 16  ;;  %v5515_v59 = vcombine.low %v2173_v38, %v2183_v53  ;;  %v393_v61 = vsel %vm7094_vm4, %v388_v48, %v392_v35  ;;  %v2200_v2 = vrot.slane %v2198_v51, 4 }
  0x3f   : > { %v2191_v0 = vor.u32 %v2190_v50, %v2187_v49  ;;  %v398_v5 = vrot.slane %v397_v55, 4  ;;  %v405_v7 = vshrl.u32 %v264_v52, 16  ;;  %v408_v8 = vshll.u32 %v264_v52, 16 }
  0x40   : > { %v2206_v6 = vrot.slane %v2204_v57, 5  ;;  %6156 = vmatprep.mubr.msk.bf16.mxu0 %vm742_vm3, %v5515_v59  ;;  %v2201_v17 = vor.u32 %v2200_v2, %v2196_v56  ;;  %v414_v10 = vshll.u32 %v265_v58, 16  ;;  %v418_v11 = vshrl.u32 %v265_v58, 16  ;;  %v5479_v2 = vld [vmem:[%s7068_s21 + $0x48] sm:$0xf] }
  0x41   : > { %v2192_v9 = vrot.slane %v2191_v0, 4  ;;  %v403_v13 = vsel %vm7094_vm4, %v398_v5, %v402_v47  ;;  %v407_v14 = vrot.slane %v405_v7, 4  ;;  %v410_v18 = vrot.slane %v408_v8, 5  ;;  %v7221_v8 = vld [vmem:[%s7068_s21 + $0x4c] sm:$0xf] }
  0x42   : > { %v424_v19 = vshll.u32 %v293_v4, 16  ;;  %v5289_v21 = vcombine.low %v393_v61, %v403_v13  ;;  %v2202_v24 = vrot.slane %v2201_v17, 4  ;;  %v416_v25 = vrot.slane %v414_v10, 5  ;;  %v294_v61 = vld [vmem:[%s7068_s21 + $0x44] sm:$0x1] }
  0x43   : > { %v2197_v23 = vsel %vm7094_vm4, %v2192_v9, %v2196_v56  ;;  %v411_v27 = vor.u32 %v410_v18, %v407_v14  ;;  %v420_v29 = vrot.slane %v418_v11, 4  ;;  %v2209_v35 = vshrl.u32 %v5476_v12, 16 }
  0x44   : > { %v426_v31 = vrot.slane %v424_v19, 5  ;;  %6021 = vmatmul.mubr.msk.bf16.gmra.mrb[4].mxu1 %vm742_vm3, %v5289_v21  ;;  %v2207_v37 = vsel %vm7094_vm4, %v2202_v24, %v2206_v6  ;;  %v2212_v36 = vshll.u32 %v5476_v12, 16  ;;  %v2218_v38 = vshll.u32 %v7198_v20, 16 }
  0x45   : > { %v2222_v39 = vshrl.u32 %v7198_v20, 16  ;;  %v5516_v43 = vcombine.low %v2197_v23, %v2207_v37  ;;  %v412_v44 = vrot.slane %v411_v27, 4  ;;  %v421_v45 = vor.u32 %v420_v29, %v416_v25  ;;  %v7229_v23 = vld [vmem:[%s7068_s21 + $0x50] sm:$0x1]  ;;  %v7233_v27 = vld [vmem:[%s7068_s21 + $0x48] sm:$0xf] }
  0x46   : > { %v2211_v47 = vrot.slane %v2209_v35, 4  ;;  %v2214_v48 = vrot.slane %v2212_v36, 5  ;;  %v2220_v49 = vrot.slane %v2218_v38, 5  ;;  %v2228_v51 = vshll.u32 %v7203_v34, 16  ;;  %v7236_v36 = vld [vmem:[%s7068_s21 + $0x4c] sm:$0xf] }
  0x47   : > { %v2224_v50 = vrot.slane %v2222_v39, 4  ;;  %6157 = vmatmul.mubr.msk.bf16.gmra.mrb[4].mxu0 %vm742_vm3, %v5516_v43  ;;  %v417_v52 = vsel %vm7094_vm4, %v412_v44, %v416_v25  ;;  %v422_v53 = vrot.slane %v421_v45, 4  ;;  %v429_v55 = vshrl.u32 %v266_v42, 16 }
  0x48   : > { %v432_v56 = vshll.u32 %v266_v42, 16  ;;  %v2215_v57 = vor.u32 %v2214_v48, %v2211_v47  ;;  %v2230_v59 = vrot.slane %v2228_v51, 5  ;;  %v438_v0 = vshll.u32 %v267_v26, 16 }
  0x49   : > { %v2225_v58 = vor.u32 %v2224_v50, %v2220_v49  ;;  %v427_v4 = vsel %vm7094_vm4, %v422_v53, %v426_v31  ;;  %v431_v5 = vrot.slane %v429_v55, 4  ;;  %v442_v7 = vshrl.u32 %v267_v26, 16  ;;  %v295_v26 = vld [vmem:[%s7068_s21 + $0x50] sm:$0x1]  ;;  %v5482_v53 = vld [vmem:[%s7068_s21 + $0x54] sm:$0xf] }
  0x4a   : > { %v434_v6 = vrot.slane %v432_v56, 5  ;;  %v5290_v9 = vcombine.low %v417_v52, %v427_v4  ;;  %v2216_v17 = vrot.slane %v2215_v57, 4  ;;  %v440_v11 = vrot.slane %v438_v0, 5  ;;  %v7252_v4 = vld [vmem:[%s7068_s21 + $0x58] sm:$0xf] }
  0x4b   : > { %v2226_v10 = vrot.slane %v2225_v58, 4  ;;  %v444_v13 = vrot.slane %v442_v7, 4  ;;  %v448_v14 = vshll.u32 %v294_v61, 16  ;;  %v2233_v18 = vshrl.u32 %v5479_v2, 16 }
  0x4c   : > { %v435_v12 = vor.u32 %v434_v6, %v431_v5  ;;  %6024 = vmatprep.mubr.msk.bf16.mxu1 %vm742_vm3, %v5290_v9  ;;  %v2221_v19 = vsel %vm7094_vm4, %v2216_v17, %v2220_v49  ;;  %v2236_v24 = vshll.u32 %v5479_v2, 16  ;;  %v2242_v25 = vshll.u32 %v7221_v8, 16 }
  0x4d   : > { %v2231_v21 = vsel %vm7094_vm4, %v2226_v10, %v2230_v59  ;;  %v445_v35 = vor.u32 %v444_v13, %v440_v11  ;;  %v450_v37 = vrot.slane %v448_v14, 5  ;;  %v2235_v38 = vrot.slane %v2233_v18, 4 }
  0x4e   : > { %v5517_v29 = vcombine.low %v2221_v19, %v2231_v21  ;;  %v436_v31 = vrot.slane %v435_v12, 4  ;;  %v2238_v39 = vrot.slane %v2236_v24, 5  ;;  %v2244_v42 = vrot.slane %v2242_v25, 5  ;;  %v7258_v12 = vld [vmem:[%s7068_s21 + $0x5c] sm:$0x1] }
  0x4f   : > { %v2246_v43 = vshrl.u32 %v7221_v8, 16  ;;  %v446_v45 = vrot.slane %v445_v35, 4  ;;  %v2252_v47 = vshll.u32 %v7229_v23, 16  ;;  %v453_v48 = vshrl.u32 %v7233_v27, 16  ;;  %v7262_v24 = vld [vmem:[%s7068_s21 + $0x54] sm:$0xf] }
  0x50   : > { %6160 = vmatprep.mubr.msk.bf16.mxu0 %vm742_vm3, %v5517_v29  ;;  %v441_v44 = vsel %vm7094_vm4, %v436_v31, %v440_v11  ;;  %v2239_v49 = vor.u32 %v2238_v39, %v2235_v38  ;;  %v456_v51 = vshll.u32 %v7233_v27, 16  ;;  %v462_v52 = vshll.u32 %v7236_v36, 16 }
  0x51   : > { %v2248_v50 = vrot.slane %v2246_v43, 4  ;;  %v451_v55 = vsel %vm7094_vm4, %v446_v45, %v450_v37  ;;  %v2254_v56 = vrot.slane %v2252_v47, 5  ;;  %v455_v57 = vrot.slane %v453_v48, 4  ;;  %v7268_v37 = vld [vmem:[%s7068_s21 + $0x58] sm:$0xf] }
  0x52   : > { %v466_v58 = vshrl.u32 %v7236_v36, 16  ;;  %v5291_v59 = vcombine.low %v441_v44, %v451_v55  ;;  %v2240_v61 = vrot.slane %v2239_v49, 4  ;;  %v458_v2 = vrot.slane %v456_v51, 5 }
  0x53   : > { %v2249_v0 = vor.u32 %v2248_v50, %v2244_v42  ;;  %v464_v5 = vrot.slane %v462_v52, 5  ;;  %v472_v7 = vshll.u32 %v295_v26, 16  ;;  %v2257_v9 = vshrl.u32 %v5482_v53, 16  ;;  %v296_v26 = vld [vmem:[%s7068_s21 + $0x5c] sm:$0x1] }
  0x54   : > { %v468_v6 = vrot.slane %v466_v58, 4  ;;  %6025 = vmatmul.mubr.msk.bf16.gmra.mrb[8].mxu1 %vm742_vm3, %v5291_v59  ;;  %v2245_v17 = vsel %vm7094_vm4, %v2240_v61, %v2244_v42  ;;  %v459_v11 = vor.u32 %v458_v2, %v455_v57  ;;  %v2260_v13 = vshll.u32 %v5482_v53, 16  ;;  %v5485_v53 = vld [vmem:[%s7068_s21 + $0x60] sm:$0xf]  ;;  %v7282_v59 = vld [vmem:[%s7068_s21 + $0x64] sm:$0xf] }
  0x55   : > { %v2250_v10 = vrot.slane %v2249_v0, 4  ;;  %v474_v18 = vrot.slane %v472_v7, 5  ;;  %v2259_v19 = vrot.slane %v2257_v9, 4  ;;  %v2266_v21 = vshll.u32 %v7252_v4, 16  ;;  %v7289_v9 = vld [vmem:[%s7068_s21 + $0x68] sm:$0x1] }
  0x56   : > { %v469_v14 = vor.u32 %v468_v6, %v464_v5  ;;  %v460_v29 = vrot.slane %v459_v11, 4  ;;  %v2262_v31 = vrot.slane %v2260_v13, 5  ;;  %v2270_v35 = vshrl.u32 %v7252_v4, 16 }
  0x57   : > { %v2255_v25 = vsel %vm7094_vm4, %v2250_v10, %v2254_v56  ;;  %v2268_v42 = vrot.slane %v2266_v21, 5  ;;  %v2276_v43 = vshll.u32 %v7258_v12, 16  ;;  %v477_v48 = vshrl.u32 %v7262_v24, 16 }
  0x58   : > { %v5518_v38 = vcombine.low %v2245_v17, %v2255_v25  ;;  %v470_v39 = vrot.slane %v469_v14, 4  ;;  %v465_v44 = vsel %vm7094_vm4, %v460_v29, %v464_v5  ;;  %v2263_v45 = vor.u32 %v2262_v31, %v2259_v19  ;;  %v7293_v19 = vld [vmem:[%s7068_s21 + $0x60] sm:$0xf] }
  0x59   : > { %v2272_v47 = vrot.slane %v2270_v35, 4  ;;  %v2278_v50 = vrot.slane %v2276_v43, 5  ;;  %v480_v51 = vshll.u32 %v7262_v24, 16  ;;  %v486_v52 = vshll.u32 %v7268_v37, 16  ;;  %v7299_v35 = vld [vmem:[%s7068_s21 + $0x64] sm:$0xf] }
  0x5a   : > { %6161 = vmatmul.mubr.msk.bf16.gmra.mrb[8].mxu0 %vm742_vm3, %v5518_v38  ;;  %v475_v49 = vsel %vm7094_vm4, %v470_v39, %v474_v18  ;;  %v2264_v56 = vrot.slane %v2263_v45, 4  ;;  %v479_v58 = vrot.slane %v477_v48, 4  ;;  %v490_v2 = vshrl.u32 %v7268_v37, 16 }
  0x5b   : > { %v5292_v55 = vcombine.low %v465_v44, %v475_v49  ;;  %v2273_v57 = vor.u32 %v2272_v47, %v2268_v42  ;;  %v482_v61 = vrot.slane %v480_v51, 5  ;;  %v488_v0 = vrot.slane %v486_v52, 5 }
  0x5c   : > { %v496_v5 = vshll.u32 %v296_v26, 16  ;;  %v2269_v6 = vsel %vm7094_vm4, %v2264_v56, %v2268_v42  ;;  %v2281_v17 = vshrl.u32 %v5485_v53, 16  ;;  %v2284_v10 = vshll.u32 %v5485_v53, 16 }
  0x5d   : > { %6028 = vmatprep.mubr.msk.bf16.mxu1 %vm742_vm3, %v5292_v55  ;;  %v2274_v7 = vrot.slane %v2273_v57, 4  ;;  %v483_v11 = vor.u32 %v482_v61, %v479_v58  ;;  %v492_v13 = vrot.slane %v490_v2, 4  ;;  %v2290_v18 = vshll.u32 %v7282_v59, 16  ;;  %v5545_v58 = vld [vmem:[%s7068_s21 + $0xc] sm:$0xe] }
  0x5e   : > { %v498_v14 = vrot.slane %v496_v5, 5  ;;  %v2283_v25 = vrot.slane %v2281_v17, 4  ;;  %v2286_v29 = vrot.slane %v2284_v10, 5  ;;  %v2294_v31 = vshrl.u32 %v7282_v59, 16 }
  0x5f   : > { %v2279_v21 = vsel %vm7094_vm4, %v2274_v7, %v2278_v50  ;;  %v484_v39 = vrot.slane %v483_v11, 4  ;;  %v493_v42 = vor.u32 %v492_v13, %v488_v0  ;;  %v2292_v43 = vrot.slane %v2290_v18, 5  ;;  %v297_v50 = vld [vmem:[%s7068_s21 + $0x68] sm:$0x1] }
  0x60   : > { %v5519_v38 = vcombine.low %v2269_v6, %v2279_v21  ;;  %v2287_v44 = vor.u32 %v2286_v29, %v2283_v25  ;;  %v2296_v45 = vrot.slane %v2294_v31, 4  ;;  %v2300_v47 = vshll.u32 %v7289_v9, 16  ;;  %v7327_v29 = vld [vmem:[%s7068_s21 + $0x70] sm:$0xf] }
  0x61   : > { %v501_v26 = vshrl.u32 %v7293_v19, 16  ;;  %v489_v48 = vsel %vm7094_vm4, %v484_v39, %v488_v0  ;;  %v494_v49 = vrot.slane %v493_v42, 4  ;;  %v504_v51 = vshll.u32 %v7293_v19, 16  ;;  %v7314_v0 = vld [vmem:[%s7068_s21 + $0x6c] sm:$0xf] }
  0x62   : > { %6164 = vmatprep.mubr.msk.bf16.mxu0 %vm742_vm3, %v5519_v38  ;;  %v510_v52 = vshll.u32 %v7299_v35, 16  ;;  %v2288_v53 = vrot.slane %v2287_v44, 4  ;;  %v2297_v55 = vor.u32 %v2296_v45, %v2292_v43  ;;  %v2302_v56 = vrot.slane %v2300_v47, 5 }
  0x63   : > { %v503_v57 = vrot.slane %v501_v26, 4  ;;  %v499_v61 = vsel %vm7094_vm4, %v494_v49, %v498_v14  ;;  %v506_v2 = vrot.slane %v504_v51, 5  ;;  %v514_v6 = vshrl.u32 %v7299_v35, 16  ;;  %v298_v26 = vld [vmem:[%s7068_s21 + $0x74] sm:$0x1] }
  0x64   : > { %v512_v5 = vrot.slane %v510_v52, 5  ;;  %v5293_v7 = vcombine.low %v489_v48, %v499_v61  ;;  %v2293_v17 = vsel %vm7094_vm4, %v2288_v53, %v2292_v43  ;;  %v2298_v10 = vrot.slane %v2297_v55, 4  ;;  %v5546_v48 = vld [vmem:[%s7068_s21 + $0x18] sm:$0xe] }
  0x65   : > { %v520_v11 = vshll.u32 %v297_v50, 16  ;;  %v507_v14 = vor.u32 %v506_v2, %v503_v57  ;;  %v516_v18 = vrot.slane %v514_v6, 4  ;;  %v5561_v21 = vrot.slane %v5545_v58, 9  ;;  %v7346_v53 = vld [vmem:[%s7068_s21 + $0x78] sm:$0xf] }
  0x66   : > { %v2858_v25 = vrot.slane %v2856_v62, 4  ;;  %6029 = vmatmul.mubr.msk.bf16.gmra.mrb[12].mxu1 %vm742_vm3, %v5293_v7  ;;  %v2303_v31 = vsel %vm7094_vm4, %v2298_v10, %v2302_v56  ;;  %v525_v39 = vshrl.u32 %v7314_v0, 16  ;;  %v528_v42 = vshll.u32 %v7314_v0, 16  ;;  %v299_v57 = vld [vmem:[%s7068_s21 + $0x80] sm:$0x1] }
  0x67   : > { %v522_v38 = vrot.slane %v520_v11, 5  ;;  %v5520_v43 = vcombine.low %v2293_v17, %v2303_v31  ;;  %v508_v44 = vrot.slane %v507_v14, 4  ;;  %v517_v45 = vor.u32 %v516_v18, %v512_v5  ;;  %v5547_v10 = vld [vmem:[%s7068_s21 + $0x24] sm:$0xe] }
  0x68   : > { %v2857_v47 = vsel %vm7320_vm7, %v5561_v21, %v2856_v62  ;;  %v2860_v49 = vsel %vm7320_vm7, %v2858_v25, %v2859_v63  ;;  %v527_v50 = vrot.slane %v525_v39, 4  ;;  %v530_v51 = vrot.slane %v528_v42, 5  ;;  %v7372_v39 = vld [vmem:[%s7068_s21 + $0x84] sm:$0xf] }
  0x69   : > { %v534_v52 = vshll.u32 %v7327_v29, 16  ;;  %6165 = vmatmul.mubr.msk.bf16.gmra.mrb[12].mxu0 %vm742_vm3, %v5520_v43  ;;  %v513_v15 = vsel %vm7094_vm4, %v508_v44, %v512_v5  ;;  %v518_v62 = vrot.slane %v517_v45, 4  ;;  %v5578_v55 = vcombine.low %v2857_v47, %v2860_v49  ;;  %v7380_v43 = vld [vmem:[%s7068_s21 + $0x88] sm:$0xf] }
  0x6a   : > { %v538_v56 = vshrl.u32 %v7327_v29, 16  ;;  %v531_v63 = vor.u32 %v530_v51, %v527_v50  ;;  %v544_v61 = vshll.u32 %v298_v26, 16  ;;  %v5562_v2 = vrot.slane %v5546_v48, 9 }
  0x6b   : > { %v536_v58 = vrot.slane %v534_v52, 5  ;;  %v523_v6 = vsel %vm7094_vm4, %v518_v62, %v522_v38  ;;  %6186 = vmatprep.mubr.msk.bf16.mxu0 %vm742_vm3, %v5578_v55  ;;  %v2867_v5 = vsel %vm7320_vm7, %v7137_v30, %v2866_v28  ;;  %v549_v17 = vshrl.u32 %v7346_v53, 16  ;;  %v300_v52 = vld [vmem:[%s7068_s21 + $0x8c] sm:$0x1] }
  0x6c   : > { %v540_v7 = vrot.slane %v538_v56, 4  ;;  %v5294_v11 = vcombine.low %v513_v15, %v523_v6  ;;  %v532_v14 = vrot.slane %v531_v63, 4  ;;  %v546_v18 = vrot.slane %v544_v61, 5 }
  0x6d   : > { %v2864_v21 = vsel %vm7320_vm7, %v5562_v2, %v2863_v22  ;;  %v551_v38 = vrot.slane %v549_v17, 4  ;;  %v552_v1 = vshll.u32 %v7346_v53, 16  ;;  %v558_v30 = vshll.u32 %v7353_v16, 16  ;;  %v7385_v22 = vld [vmem:[%s9059_s1 + $0xe] sm:$0x3] }
  0x6e   : > { %v541_v25 = vor.u32 %v540_v7, %v536_v58  ;;  %v5579_v31 = vcombine.low %v2864_v21, %v2867_v5  ;;  %6032 = vmatprep.mubr.msk.bf16.mxu1 %vm742_vm3, %v5294_v11  ;;  %v537_v28 = vsel %vm7094_vm4, %v532_v14, %v536_v58  ;;  %v562_v60 = vshrl.u32 %v7353_v16, 16  ;;  %v7404_v5 = vld [vmem:[%s7068_s21 + $0x90] sm:$0xf] }
  0x6f   : > { %v568_v42 = vshll.u32 %v299_v57, 16  ;;  %v554_v45 = vrot.slane %v552_v1, 5  ;;  %v5563_v47 = vrot.slane %v5547_v10, 9  ;;  %v2870_v26 = vrot.slane %v7144_v46, 5  ;;  %v5548_v57 = vld [vmem:[%s7068_s21 + $0x30] sm:$0xe] }
  0x70   : > { %v542_v44 = vrot.slane %v541_v25, 4  ;;  %v560_v48 = vrot.slane %v558_v30, 5  ;;  %v564_v49 = vrot.slane %v562_v60, 4  ;;  %v2873_v51 = vrot.slane %v7153_v54, 5  ;;  %v7416_v30 = vld [vmem:[%s7068_s21 + $0x94] sm:$0xf] }
  0x71   : > { %v570_v50 = vrot.slane %v568_v42, 5  ;;  %6187 = vmatmul.mubr.msk.bf16.vlgmr.msra.gmra.mrb[0].mxu0 %vm742_vm3, %v5579_v31  ;;  %v555_v62 = vor.u32 %v554_v45, %v551_v38  ;;  %v2871_v55 = vsel %vm7320_vm7, %v5563_v47, %v2870_v26  ;;  %v2872_v56 = vrot.slane %v2870_v26, 4  ;;  %v301_v60 = vld [vmem:[%s7068_s21 + $0x98] sm:$0x1]  ;;  %v5549_v26 = vld [vmem:[%s7068_s21 + $0x3c] sm:$0xe] }
  0x72   : > { %v547_v15 = vsel %vm7094_vm4, %v542_v44, %v546_v18  ;;  %6219 = vmatpush3.bf16.msra.mxu0 %v7104_v41  ;;  %v565_v46 = vor.u32 %v564_v49, %v560_v48  ;;  %v573_v58 = vshrl.u32 %v7372_v39, 16  ;;  %v576_v54 = vshll.u32 %v7372_v39, 16 }
  0x73   : > { %v5295_v63 = vcombine.low %v537_v28, %v547_v15  ;;  %v556_v61 = vrot.slane %v555_v62, 4  ;;  %v2874_v2 = vsel %vm7320_vm7, %v2872_v56, %v2873_v51  ;;  %v582_v6 = vshll.u32 %v7380_v43, 16  ;;  %6586 = vmatprep.subr.msk.bf16.mxu0 %vm791_vm0, %v7385_v22 }
  0x74   : > { %v586_v7 = vshrl.u32 %v7380_v43, 16  ;;  %v566_v41 = vrot.slane %v565_v46, 4  ;;  %v5580_v17 = vcombine.low %v2871_v55, %v2874_v2  ;;  %v575_v10 = vrot.slane %v573_v58, 4  ;;  %v7436_v46 = vld [vmem:[%s7068_s21 + $0xa0] sm:$0xf] }
  0x75   : > { %6033 = vmatmul.mubr.msk.bf16.gmra.mrb[16].mxu1 %vm742_vm3, %v5295_v63  ;;  %v578_v11 = vrot.slane %v576_v54, 5  ;;  %v561_v14 = vsel %vm7094_vm4, %v556_v61, %v560_v48  ;;  %v584_v18 = vrot.slane %v582_v6, 5  ;;  %v592_v25 = vshll.u32 %v300_v52, 16  ;;  %v7425_v52 = vld [vmem:[%s7068_s21 + $0x9c] sm:$0xf] }
  0x76   : > { %v588_v21 = vrot.slane %v586_v7, 4  ;;  %v571_v31 = vsel %vm7094_vm4, %v566_v41, %v570_v50  ;;  %6190 = vmatprep.mubr.msk.bf16.mxu0 %vm742_vm3, %v5580_v17  ;;  %v5564_v1 = vrot.slane %v5548_v57, 9  ;;  %v2877_v28 = vrot.slane %v7173_v33, 5 }
  0x77   : > { %v579_v38 = vor.u32 %v578_v11, %v575_v10  ;;  %v5296_v42 = vcombine.low %v561_v14, %v571_v31  ;;  %v594_v45 = vrot.slane %v592_v25, 5  ;;  %v2880_v47 = vrot.slane %v7181_v40, 5  ;;  %v302_v10 = vld [vmem:[%s7068_s21 + $0xa4] sm:$0x1]  ;;  %v5550_v11 = vld [vmem:[%s7068_s21 + $0x48] sm:$0xe] }
  0x78   : > { %v589_v44 = vor.u32 %v588_v21, %v584_v18  ;;  %v2878_v49 = vsel %vm7320_vm7, %v5564_v1, %v2877_v28  ;;  %v2879_v50 = vrot.slane %v2877_v28, 4  ;;  %v597_v51 = vshrl.u32 %v7404_v5, 16 }
  0x79   : > { %v580_v48 = vrot.slane %v579_v38, 4  ;;  %6036 = vmatprep.mubr.msk.bf16.mxu1 %vm742_vm3, %v5296_v42  ;;  %v600_v15 = vshll.u32 %v7404_v5, 16  ;;  %v606_v62 = vshll.u32 %v7416_v30, 16  ;;  %v610_v40 = vshrl.u32 %v7416_v30, 16 }
  0x7a   : > { %v590_v33 = vrot.slane %v589_v44, 4  ;;  %v2881_v56 = vsel %vm7320_vm7, %v2879_v50, %v2880_v47  ;;  %v599_v57 = vrot.slane %v597_v51, 4  ;;  %v616_v63 = vshll.u32 %v301_v60, 16 }
  0x7b   : > { %v585_v55 = vsel %vm7094_vm4, %v580_v48, %v584_v18  ;;  %v5581_v54 = vcombine.low %v2878_v49, %v2881_v56  ;;  %v602_v61 = vrot.slane %v600_v15, 5  ;;  %v608_v2 = vrot.slane %v606_v62, 5  ;;  %v7462_v56 = vld [vmem:[%s7068_s21 + $0xac] sm:$0xf] }
  0x7c   : > { %v595_v58 = vsel %vm7094_vm4, %v590_v33, %v594_v45  ;;  %v612_v7 = vrot.slane %v610_v40, 4  ;;  %v618_v41 = vrot.slane %v616_v63, 5  ;;  %v5565_v17 = vrot.slane %v5549_v26, 9  ;;  %v7457_v33 = vld [vmem:[%s7068_s21 + $0xa8] sm:$0xf] }
  0x7d   : > { %v5297_v6 = vcombine.low %v585_v55, %v595_v58  ;;  %6191 = vmatmul.mubr.msk.bf16.gmra.mrb[4].mxu0 %vm742_vm3, %v5581_v54  ;;  %v603_v14 = vor.u32 %v602_v61, %v599_v57  ;;  %v2884_v18 = vrot.slane %v7198_v20, 5  ;;  %v2887_v21 = vrot.slane %v7203_v34, 5  ;;  %v303_v61 = vld [vmem:[%s7068_s21 + $0xb0] sm:$0x1] }
  0x7e   : > { %v621_v25 = vshrl.u32 %v7425_v52, 16  ;;  %v613_v31 = vor.u32 %v612_v7, %v608_v2  ;;  %v624_v38 = vshll.u32 %v7425_v52, 16  ;;  %v630_v1 = vshll.u32 %v7436_v46, 16 }
  0x7f   : > { %6037 = vmatmul.mubr.msk.bf16.gmra.mrb[20].mxu1 %vm742_vm3, %v5297_v6  ;;  %v634_v28 = vshrl.u32 %v7436_v46, 16  ;;  %v604_v60 = vrot.slane %v603_v14, 4  ;;  %v2885_v42 = vsel %vm7320_vm7, %v5565_v17, %v2884_v18  ;;  %v2886_v20 = vrot.slane %v2884_v18, 4  ;;  %v7477_v14 = vld [vmem:[%s7068_s21 + $0xb4] sm:$0xf] }
  0x80   : > { %v623_v44 = vrot.slane %v621_v25, 4  ;;  %v614_v34 = vrot.slane %v613_v31, 4  ;;  %v626_v45 = vrot.slane %v624_v38, 5  ;;  %v632_v47 = vrot.slane %v630_v1, 5 }
  0x81   : > { %v636_v26 = vrot.slane %v634_v28, 4  ;;  %v609_v48 = vsel %vm7094_vm4, %v604_v60, %v608_v2  ;;  %v2888_v49 = vsel %vm7320_vm7, %v2886_v20, %v2887_v21  ;;  %v640_v50 = vshll.u32 %v302_v10, 16  ;;  %v5551_v2 = vld [vmem:[%s7068_s21 + $0x54] sm:$0xe] }
  0x82   : > { %v5566_v51 = vrot.slane %v5550_v11, 9  ;;  %v619_v15 = vsel %vm7094_vm4, %v614_v34, %v618_v41  ;;  %v5582_v62 = vcombine.low %v2885_v42, %v2888_v49  ;;  %v627_v40 = vor.u32 %v626_v45, %v623_v44  ;;  %v7486_v42 = vld [vmem:[%s7068_s21 + $0xb8] sm:$0xf]  ;;  %v304_v49 = vld [vmem:[%s7068_s21 + $0xbc] sm:$0x1] }
  0x83   : > { %v637_v55 = vor.u32 %v636_v26, %v632_v47  ;;  %v5298_v57 = vcombine.low %v609_v48, %v619_v15  ;;  %v642_v63 = vrot.slane %v640_v50, 5  ;;  %v2891_v58 = vrot.slane %v7221_v8, 5 }
  0x84   : > { %v2894_v54 = vrot.slane %v7229_v23, 5  ;;  %6194 = vmatprep.mubr.msk.bf16.mxu0 %vm742_vm3, %v5582_v62  ;;  %v628_v6 = vrot.slane %v627_v40, 4  ;;  %v645_v41 = vshrl.u32 %v7457_v33, 16  ;;  %v648_v17 = vshll.u32 %v7457_v33, 16 }
  0x85   : > { %v638_v7 = vrot.slane %v637_v55, 4  ;;  %6040 = vmatprep.mubr.msk.bf16.mxu1 %vm742_vm3, %v5298_v57  ;;  %v2892_v10 = vsel %vm7320_vm7, %v5566_v51, %v2891_v58  ;;  %v2893_v11 = vrot.slane %v2891_v58, 4  ;;  %v654_v8 = vshll.u32 %v7462_v56, 16  ;;  %v5552_v55 = vld [vmem:[%s7068_s21 + $0x60] sm:$0xe] }
  0x86   : > { %v658_v23 = vshrl.u32 %v7462_v56, 16  ;;  %v633_v18 = vsel %vm7094_vm4, %v628_v6, %v632_v47  ;;  %v647_v25 = vrot.slane %v645_v41, 4  ;;  %v650_v31 = vrot.slane %v648_v17, 5  ;;  %v5553_v6 = vld [vmem:[%s7068_s21 + $0x6c] sm:$0xe] }
  0x87   : > { %v643_v21 = vsel %vm7094_vm4, %v638_v7, %v642_v63  ;;  %v2895_v1 = vsel %vm7320_vm7, %v2893_v11, %v2894_v54  ;;  %v656_v28 = vrot.slane %v654_v8, 5  ;;  %v664_v34 = vshll.u32 %v303_v61, 16  ;;  %v5489_v11 = vld [vmem:[%s7068_s21 + $0x70] sm:$0xf]  ;;  %v5490_v8 = vld [vmem:[%s7068_s21 + $0x74] sm:$0x1] }
  0x88   : > { %v5299_v38 = vcombine.low %v633_v18, %v643_v21  ;;  %v660_v60 = vrot.slane %v658_v23, 4  ;;  %v5583_v20 = vcombine.low %v2892_v10, %v2895_v1  ;;  %v651_v44 = vor.u32 %v650_v31, %v647_v25 }
  0x89   : > { %v5567_v45 = vrot.slane %v5551_v2, 9  ;;  %v2898_v26 = vrot.slane %v7252_v4, 5  ;;  %v2901_v48 = vrot.slane %v7258_v12, 5  ;;  %v669_v50 = vshrl.u32 %v7477_v14, 16 }
  0x8a   : > { %6041 = vmatmul.mubr.msk.bf16.gmra.mrb[24].mxu1 %vm742_vm3, %v5299_v38  ;;  %v661_v47 = vor.u32 %v660_v60, %v656_v28  ;;  %6195 = vmatmul.mubr.msk.bf16.gmra.mrb[8].mxu0 %vm742_vm3, %v5583_v20  ;;  %v652_v51 = vrot.slane %v651_v44, 4  ;;  %v666_v15 = vrot.slane %v664_v34, 5  ;;  %v672_v62 = vshll.u32 %v7477_v14, 16 }
  0x8b   : > { %v678_v40 = vshll.u32 %v7486_v42, 16  ;;  %v2899_v4 = vsel %vm7320_vm7, %v5567_v45, %v2898_v26  ;;  %v2900_v12 = vrot.slane %v2898_v26, 4  ;;  %v671_v63 = vrot.slane %v669_v50, 4 }
  0x8c   : > { %v662_v57 = vrot.slane %v661_v47, 4  ;;  %v657_v58 = vsel %vm7094_vm4, %v652_v51, %v656_v28  ;;  %v674_v54 = vrot.slane %v672_v62, 5  ;;  %v682_v2 = vshrl.u32 %v7486_v42, 16  ;;  %v5554_v47 = vld [vmem:[%s7068_s21 + $0x78] sm:$0xe] }
  0x8d   : > { %v680_v61 = vrot.slane %v678_v40, 5  ;;  %v2902_v41 = vsel %vm7320_vm7, %v2900_v12, %v2901_v48  ;;  %v688_v17 = vshll.u32 %v304_v49, 16  ;;  %v5568_v10 = vrot.slane %v5552_v55, 9  ;;  %v6822_v51 = vld [vmem:[%s7068_s21] sm:$0xf] }
  0x8e   : > { %v667_v7 = vsel %vm7094_vm4, %v662_v57, %v666_v15  ;;  %v5584_v18 = vcombine.low %v2899_v4, %v2902_v41  ;;  %v675_v21 = vor.u32 %v674_v54, %v671_v63  ;;  %v684_v25 = vrot.slane %v682_v2, 4  ;;  %v7524_v15 = vld [vmem:[%s7068_s21 + $0x4] sm:$0xf]  ;;  %v7528_v40 = vld [vmem:[%s7068_s21 + $0x7c] sm:$0xf] }
  0x8f   : > { %v5300_v23 = vcombine.low %v657_v58, %v667_v7  ;;  %v690_v31 = vrot.slane %v688_v17, 5  ;;  %v2905_v38 = vrot.slane %v7282_v59, 5  ;;  %v2908_v1 = vrot.slane %v7289_v9, 5  ;;  %v7531_v55 = vld [vmem:[%s7068_s21 + $0x80] sm:$0x1] }
  0x90   : > { %v5569_v28 = vrot.slane %v5553_v6, 9  ;;  %6198 = vmatprep.mubr.msk.bf16.mxu0 %vm742_vm3, %v5584_v18  ;;  %v676_v60 = vrot.slane %v675_v21, 4  ;;  %v685_v20 = vor.u32 %v684_v25, %v680_v61  ;;  %v2912_v44 = vrot.slane %v5489_v11, 5  ;;  %v5495_v57 = vld [vmem:[%s7068_s21 + $0x88] sm:$0xf] }
  0x91   : > { %6044 = vmatprep.mubr.msk.bf16.mxu1 %vm742_vm3, %v5300_v23  ;;  %v2915_v34 = vrot.slane %v5490_v8, 5  ;;  %v2906_v45 = vsel %vm7320_vm7, %v5568_v10, %v2905_v38  ;;  %v2907_v59 = vrot.slane %v2905_v38, 4  ;;  %v5318_v62 = vcombine.low %v6822_v51, %v7524_v15  ;;  %v5496_v54 = vld [vmem:[%s7068_s21 + $0x8c] sm:$0x1]  ;;  %v5498_v17 = vld [vmem:[%s7068_s21 + $0x94] sm:$0xf] }
  0x92   : > { %v681_v9 = vsel %vm7094_vm4, %v676_v60, %v680_v61  ;;  %v686_v26 = vrot.slane %v685_v20, 4  ;;  %v2913_v48 = vsel %vm7320_vm7, %v5569_v28, %v2912_v44  ;;  %v2914_v49 = vrot.slane %v2912_v44, 4  ;;  %v5555_v61 = vld [vmem:[%s7068_s21 + $0x84] sm:$0xe]  ;;  %v5556_v23 = vld [vmem:[%s7068_s21 + $0x90] sm:$0xe] }
  0x93   : > { %v2909_v50 = vsel %vm7320_vm7, %v2907_v59, %v2908_v1  ;;  %v5570_v58 = vrot.slane %v5554_v47, 9  ;;  %v2919_v7 = vrot.slane %v7528_v40, 5  ;;  %v2922_v41 = vrot.slane %v7531_v55, 5  ;;  %v5499_v25 = vld [vmem:[%s7068_s21 + $0x98] sm:$0x1] }
  0x94   : > { %v691_v4 = vsel %vm7094_vm4, %v686_v26, %v690_v31  ;;  %v5585_v12 = vcombine.low %v2906_v45, %v2909_v50  ;;  %v2916_v63 = vsel %vm7320_vm7, %v2914_v49, %v2915_v34  ;;  %v5571_v10 = vrot.slane %v5555_v61, 9  ;;  %v5501_v31 = vld [vmem:[%s7068_s21 + $0xa0] sm:$0xf]  ;;  %v5502_v60 = vld [vmem:[%s7068_s21 + $0xa4] sm:$0x1] }
  0x95   : > { %v5301_v2 = vcombine.low %v681_v9, %v691_v4  ;;  %v5586_v6 = vcombine.low %v2913_v48, %v2916_v63  ;;  %v2926_v11 = vrot.slane %v5495_v57, 5  ;;  %v2929_v8 = vrot.slane %v5496_v54, 5  ;;  %v5557_v20 = vld [vmem:[%s7068_s21 + $0x9c] sm:$0xe]  ;;  %v6824_v44 = vld [vmem:[%s7068_s21 + $0xc] sm:$0xf] }
  0x96   : > { %6199 = vmatmul.mubr.msk.bf16.gmra.mrb[12].mxu0 %vm742_vm3, %v5585_v12  ;;  %v2920_v18 = vsel %vm7320_vm7, %v5570_v58, %v2919_v7  ;;  %v2921_v21 = vrot.slane %v2919_v7, 4  ;;  %v2933_v28 = vrot.slane %v5498_v17, 5  ;;  %v7558_v34 = vld [vmem:[%s7068_s21 + $0x10] sm:$0xf]  ;;  %v6826_v47 = vld [vmem:[%s7068_s21 + $0x18] sm:$0xf] }
  0x97   : > { %6045 = vmatmul.mubr.msk.bf16.gmra.mrb[28].mxu1 %vm742_vm3, %v5301_v2  ;;  %6202 = vmatprep.mubr.msk.bf16.mxu0 %vm742_vm3, %v5586_v6  ;;  %v2927_v38 = vsel %vm7320_vm7, %v5571_v10, %v2926_v11  ;;  %v2928_v1 = vrot.slane %v2926_v11, 4  ;;  %v5319_v45 = vcombine.low %v6824_v44, %v7558_v34  ;;  %v7565_v9 = vld [vmem:[%s7068_s21 + $0x1c] sm:$0xf]  ;;  %v5572_v48 = vrot.slane %v5556_v23, 9  ;;  %v5504_v57 = vld [vmem:[%s7068_s21 + $0xac] sm:$0xf] }
  0x98   : > { %6050 = vmatprep.mubr.msk.bf16.mxu1 %vm742_vm3, %v5318_v62  ;;  %v2923_v59 = vsel %vm7320_vm7, %v2921_v21, %v2922_v41  ;;  %v5320_v26 = vcombine.low %v6826_v47, %v7565_v9  ;;  %v2935_v51 = vrot.slane %v2933_v28, 4  ;;  %v2936_v62 = vrot.slane %v5499_v25, 5  ;;  %v6828_v54 = vld [vmem:[%s9059_s1 + $0x4] sm:$0x3]  ;;  %v5507_v2 = vld [vmem:[%s7068_s21 + $0xb8] sm:$0xf] }
  0x99   : > { %v5587_v49 = vcombine.low %v2920_v18, %v2923_v59  ;;  %v2930_v50 = vsel %vm7320_vm7, %v2928_v1, %v2929_v8  ;;  %v5573_v12 = vrot.slane %v5557_v20, 9  ;;  %v2940_v63 = vrot.slane %v5501_v31, 5  ;;  %v7580_v7 = vld [vmem:[%s9059_s1 + $0x6] sm:$0x3]  ;;  %v5505_v10 = vld [vmem:[%s7068_s21 + $0xb0] sm:$0x1] }
  0x9a   : > { %v5588_v4 = vcombine.low %v2927_v38, %v2930_v50  ;;  %v2943_v58 = vrot.slane %v5502_v60, 5  ;;  %v1510_v61 = vsel %vm791_vm0, %v6828_v54, 0  ;;  %v2934_v41 = vsel %vm7320_vm7, %v5572_v48, %v2933_v28  ;;  %v5558_v11 = vld [vmem:[%s7068_s21 + $0xa8] sm:$0xe]  ;;  %v5508_v25 = vld [vmem:[%s7068_s21 + $0xbc] sm:$0x1] }
  0x9b   : > { %v2942_v6 = vrot.slane %v2940_v63, 4  ;;  %v2937_v17 = vsel %vm7320_vm7, %v2935_v51, %v2936_v62  ;;  %v2947_v8 = vrot.slane %v5504_v57, 5  ;;  %v2941_v23 = vsel %vm7320_vm7, %v5573_v12, %v2940_v63  ;;  %v5559_v31 = vld [vmem:[%s7068_s21 + $0xb4] sm:$0xe]  ;;  %v6829_v38 = vld [vmem:[%s7068_s21 + $0x24] sm:$0xf] }
  0x9c   : > { %v2954_v21 = vrot.slane %v5507_v2, 5  ;;  %v7601_v1 = vld [vmem:[%s7068_s21 + $0x28] sm:$0xf]  ;;  %v5589_v60 = vcombine.low %v2934_v41, %v2937_v17  ;;  %v5574_v44 = vrot.slane %v5558_v11, 9  ;;  %v2950_v59 = vrot.slane %v5505_v10, 5 }
  0x9d   : > { %v2944_v18 = vsel %vm7320_vm7, %v2942_v6, %v2943_v58  ;;  %v5321_v28 = vcombine.low %v6829_v38, %v7601_v1  ;;  %v6831_v47 = vld [vmem:[%s7068_s21 + $0x30] sm:$0xf]  ;;  %v2957_v51 = vrot.slane %v5508_v25, 5  ;;  %v5510_v62 = vld [vmem:[%s7068_s21 + $0xc4] sm:$0xf]  ;;  %v2342_v25 = vshrl.u32 %v7528_v40, 16 }
  0x9e   : > { %6203 = vmatmul.mubr.msk.bf16.gmra.mrb[16].mxu0 %vm742_vm3, %v5587_v49  ;;  %v5590_v20 = vcombine.low %v2941_v23, %v2944_v18  ;;  %v5575_v49 = vrot.slane %v5559_v31, 9  ;;  %v2956_v50 = vrot.slane %v2954_v21, 4  ;;  %v2948_v57 = vsel %vm7320_vm7, %v5574_v44, %v2947_v8  ;;  %v5560_v12 = vld [vmem:[%s7068_s21 + $0xc0] sm:$0xe]  ;;  %v6833_v41 = vld [vmem:[%s7068_s21 + $0x3c] sm:$0xf] }
  0x9f   : > { %6051 = vmatmul.mubr.msk.bf16.vlgmr.msra.gmra.mrb[0].mxu1 %vm742_vm3, %v5319_v45  ;;  %6206 = vmatprep.mubr.msk.bf16.mxu0 %vm742_vm3, %v5588_v4  ;;  %v2949_v45 = vrot.slane %v2947_v8, 4  ;;  %v2961_v63 = vrot.slane %v5510_v62, 5  ;;  %v5576_v6 = vrot.slane %v5560_v12, 9  ;;  %v7626_v17 = vld [vmem:[%s7068_s21 + $0x40] sm:$0xf]  ;;  %v5324_v18 = vcombine.low %v7233_v27, %v7236_v36  ;;  %v6657_v62 = vld [vmem:[%s7068_s21 + $0x24] sm:$0xff]  }
  0xa0   : > { %6083 = vmatpush3.bf16.msra.mxu1 %v1510_v61  ;;  %6054 = vmatprep.mubr.msk.bf16.mxu1 %vm742_vm3, %v5320_v26  ;;  %v7606_v26 = vld [vmem:[%s7068_s21 + $0x34] sm:$0xf]  ;;  %v2955_v58 = vsel %vm7320_vm7, %v5575_v49, %v2954_v21  ;;  %v2958_v54 = vsel %vm7320_vm7, %v2956_v50, %v2957_v51  ;;  %v5511_v61 = vld [vmem:[%s7068_s21 + $0xc8] sm:$0x1]  ;;  %v5323_v10 = vcombine.low %v6833_v41, %v7626_v17  ;;  %v2338_v21 = vshll.u32 %v7528_v40, 16 }
  0xa1   : > { %6581 = vmatprep.subr.msk.bf16.mxu1 %vm791_vm0, %v7580_v7  ;;  %v5322_v48 = vcombine.low %v6831_v47, %v7606_v26  ;;  %v2951_v4 = vsel %vm7320_vm7, %v2949_v45, %v2950_v59  ;;  %v5592_v11 = vcombine.low %v2955_v58, %v2958_v54  ;;  %v2963_v8 = vrot.slane %v2961_v63, 4  ;;  %v1248_v45 = vld [vmem:[%s7068_s21] sm:$0xe]  ;;  %v1249_v59 = vld [vmem:[%s7068_s21 + $0xc] sm:$0xe] }
  0xa2   : > { %v5591_v2 = vcombine.low %v2948_v57, %v2951_v4  ;;  %v2964_v23 = vrot.slane %v5511_v61, 5  ;;  %v2962_v31 = vsel %vm7320_vm7, %v5576_v6, %v2961_v63  ;;  %v7641_v27 = vrot.slane %v2338_v21, 5  ;;  %v1252_v41 = vld [vmem:[%s7068_s21 + $0x30] sm:$0xe] }
  0xa3   : > { %v2344_v36 = vrot.slane %v2342_v25, 4  ;;  %v5326_v44 = vcombine.low %v7293_v19, %v7299_v35  ;;  %v2348_v47 = vshll.u32 %v7531_v55, 16  ;;  %v5350_v19 = vrot.slane %v1248_v45, 9 }
  0xa4   : > { %v2965_v38 = vsel %vm7320_vm7, %v2963_v8, %v2964_v23  ;;  %9083 = vst [vmem:[#allocation6_spill] sm:$0xff] %v7641_v27  ;;  %v5351_v35 = vrot.slane %v1249_v59, 9  ;;  %v1315_v4 = vrot.slane %v7565_v9, 5  ;;  %v1322_v12 = vrot.slane %v7601_v1, 5  ;;  %v1253_v8 = vld [vmem:[%s7068_s21 + $0x3c] sm:$0xe] }
  0xa5   : > { %v5593_v40 = vcombine.low %v2962_v31, %v2965_v38  ;;  %v2345_v49 = vor.u32 %v2344_v36, %v7641_v27  ;;  %v7661_v51 = vrot.slane %v2348_v47, 5  ;;  %v5327_v58 = vcombine.low %v7314_v0, %v7327_v29  ;;  %v1254_v31 = vld [vmem:[%s7068_s21 + $0x48] sm:$0xe]  ;;  %v6839_v59 = vld [vmem:[%s7068_s21 + $0x38] sm:$0x1] }
  0xa6   : > { %6207 = vmatmul.mubr.msk.bf16.gmra.mrb[20].mxu0 %vm742_vm3, %v5589_v60  ;;  %v5325_v60 = vcombine.low %v7262_v24, %v7268_v37  ;;  %v6836_v24 = vld [vmem:[%s7068_s21 + $0x14] sm:$0x1]  ;;  %v4150_v54 = vsel %vm791_vm0, %v7385_v22, 0  ;;  %v5328_v61 = vcombine.low %v7346_v53, %v7353_v16  ;;  %v5329_v6 = vcombine.low %v7372_v39, %v7380_v43  ;;  %v6837_v16 = vld [vmem:[%s7068_s21 + $0x20] sm:$0x1] }
  0xa7   : > { %6055 = vmatmul.mubr.msk.bf16.gmra.mrb[4].mxu1 %vm742_vm3, %v5321_v28  ;;  %6210 = vmatprep.mubr.msk.bf16.mxu0 %vm742_vm3, %v5590_v20  ;;  %v1308_v28 = vrot.slane %v7558_v34, 5  ;;  %v6655_v20 = vld [vmem:[%s7068_s21 + $0x18] sm:$0xff]   ;;  %v6835_v34 = vld [vmem:[%s7068_s21 + $0x8] sm:$0x1]  ;;  %v1311_v37 = vrot.slane %v6836_v24, 5  ;;  %9084 = vst [vmem:[#allocation7_spill] sm:$0xff] %v7661_v51  ;;  %v5330_v9 = vcombine.low %v7404_v5, %v7416_v30 }
  0xa8   : > { %6058 = vmatprep.mubr.msk.bf16.mxu1 %vm742_vm3, %v5322_v48  ;;  %v1301_v48 = vrot.slane %v7524_v15, 5  ;;  %v1304_v50 = vrot.slane %v6835_v34, 5  ;;  %v1250_v15 = vld [vmem:[%s7068_s21 + $0x18] sm:$0xe]  ;;  %v7666_v63 = vrot.slane %v2345_v49, 4  ;;  %v1318_v22 = vrot.slane %v6837_v16, 5 }
  0xa9   : > { %v1310_v55 = vrot.slane %v1308_v28, 4  ;;  %v5352_v1 = vrot.slane %v1250_v15, 9  ;;  %v7688_v29 = vsel %vm7320_vm7, %v5351_v35, %v1308_v28  ;;  %v1324_v25 = vrot.slane %v1322_v12, 4  ;;  %v5675_v24 = vld [vmem:[%s7068_s21 + $0x18] sm:$0xf] }
  0xaa   : > { %v1303_v57 = vrot.slane %v1301_v48, 4  ;;  %9085 = vst [vmem:[#allocation8_spill] sm:$0xff] %v7666_v63  ;;  %v7684_v0 = vsel %vm7320_vm7, %v5350_v19, %v1301_v48  ;;  %v1332_v47 = vrot.slane %v6839_v59, 5  ;;  %v7725_v49 = vsel %vm791_vm0, %v7580_v7, 0  ;;  %v5676_v7 = vld [vmem:[%s7068_s21 + $0x1c] sm:$0xf] }
  0xab   : > { %v7692_v53 = vsel %vm7320_vm7, %v1310_v55, %v1311_v37  ;;  %v7729_v34 = vsel %vm7320_vm7, %v5352_v1, %v1315_v4  ;;  %v6661_v37 = vld [vmem:[%s7068_s21 + $0x3c] sm:$0xff]   ;;  %v5355_v35 = vrot.slane %v1253_v8, 9  ;;  %v6840_v55 = vld [vmem:[%s7068_s21 + $0x44] sm:$0x1]  ;;  %v3671_v8 = vshll.u32 %v5675_v24, 16 }
  0xac   : > { %v7703_v23 = vsel %vm7320_vm7, %v1303_v57, %v1304_v50  ;;  %v1255_v50 = vld [vmem:[%s7068_s21 + $0x54] sm:$0xe]  ;;  %v1339_v15 = vrot.slane %v6840_v55, 5  ;;  %v5679_v39 = vld [vmem:[%s7068_s21 + $0x28] sm:$0xf] }
  0xad   : > { %v6847_v5 = vld [vmem:[%s7068_s21 + $0x70] sm:$0xf] }
  0xae   : > { %6211 = vmatmul.mubr.msk.bf16.gmra.mrb[24].mxu0 %vm742_vm3, %v5591_v2  ;;  %v1251_v2 = vld [vmem:[%s7068_s21 + $0x24] sm:$0xe]  ;;  %v1364_v30 = vrot.slane %v6847_v5, 5 }
  0xaf   : > { %6059 = vmatmul.mubr.msk.bf16.gmra.mrb[8].mxu1 %vm742_vm3, %v5323_v10  ;;  %6214 = vmatprep.mubr.msk.bf16.mxu0 %vm742_vm3, %v5592_v11  ;;  %v1329_v10 = vrot.slane %v7606_v26, 5  ;;  %v6659_v11 = vld [vmem:[%s7068_s21 + $0x30] sm:$0xff]   ;;  %v5353_v21 = vrot.slane %v1251_v2, 9 }
  0xb0   : > { %6062 = vmatprep.mubr.msk.bf16.mxu1 %vm742_vm3, %v5324_v18  ;;  %v7699_v26 = vld [vmem:[%s9059_s1 + $0x10] sm:$0x3]  ;;  %v1317_v18 = vrot.slane %v1315_v4, 4  ;;  %v1366_v48 = vrot.slane %v1364_v30, 4 }
  0xb1   : > { %v1331_v45 = vrot.slane %v1329_v10, 4  ;;  %v7736_v19 = vsel %vm7320_vm7, %v5353_v21, %v1322_v12  ;;  %v3681_v21 = vshrl.u32 %v5676_v7, 16 }
  0xb2   : > { %v7745_v4 = vsel %vm7320_vm7, %v1317_v18, %v1318_v22  ;;  %v3668_v22 = vshrl.u32 %v5675_v24, 16  ;;  %v3677_v18 = vshll.u32 %v5676_v7, 16  ;;  %v5678_v24 = vld [vmem:[%s7068_s21 + $0x24] sm:$0xf] }
  0xb3   : > { %v7758_v1 = vsel %vm7320_vm7, %v1331_v45, %v1332_v47 }
  0xb4   : > { %v3670_v43 = vrot.slane %v3668_v22, 4  ;;  %v7800_v7 = vrot.slane %v3677_v18, 5  ;;  %v3695_v22 = vshll.u32 %v5678_v24, 16  ;;  %v3705_v18 = vshrl.u32 %v5679_v39, 16 }
  0xb6   : > { %6215 = vmatmul.mubr.msk.bf16.gmra.mrb[28].mxu0 %vm742_vm3, %v5593_v40  ;;  %v6838_v40 = vld [vmem:[%s7068_s21 + $0x2c] sm:$0x1]  ;;  %v3697_v27 = vrot.slane %v3695_v22, 5 }
  0xb7   : > { %6063 = vmatmul.mubr.msk.bf16.gmra.mrb[12].mxu1 %vm742_vm3, %v5325_v60  ;;  %6220 = vmatprep.mubr.msk.bf16.mxu0 %vm742_vm3, %v6655_v20  ;;  %v1325_v28 = vrot.slane %v6838_v40, 5  ;;  %v1336_v60 = vrot.slane %v7626_v17, 5  ;;  %v6843_v40 = vld [vmem:[%s7068_s21 + $0x50] sm:$0x1]  ;;  %v6848_v17 = vld [vmem:[%s7068_s21 + $0x74] sm:$0x1] }
  0xb8   : > { %6066 = vmatprep.mubr.msk.bf16.mxu1 %vm742_vm3, %v5326_v44  ;;  %v5354_v44 = vrot.slane %v1252_v41, 9  ;;  %v5357_v41 = vrot.slane %v1255_v50, 9  ;;  %v1256_v50 = vld [vmem:[%s7068_s21 + $0x60] sm:$0xe]  ;;  %v5680_v20 = vld [vmem:[%s7068_s21 + $0x2c] sm:$0x1] }
  0xb9   : > { %v1338_v12 = vrot.slane %v1336_v60, 4  ;;  %v7771_v45 = vsel %vm7320_vm7, %v5355_v35, %v1336_v60  ;;  %v6844_v35 = vld [vmem:[%s7068_s21 + $0x5c] sm:$0x1] }
  0xba   : > { %v7754_v2 = vsel %vm7320_vm7, %v5354_v44, %v1329_v10  ;;  %v1353_v55 = vrot.slane %v6844_v35, 5  ;;  %v1257_v35 = vld [vmem:[%s7068_s21 + $0x6c] sm:$0xe] }
  0xbb   : > { %v7775_v59 = vsel %vm7320_vm7, %v1338_v12, %v1339_v15  ;;  %v6845_v15 = vld [vmem:[%s7068_s21 + $0x64] sm:$0xf]  ;;  %v3683_v12 = vrot.slane %v3681_v21, 4  ;;  %v5359_v5 = vrot.slane %v1257_v35, 9 }
  0xbc   : > { %v6667_v21 = vld [vmem:[%s7068_s21 + $0x60] sm:$0xff]  }
  0xbe   : > { %6221 = vmatmul.mubr.msk.bf16.vlgmr.msra.gmra.mrb[0].mxu0 %vm742_vm3, %v6657_v62  ;;  %v6841_v62 = vld [vmem:[%s7068_s21 + $0x4c] sm:$0xf] }
  0xbf   : > { %6067 = vmatmul.mubr.msk.bf16.gmra.mrb[16].mxu1 %vm742_vm3, %v5327_v58  ;;  %6253 = vmatpush3.bf16.msra.mxu0 %v4150_v54  ;;  %v1343_v57 = vrot.slane %v6841_v62, 5  ;;  %v7749_v58 = vsel %vm7320_vm7, %v1324_v25, %v1325_v28  ;;  %v5356_v54 = vrot.slane %v1254_v31, 9  ;;  %v1346_v28 = vrot.slane %v6843_v40, 5 }
  0xc0   : > { %6070 = vmatprep.mubr.msk.bf16.mxu1 %vm742_vm3, %v5328_v61  ;;  %6224 = vmatprep.mubr.msk.bf16.mxu0 %vm742_vm3, %v6659_v11  ;;  %v6663_v61 = vld [vmem:[%s7068_s21 + $0x48] sm:$0xff]   ;;  %v6842_v11 = vld [vmem:[%s7068_s21 + $0x58] sm:$0xf]  ;;  %v1357_v62 = vrot.slane %v6845_v15, 5  ;;  %v5682_v15 = vld [vmem:[%s7068_s21 + $0x34] sm:$0xf] }
  0xc1   : > { %6587 = vmatprep.subr.msk.bf16.mxu0 %vm791_vm0, %v7699_v26  ;;  %v1350_v16 = vrot.slane %v6842_v11, 5  ;;  %v1345_v31 = vrot.slane %v1343_v57, 4  ;;  %v7779_v47 = vsel %vm7320_vm7, %v5356_v54, %v1343_v57  ;;  %v5677_v57 = vld [vmem:[%s7068_s21 + $0x20] sm:$0x1]  ;;  %v5681_v54 = vld [vmem:[%s7068_s21 + $0x30] sm:$0xf] }
  0xc2   : > { %v5358_v11 = vrot.slane %v1256_v50, 9  ;;  %v3719_v50 = vshll.u32 %v5681_v54, 16  ;;  %v3687_v25 = vshll.u32 %v5677_v57, 16  ;;  %v3725_v36 = vshll.u32 %v5682_v15, 16 }
  0xc3   : > { %v7790_v60 = vsel %vm7320_vm7, %v5357_v41, %v1350_v16  ;;  %v7806_v41 = vsel %vm7320_vm7, %v1345_v31, %v1346_v28  ;;  %v1359_v31 = vrot.slane %v1357_v62, 4  ;;  %v3716_v28 = vshrl.u32 %v5681_v54, 16 }
  0xc4   : > { %v7848_v35 = vrot.slane %v3725_v36, 5 }
  0xc6   : > { %6225 = vmatmul.mubr.msk.bf16.gmra.mrb[4].mxu0 %vm742_vm3, %v6661_v37  ;;  %v1352_v37 = vrot.slane %v1350_v16, 4  ;;  %v6846_v16 = vld [vmem:[%s7068_s21 + $0x68] sm:$0x1] }
  0xc7   : > { %6071 = vmatmul.mubr.msk.bf16.gmra.mrb[20].mxu1 %vm742_vm3, %v5329_v6  ;;  %6228 = vmatprep.mubr.msk.bf16.mxu0 %vm742_vm3, %v6663_v61  ;;  %v3673_v6 = vrot.slane %v3671_v8, 5  ;;  %v6665_v61 = vld [vmem:[%s7068_s21 + $0x54] sm:$0xff]   ;;  %v1360_v40 = vrot.slane %v6846_v16, 5  ;;  %v3701_v8 = vshll.u32 %v5679_v39, 16  ;;  %v3684_v16 = vor.u32 %v3683_v12, %v7800_v7 }
  0xc8   : > { %6074 = vmatprep.mubr.msk.bf16.mxu1 %vm742_vm3, %v5330_v9  ;;  %v3692_v9 = vshrl.u32 %v5678_v24, 16  ;;  %v7815_v44 = vsel %vm7320_vm7, %v1352_v37, %v1353_v55  ;;  %v1367_v24 = vrot.slane %v6848_v17, 5  ;;  %v3729_v39 = vshrl.u32 %v5682_v15, 16 }
  0xc9   : > { %v3674_v10 = vor.u32 %v3673_v6, %v3670_v43  ;;  %v7821_v37 = vrot.slane %v3701_v8, 5  ;;  %v3707_v55 = vrot.slane %v3705_v18, 4  ;;  %v9086_v43 = vcombine.low %v7425_v52, %v7436_v46  ;;  %v6849_v8 = vld [vmem:[%s7068_s21 + $0x7c] sm:$0xf]  ;;  %v7857_v18 = vld [vmem:[%s7068_s21 + $0x38] sm:$0x1] }
  0xca   : > { %v3694_v38 = vrot.slane %v3692_v9, 4  ;;  %v7830_v17 = vsel %vm7320_vm7, %v5358_v11, %v1357_v62  ;;  %v7834_v57 = vsel %vm7320_vm7, %v1359_v31, %v1360_v40  ;;  %v3718_v6 = vrot.slane %v3716_v28, 4  ;;  %9088 = vst [vmem:[#allocation9_spill] sm:$0xff] %v7857_v18 }
  0xcb   : > { %v3721_v12 = vrot.slane %v3719_v50, 5  ;;  %v9087_v52 = vcombine.low %v7457_v33, %v7462_v56  ;;  %v3675_v46 = vrot.slane %v3674_v10, 4  ;;  %v3685_v54 = vrot.slane %v3684_v16, 4  ;;  %v6669_v33 = vld [vmem:[%s7068_s21 + $0x6c] sm:$0xff]   ;;  %v1259_v16 = vld [vmem:[%s7068_s21 + $0x84] sm:$0xe] }
  0xcc   : > { %v3711_v62 = vshll.u32 %v5680_v20, 16  ;;  %v7842_v11 = vsel %vm7320_vm7, %v5359_v5, %v1364_v30  ;;  %v7846_v40 = vsel %vm7320_vm7, %v1366_v48, %v1367_v24  ;;  %v3731_v9 = vrot.slane %v3729_v39, 4  ;;  %v6670_v48 = vld [vmem:[%s7068_s21 + $0x78] sm:$0xff]  }
  0xcd   : > { %v3698_v10 = vor.u32 %v3697_v27, %v3694_v38  ;;  %v3708_v20 = vor.u32 %v3707_v55, %v7821_v37  ;;  %v1371_v30 = vrot.slane %v6849_v8, 5  ;;  %v3722_v38 = vor.u32 %v3721_v12, %v3718_v6  ;;  %v5684_v5 = vld [vmem:[%s7068_s21 + $0x3c] sm:$0xf] }
  0xce   : > { %6229 = vmatmul.mubr.msk.bf16.gmra.mrb[8].mxu0 %vm742_vm3, %v6665_v61  ;;  %v3689_v61 = vrot.slane %v3687_v25, 5  ;;  %v1258_v25 = vld [vmem:[%s7068_s21 + $0x78] sm:$0xe]  ;;  %v7873_v50 = vrot.slane %v3711_v62, 5  ;;  %v3732_v39 = vor.u32 %v3731_v9, %v7848_v35  ;;  %v3735_v55 = vshll.u32 %v7857_v18, 16 }
  0xcf   : > { %6075 = vmatmul.mubr.msk.bf16.gmra.mrb[24].mxu1 %vm742_vm3, %v9086_v43  ;;  %6232 = vmatprep.mubr.msk.bf16.mxu0 %vm742_vm3, %v6667_v21  ;;  %v3680_v21 = vsel %vm7094_vm4, %v3675_v46, %v7800_v7  ;;  %v5360_v24 = vrot.slane %v1258_v25, 9  ;;  %v6850_v43 = vld [vmem:[%s7068_s21 + $0x88] sm:$0xf]  ;;  %v7881_v7 = vld [vmem:[%s7068_s21 + $0x40] sm:$0xf]  ;;  %v3699_v12 = vrot.slane %v3698_v10, 4  ;;  %v9090_v62 = vcombine.low %v7477_v14, %v7486_v42 }
  0xd0   : > { %6078 = vmatprep.mubr.msk.bf16.mxu1 %vm742_vm3, %v9087_v52  ;;  %v3690_v31 = vsel %vm7094_vm4, %v3685_v54, %v3689_v61  ;;  %v1378_v6 = vrot.slane %v6850_v43, 5  ;;  %9089 = vst [vmem:[#allocation10_spill] sm:$0xff] %v7881_v7  ;;  %v3709_v52 = vrot.slane %v3708_v20, 4  ;;  %v1373_v46 = vrot.slane %v1371_v30, 4  ;;  %v6851_v54 = vld [vmem:[%s7068_s21 + $0x80] sm:$0x1] }
  0xd1   : > { %v1374_v61 = vrot.slane %v6851_v54, 5  ;;  %v3723_v9 = vrot.slane %v3722_v38, 4  ;;  %v5361_v25 = vrot.slane %v1259_v16, 9  ;;  %v3740_v8 = vshrl.u32 %v5684_v5, 16  ;;  %v6671_v10 = vld [vmem:[%s7068_s21 + $0x84] sm:$0xff]  }
  0xd2   : > { %v3743_v43 = vshll.u32 %v5684_v5, 16  ;;  %v7895_v20 = vcombine.low %v3680_v21, %v3690_v31  ;;  %v7899_v14 = vsel %vm791_vm0, %v7699_v26, 0  ;;  %v3753_v38 = vshrl.u32 %v7881_v7, 16  ;;  %v6672_v21 = vld [vmem:[%s7068_s21 + $0x90] sm:$0xff]   ;;  %v6856_v18 = vld [vmem:[%s7068_s21 + $0xa0] sm:$0xf] }
  0xd3   : > { %v3733_v16 = vrot.slane %v3732_v39, 4  ;;  %v3737_v5 = vrot.slane %v3735_v55, 5  ;;  %v1380_v54 = vrot.slane %v1378_v6, 4  ;;  %v3704_v31 = vsel %vm7094_vm4, %v3699_v12, %v7821_v37 }
  0xd4   : > { %v3714_v26 = vsel %vm7094_vm4, %v3709_v52, %v7873_v50  ;;  %v7914_v39 = vsel %vm7320_vm7, %v5360_v24, %v1371_v30  ;;  %v7918_v55 = vsel %vm7320_vm7, %v1373_v46, %v1374_v61  ;;  %v3728_v37 = vsel %vm7094_vm4, %v3723_v9, %v7848_v35  ;;  %v5690_v30 = vld [vmem:[%s7068_s21 + $0x54] sm:$0xf]  ;;  %v7935_v24 = vld [vmem:[%s7068_s21 + $0x58] sm:$0xf]  ;;  %v7940_v61 = vld [vmem:[%s7068_s21 + $0x90] sm:$0xe] }
  0xd5   : > { %v7931_v12 = vsel %vm7320_vm7, %v5361_v25, %v1378_v6  ;;  %v3742_v50 = vrot.slane %v3740_v8, 4  ;;  %v3745_v52 = vrot.slane %v3743_v43, 5  ;;  %v3755_v46 = vrot.slane %v3753_v38, 4 }
  0xd6   : > { %6233 = vmatmul.mubr.msk.bf16.gmra.mrb[12].mxu0 %vm742_vm3, %v6669_v33  ;;  %v9091_v33 = vcombine.low %v7684_v0, %v7703_v23  ;;  %v6852_v0 = vld [vmem:[%s7068_s21 + $0x8c] sm:$0x1]  ;;  %v3738_v36 = vsel %vm7094_vm4, %v3733_v16, %v3737_v5  ;;  %v3788_v25 = vshrl.u32 %v5690_v30, 16  ;;  %v3791_v8 = vshll.u32 %v5690_v30, 16 }
  0xd7   : > { %6079 = vmatmul.mubr.msk.bf16.gmra.mrb[28].mxu1 %vm742_vm3, %v9090_v62  ;;  %6236 = vmatprep.mubr.msk.bf16.mxu0 %vm742_vm3, %v6670_v48  ;;  %v3749_v48 = vshll.u32 %v7881_v7, 16  ;;  %v1381_v23 = vrot.slane %v6852_v0, 5  ;;  %v5687_v62 = vld [vmem:[%s7068_s21 + $0x48] sm:$0xf]  ;;  %v7924_v0 = vld [vmem:[%s7068_s21 + $0x4c] sm:$0xf]  ;;  %v9093_v38 = vcombine.low %v7688_v29, %v7692_v53  ;;  %v7958_v16 = vcombine.low %v3704_v31, %v3714_v26 }
  0xd8   : > { %6084 = vmatprep.mubr.msk.bf16.mxu1 %vm742_vm3, %v9091_v33  ;;  %v7921_v33 = vld [vmem:[%s7068_s21 + $0x44] sm:$0x1]  ;;  %v3764_v27 = vshrl.u32 %v5687_v62, 16  ;;  %v3767_v15 = vshll.u32 %v5687_v62, 16  ;;  %v3773_v6 = vshll.u32 %v7924_v0, 16  ;;  %v3777_v9 = vshrl.u32 %v7924_v0, 16 }
  0xd9   : > { %9092 = vst [vmem:[#allocation11_spill] sm:$0xff] %v7921_v33  ;;  %v7937_v28 = vrot.slane %v3749_v48, 5  ;;  %v7946_v35 = vsel %vm7320_vm7, %v1380_v54, %v1381_v23  ;;  %v3797_v43 = vshll.u32 %v7935_v24, 16  ;;  %v3801_v48 = vshrl.u32 %v7935_v24, 16  ;;  %v5693_v31 = vld [vmem:[%s7068_s21 + $0x60] sm:$0xf] }
  0xda   : > { %v3759_v5 = vshll.u32 %v7921_v33, 16  ;;  %v5362_v54 = vrot.slane %v7940_v61, 9  ;;  %v9094_v23 = vcombine.low %v7729_v34, %v7745_v4  ;;  %v7969_v29 = vcombine.low %v3728_v37, %v3738_v36  ;;  %v6673_v26 = vld [vmem:[%s7068_s21 + $0x9c] sm:$0xff]   ;;  %v6674_v30 = vld [vmem:[%s7068_s21 + $0xa8] sm:$0xff]  }
  0xdb   : > { %v3746_v53 = vor.u32 %v3745_v52, %v3742_v50  ;;  %v3766_v62 = vrot.slane %v3764_v27, 4  ;;  %v7980_v34 = vrot.slane %v3773_v6, 5  ;;  %v3779_v4 = vrot.slane %v3777_v9, 4  ;;  %v6853_v36 = vld [vmem:[%s9059_s1 + $0x8] sm:$0x3] }
  0xdc   : > { %v3790_v27 = vrot.slane %v3788_v25, 4  ;;  %v3793_v37 = vrot.slane %v3791_v8, 5  ;;  %v7989_v50 = vrot.slane %v3797_v43, 5  ;;  %v3803_v52 = vrot.slane %v3801_v48, 4  ;;  %v6854_v6 = vld [vmem:[%s7068_s21 + $0x94] sm:$0xf] }
  0xdd   : > { %v7995_v9 = vld [vmem:[%s7068_s21 + $0x64] sm:$0xf]  ;;  %v3812_v61 = vshrl.u32 %v5693_v31, 16  ;;  %v7997_v22 = vrot.slane %v3746_v53, 4  ;;  %v1392_v25 = vrot.slane %v6856_v18, 5  ;;  %v3780_v43 = vor.u32 %v3779_v4, %v7980_v34 }
  0xde   : > { %6237 = vmatmul.mubr.msk.bf16.gmra.mrb[16].mxu0 %vm742_vm3, %v6671_v10  ;;  %9095 = vst [vmem:[#allocation12_spill] sm:$0xff] %v7995_v9  ;;  %v3815_v10 = vshll.u32 %v5693_v31, 16  ;;  %v3794_v31 = vor.u32 %v3793_v37, %v3790_v27  ;;  %v3804_v53 = vor.u32 %v3803_v52, %v7989_v50  ;;  %v9096_v18 = vcombine.low %v7736_v19, %v7749_v58  ;;  %v6675_v37 = vld [vmem:[%s7068_s21 + $0xb4] sm:$0xff]  }
  0xdf   : > { %6085 = vmatmul.mubr.msk.bf16.vlgmr.msra.gmra.mrb[0].mxu1 %vm742_vm3, %v9093_v38  ;;  %6240 = vmatprep.mubr.msk.bf16.mxu0 %vm742_vm3, %v6672_v21  ;;  %v3769_v21 = vrot.slane %v3767_v15, 5  ;;  %v7978_v38 = vld [vmem:[%s7068_s21 + $0x50] sm:$0x1]  ;;  %v7987_v15 = vld [vmem:[%s7068_s21 + $0x5c] sm:$0x1]  ;;  %v9097_v27 = vcombine.low %v7754_v2, %v7758_v1  ;;  %v1394_v52 = vrot.slane %v1392_v25, 4 }
  0xe0   : > { %6117 = vmatpush3.bf16.msra.mxu1 %v7725_v49  ;;  %6088 = vmatprep.mubr.msk.bf16.mxu1 %vm742_vm3, %v9094_v23  ;;  %v3756_v49 = vor.u32 %v3755_v46, %v7937_v28  ;;  %v7991_v46 = vrot.slane %v3759_v5, 5  ;;  %v1385_v23 = vrot.slane %v6854_v6, 5  ;;  %v3783_v48 = vshll.u32 %v7978_v38, 16  ;;  %v1261_v5 = vld [vmem:[%s7068_s21 + $0x9c] sm:$0xe] }
  0xe1   : > { %6583 = vmatprep.subr.msk.bf16.mxu1 %vm791_vm0, %v6853_v36  ;;  %v6855_v36 = vld [vmem:[%s7068_s21 + $0x98] sm:$0x1]  ;;  %v3770_v7 = vor.u32 %v3769_v21, %v3766_v62  ;;  %v3807_v6 = vshll.u32 %v7987_v15, 16  ;;  %v3825_v62 = vshrl.u32 %v7995_v9, 16  ;;  %v3817_v4 = vrot.slane %v3815_v10, 5 }
  0xe2   : > { %v1388_v33 = vrot.slane %v6855_v36, 5  ;;  %v3757_v8 = vrot.slane %v3756_v49, 4  ;;  %v3821_v36 = vshll.u32 %v7995_v9, 16  ;;  %v8016_v21 = vsel %vm7320_vm7, %v5362_v54, %v1385_v23  ;;  %v8027_v2 = vld [vmem:[%s7068_s21 + $0x68] sm:$0x1] }
  0xe3   : > { %v3814_v49 = vrot.slane %v3812_v61, 4  ;;  %v3771_v19 = vrot.slane %v3770_v7, 4  ;;  %v5363_v58 = vrot.slane %v1261_v5, 9  ;;  %v3781_v3 = vrot.slane %v3780_v43, 4  ;;  %9098 = vst [vmem:[#allocation13_spill] sm:$0xff] %v8027_v2  ;;  %v6676_v5 = vld [vmem:[%s7068_s21 + $0xc0] sm:$0xff]  }
  0xe4   : > { %v3785_v54 = vrot.slane %v3783_v48, 5  ;;  %v3809_v63 = vrot.slane %v3807_v6, 5  ;;  %v1399_v61 = vrot.slane %v7462_v56, 5  ;;  %v3795_v10 = vrot.slane %v3794_v31, 4  ;;  %v1263_v31 = vld [vmem:[%s7068_s21 + $0xb4] sm:$0xe] }
  0xe5   : > { %v3805_v51 = vrot.slane %v3804_v53, 4  ;;  %v8029_v1 = vrot.slane %v3821_v36, 5  ;;  %v3827_v7 = vrot.slane %v3825_v62, 4  ;;  %v3752_v43 = vsel %vm7094_vm4, %v7997_v22, %v7937_v28  ;;  %v6858_v62 = vld [vmem:[%s7068_s21 + $0xb0] sm:$0x1] }
  0xe6   : > { %6241 = vmatmul.mubr.msk.bf16.gmra.mrb[20].mxu0 %vm742_vm3, %v6673_v26  ;;  %v1387_v26 = vrot.slane %v1385_v23, 4  ;;  %v1262_v23 = vld [vmem:[%s7068_s21 + $0xa8] sm:$0xe]  ;;  %v3762_v48 = vsel %vm7094_vm4, %v3757_v8, %v7991_v46  ;;  %v3818_v6 = vor.u32 %v3817_v4, %v3814_v49  ;;  %v3776_v53 = vsel %vm7094_vm4, %v3771_v19, %v7980_v34  ;;  %v5696_v46 = vld [vmem:[%s7068_s21 + $0x6c] sm:$0xf] }
  0xe7   : > { %6089 = vmatmul.mubr.msk.bf16.gmra.mrb[4].mxu1 %vm742_vm3, %v9096_v18  ;;  %6244 = vmatprep.mubr.msk.bf16.mxu0 %vm742_vm3, %v6674_v30  ;;  %v6857_v18 = vld [vmem:[%s7068_s21 + $0xa4] sm:$0x1]  ;;  %v8049_v36 = vsel %vm7320_vm7, %v5363_v58, %v1392_v25  ;;  %v5364_v28 = vrot.slane %v1262_v23, 9  ;;  %v1401_v8 = vrot.slane %v1399_v61, 4  ;;  %v3831_v49 = vshll.u32 %v8027_v2, 16 }
  0xe8   : > { %6092 = vmatprep.mubr.msk.bf16.mxu1 %vm742_vm3, %v9097_v27  ;;  %v1395_v30 = vrot.slane %v6857_v18, 5  ;;  %v8041_v56 = vsel %vm7320_vm7, %v1387_v26, %v1388_v33  ;;  %v3786_v33 = vsel %vm7094_vm4, %v3781_v3, %v3785_v54  ;;  %v1402_v26 = vrot.slane %v6858_v62, 5  ;;  %v5699_v18 = vld [vmem:[%s7068_s21 + $0x78] sm:$0xf]  ;;  %v8104_v54 = vld [vmem:[%s7068_s21 + $0xbc] sm:$0x1] }
  0xe9   : > { %v3800_v34 = vsel %vm7094_vm4, %v3795_v10, %v7989_v50  ;;  %v3810_v25 = vsel %vm7094_vm4, %v3805_v51, %v3809_v63  ;;  %v3828_v4 = vor.u32 %v3827_v7, %v8029_v1  ;;  %v5365_v27 = vrot.slane %v1263_v31, 9  ;;  %v8078_v51 = vld [vmem:[%s7068_s21 + $0x70] sm:$0xf]  ;;  %v8108_v10 = vld [vmem:[%s7068_s21 + $0x7c] sm:$0xf] }
  0xea   : > { %v8053_v22 = vsel %vm7320_vm7, %v1394_v52, %v1395_v30  ;;  %v9100_v3 = vcombine.low %v7771_v45, %v7775_v59  ;;  %v8074_v19 = vrot.slane %v3818_v6, 4  ;;  %v1406_v50 = vrot.slane %v7486_v42, 5  ;;  %9101 = vst [vmem:[#allocation15_spill] sm:$0xff] %v8078_v51  ;;  %9103 = vst [vmem:[#allocation16_spill] sm:$0xff] %v8108_v10  ;;  %v5702_v7 = vld [vmem:[%s7068_s21 + $0x84] sm:$0xf] }
  0xeb   : > { %9099 = vst [vmem:[#allocation14_spill] sm:$0xff] %v8053_v22  ;;  %v3836_v63 = vshrl.u32 %v5696_v46, 16  ;;  %v9102_v45 = vcombine.low %v7779_v47, %v7806_v41  ;;  %v8086_v58 = vcombine.low %v3776_v53, %v3786_v33  ;;  %v8092_v42 = vsel %vm7320_vm7, %v5364_v28, %v1399_v61  ;;  %v6677_v61 = vld [vmem:[%s7068_s21 + $0xcc] sm:$0xff]   ;;  %v8120_v31 = vld [vmem:[%s7068_s21 + $0x88] sm:$0xf] }
  0xec   : > { %v8095_v30 = vcombine.low %v3800_v34, %v3810_v25  ;;  %v8099_v47 = vsel %vm7320_vm7, %v1401_v8, %v1402_v26  ;;  %v8101_v41 = vrot.slane %v3831_v49, 5  ;;  %v3845_v6 = vshll.u32 %v8078_v51, 16  ;;  %9104 = vst [vmem:[#allocation17_spill] sm:$0xff] %v8120_v31  ;;  %v5705_v62 = vld [vmem:[%s7068_s21 + $0x90] sm:$0xf] }
  0xed   : > { %v8126_v28 = vrot.slane %v1406_v50, 4  ;;  %v8128_v33 = vrot.slane %v3836_v63, 4  ;;  %v3849_v8 = vshrl.u32 %v8078_v51, 16  ;;  %v3860_v26 = vshrl.u32 %v5699_v18, 16  ;;  %v8135_v25 = vld [vmem:[%s7068_s21 + $0x94] sm:$0xf] }
  0xee   : > { %6245 = vmatmul.mubr.msk.bf16.gmra.mrb[24].mxu0 %vm742_vm3, %v6675_v37  ;;  %v8072_v37 = vcombine.low %v3752_v43, %v3762_v48  ;;  %v8116_v43 = vsel %vm7320_vm7, %v5365_v27, %v1406_v50  ;;  %v3839_v48 = vshll.u32 %v5696_v46, 16  ;;  %v3863_v49 = vshll.u32 %v5699_v18, 16  ;;  %9105 = vst [vmem:[#allocation18_spill] sm:$0xff] %v8135_v25  ;;  %v8173_v2 = vld [vmem:[%s7068_s21 + $0x8c] sm:$0x1] }
  0xef   : > { %6093 = vmatmul.mubr.msk.bf16.gmra.mrb[8].mxu1 %vm742_vm3, %v9100_v3  ;;  %6248 = vmatprep.mubr.msk.bf16.mxu0 %vm742_vm3, %v6676_v5  ;;  %v8112_v5 = vrot.slane %v3828_v4, 4  ;;  %v3869_v46 = vshll.u32 %v8108_v10, 16  ;;  %v3873_v34 = vshrl.u32 %v8108_v10, 16  ;;  %v3884_v4 = vshrl.u32 %v5702_v7, 16 }
  0xf0   : > { %6096 = vmatprep.mubr.msk.bf16.mxu1 %vm742_vm3, %v9102_v45  ;;  %v3887_v27 = vshll.u32 %v5702_v7, 16  ;;  %v3893_v3 = vshll.u32 %v8120_v31, 16  ;;  %v3897_v50 = vshrl.u32 %v8120_v31, 16  ;;  %v8145_v45 = vld [vmem:[%s7068_s21 + $0x74] sm:$0x1]  ;;  %v3841_v18 = vrot.slane %v3839_v48, 5 }
  0xf1   : > { %v3908_v52 = vshrl.u32 %v5705_v62, 16  ;;  %v3911_v53 = vshll.u32 %v5705_v62, 16  ;;  %v9106_v7 = vcombine.low %v7790_v60, %v7815_v44  ;;  %v3851_v59 = vrot.slane %v3849_v8, 4  ;;  %v5708_v48 = vld [vmem:[%s7068_s21 + $0x9c] sm:$0xf] }
  0xf2   : > { %v3917_v63 = vshll.u32 %v8135_v25, 16  ;;  %v3921_v23 = vshrl.u32 %v8135_v25, 16  ;;  %v9107_v62 = vcombine.low %v7830_v17, %v7834_v57  ;;  %v8163_v44 = vld [vmem:[%s7068_s21 + $0x80] sm:$0x1]  ;;  %v3862_v60 = vrot.slane %v3860_v26, 4 }
  0xf3   : > { %9108 = vst [vmem:[#allocation19_spill] sm:$0xff] %v8163_v44  ;;  %v3886_v31 = vrot.slane %v3884_v4, 4  ;;  %v3889_v8 = vrot.slane %v3887_v27, 5  ;;  %v8167_v10 = vrot.slane %v3893_v3, 5  ;;  %v3899_v51 = vrot.slane %v3897_v50, 4 }
  0xf4   : > { %v8170_v25 = vld [vmem:[%s7068_s21 + $0xa0] sm:$0xf]  ;;  %v3910_v17 = vrot.slane %v3908_v52, 4  ;;  %v3913_v57 = vrot.slane %v3911_v53, 5  ;;  %v3935_v9 = vshll.u32 %v5708_v48, 16  ;;  %v3842_v26 = vor.u32 %v3841_v18, %v8128_v33 }
  0xf5   : > { %v3879_v27 = vshll.u32 %v8163_v44, 16  ;;  %v8182_v3 = vld [vmem:[%s7068_s21 + $0x98] sm:$0x1]  ;;  %v3941_v50 = vshll.u32 %v8170_v25, 16  ;;  %v3945_v52 = vshrl.u32 %v8170_v25, 16  ;;  %v3890_v22 = vor.u32 %v3889_v8, %v3886_v31 }
  0xf6   : > { %6249 = vmatmul.mubr.msk.bf16.gmra.mrb[28].mxu0 %vm742_vm3, %v6677_v61  ;;  %v8153_v61 = vrot.slane %v3845_v6, 5  ;;  %v3875_v6 = vrot.slane %v3873_v34, 4  ;;  %v3923_v34 = vrot.slane %v3921_v23, 4  ;;  %v3903_v33 = vshll.u32 %v8173_v2, 16 }
  0xf7   : > { %6097 = vmatmul.mubr.msk.bf16.gmra.mrb[12].mxu1 %vm742_vm3, %v9106_v7  ;;  %6254 = vmatprep.mubr.msk.bf16.mxu0 %vm742_vm3, %v7895_v20  ;;  %v3865_v7 = vrot.slane %v3863_v49, 5  ;;  %v8165_v20 = vrot.slane %v3869_v46, 5  ;;  %v3855_v49 = vshll.u32 %v8145_v45, 16  ;;  %v8177_v46 = vrot.slane %v3917_v63, 5 }
  0xf8   : > { %6100 = vmatprep.mubr.msk.bf16.mxu1 %vm742_vm3, %v9107_v62  ;;  %v3932_v62 = vshrl.u32 %v5708_v48, 16  ;;  %v3852_v4 = vor.u32 %v3851_v59, %v8153_v61  ;;  %v3900_v23 = vor.u32 %v3899_v51, %v8167_v10  ;;  %v3914_v59 = vor.u32 %v3913_v57, %v3910_v17  ;;  %v8215_v57 = vld [vmem:[%s7068_s21 + $0xa4] sm:$0x1] }
  0xf9   : > { %v3866_v53 = vor.u32 %v3865_v7, %v3862_v60  ;;  %v3876_v48 = vor.u32 %v3875_v6, %v8165_v20  ;;  %v3937_v18 = vrot.slane %v3935_v9, 5  ;;  %v9109_v44 = vcombine.low %v7842_v11, %v7846_v40 }
  0xfa   : > { %v3934_v63 = vrot.slane %v3932_v62, 4  ;;  %v9110_v31 = vrot.slane %v8104_v54, 5  ;;  %v3857_v51 = vrot.slane %v3855_v49, 5  ;;  %v3924_v60 = vor.u32 %v3923_v34, %v8177_v46  ;;  %v8218_v34 = vld [vmem:[%s7068_s21 + $0xac] sm:$0xf] }
  0xfb   : > { %v3927_v9 = vshll.u32 %v8182_v3, 16  ;;  %v9111_v11 = vcombine.low %v7914_v39, %v7918_v55  ;;  %v3843_v40 = vrot.slane %v3842_v26, 4  ;;  %v8211_v54 = vrot.slane %v3941_v50, 5 }
  0xfc   : > { %v3867_v7 = vrot.slane %v3866_v53, 4  ;;  %v3877_v6 = vrot.slane %v3876_v48, 4  ;;  %v3881_v8 = vrot.slane %v3879_v27, 5  ;;  %v3905_v17 = vrot.slane %v3903_v33, 5  ;;  %v8228_v48 = vld [vmem:[%s7068_s21 + $0xb0] sm:$0x1] }
  0xfd   : > { %v3891_v39 = vrot.slane %v3890_v22, 4  ;;  %v3901_v55 = vrot.slane %v3900_v23, 4  ;;  %v3915_v62 = vrot.slane %v3914_v59, 4  ;;  %v3938_v49 = vor.u32 %v3937_v18, %v3934_v63 }
  0xfe   : > { %6255 = vmatmul.mubr.msk.bf16.vlgmr.msra.gmra.mrb[0].mxu0 %vm742_vm3, %v7958_v16  ;;  %v8201_v16 = vsel %vm7320_vm7, %v8126_v28, %v9110_v31  ;;  %v3947_v28 = vrot.slane %v3945_v52, 4  ;;  %v3929_v26 = vrot.slane %v3927_v9, 5  ;;  %v3848_v52 = vsel %vm7094_vm4, %v3843_v40, %v8153_v61 }
  0xff   : > { %6101 = vmatmul.mubr.msk.bf16.gmra.mrb[16].mxu1 %vm742_vm3, %v9109_v44  ;;  %6287 = vmatpush3.bf16.msra.mxu0 %v7899_v14  ;;  %v3853_v14 = vrot.slane %v3852_v4, 4  ;;  %v5711_v44 = vld [vmem:[%s7068_s21 + $0xa8] sm:$0xf]  ;;  %v3951_v22 = vshll.u32 %v8215_v57, 16  ;;  %v3872_v33 = vsel %vm7094_vm4, %v3867_v7, %v8165_v20  ;;  %v3882_v23 = vsel %vm7094_vm4, %v3877_v6, %v3881_v8 }
 0x100   : > { %6104 = vmatprep.mubr.msk.bf16.mxu1 %vm742_vm3, %v9111_v11  ;;  %6258 = vmatprep.mubr.msk.bf16.mxu0 %vm742_vm3, %v7969_v29  ;;  %v3925_v29 = vrot.slane %v3924_v60, 4  ;;  %v3956_v4 = vshrl.u32 %v5711_v44, 16  ;;  %v3959_v50 = vshll.u32 %v5711_v44, 16  ;;  %v3948_v53 = vor.u32 %v3947_v28, %v8211_v54  ;;  %v5760_v11 = vld [vmem:[%s7068_s21 + $0x48] sm:$0xe] }
 0x101   : > { %v3858_v27 = vsel %vm7094_vm4, %v3853_v14, %v3857_v51  ;;  %v3965_v59 = vshll.u32 %v8218_v34, 16  ;;  %v3969_v61 = vshrl.u32 %v8218_v34, 16  ;;  %v3896_v63 = vsel %vm7094_vm4, %v3891_v39, %v8167_v10  ;;  %v8293_v39 = vld [vmem:[%s7068_s21 + $0xb8] sm:$0xf] }
 0x102   : > { %v3906_v18 = vsel %vm7094_vm4, %v3901_v55, %v3905_v17  ;;  %v3920_v20 = vsel %vm7094_vm4, %v3915_v62, %v8177_v46  ;;  %v3939_v31 = vrot.slane %v3938_v49, 4  ;;  %v9112_v51 = vcombine.low %v7931_v12, %v7946_v35 }
 0x103   : > { %v3958_v10 = vrot.slane %v3956_v4, 4  ;;  %v3961_v60 = vrot.slane %v3959_v50, 5  ;;  %v3975_v9 = vshll.u32 %v8228_v48, 16  ;;  %v9113_v46 = vcombine.low %v8016_v21, %v8041_v56  ;;  %v5714_v21 = vld [vmem:[%s7068_s21 + $0xb4] sm:$0xf] }
 0x104   : > { %v5381_v12 = vcombine.low %v8092_v42, %v8099_v47  ;;  %v9114_v35 = vsel %vm7094_vm4, %v8112_v5, %v8101_v41  ;;  %v3949_v14 = vrot.slane %v3948_v53, 4  ;;  %v3953_v28 = vrot.slane %v3951_v22, 5  ;;  %v5762_v4 = vld [vmem:[%s7068_s21 + $0x60] sm:$0xe]  ;;  %v5763_v53 = vld [vmem:[%s7068_s21 + $0x6c] sm:$0xe] }
 0x105   : > { %v5382_v56 = vcombine.low %v8116_v43, %v8201_v16  ;;  %v8276_v44 = vcombine.low %v3848_v52, %v3858_v27  ;;  %v8278_v42 = vrot.slane %v3965_v59, 5  ;;  %v3971_v47 = vrot.slane %v3969_v61, 4  ;;  %v9123_v16 = vld [vmem:[#allocation7_spill] sm:$0xff] }
 0x106   : > { %6259 = vmatmul.mubr.msk.bf16.gmra.mrb[4].mxu0 %vm742_vm3, %v8072_v37  ;;  %v3930_v37 = vsel %vm7094_vm4, %v3925_v29, %v3929_v26  ;;  %v8280_v41 = vcombine.low %v3872_v33, %v3882_v23  ;;  %v8282_v5 = vcombine.low %v3896_v63, %v3906_v18  ;;  %v3944_v6 = vsel %vm7094_vm4, %v3939_v31, %v8211_v54  ;;  %v9116_v23 = vld [vmem:[#allocation14_spill] sm:$0xff]  ;;  %v5717_v63 = vld [vmem:[%s7068_s21 + $0xc0] sm:$0xf]  ;;  %v9118_v18 = vld [vmem:[#allocation12_spill] sm:$0xff] }
 0x107   : > { %6105 = vmatmul.mubr.msk.bf16.gmra.mrb[20].mxu1 %vm742_vm3, %v9112_v51  ;;  %6262 = vmatprep.mubr.msk.bf16.mxu0 %vm742_vm3, %v8086_v58  ;;  %v9115_v58 = vsel %vm7094_vm4, %v8074_v19, %v8029_v1  ;;  %v8284_v7 = vcombine.low %v3920_v20, %v3930_v37  ;;  %v5776_v1 = vrot.slane %v5760_v11, 9  ;;  %v5761_v19 = vld [vmem:[%s7068_s21 + $0x54] sm:$0xe]  ;;  %v3962_v8 = vor.u32 %v3961_v60, %v3958_v10 }
 0x108   : > { %6108 = vmatprep.mubr.msk.bf16.mxu1 %vm742_vm3, %v9113_v46  ;;  %v5730_v40 = vcombine.low %v9115_v58, %v9114_v35  ;;  %v8290_v17 = vrot.slane %v3975_v9, 5  ;;  %v3980_v55 = vshrl.u32 %v5714_v21, 16  ;;  %v3954_v62 = vsel %vm7094_vm4, %v3949_v14, %v3953_v28  ;;  %v9119_v31 = vld [vmem:[#allocation13_spill] sm:$0xff]  ;;  %v9120_v9 = vld [vmem:[#allocation15_spill] sm:$0xff]  ;;  %v8342_v35 = vld [vmem:[%s7068_s21 + $0xbc] sm:$0x1] }
 0x109   : > { %v3983_v49 = vshll.u32 %v5714_v21, 16  ;;  %v4439_v29 = vrot.slane %v7924_v0, 5  ;;  %v4442_v26 = vrot.slane %v7978_v38, 5  ;;  %v3972_v50 = vor.u32 %v3971_v47, %v8278_v42  ;;  %v8345_v58 = vld [vmem:[%s7068_s21 + $0xc4] sm:$0xf] }
 0x10a   : > { %v5777_v52 = vrot.slane %v5761_v19, 9  ;;  %v4446_v54 = vrot.slane %v7935_v24, 5  ;;  %v4449_v27 = vrot.slane %v7987_v15, 5  ;;  %v3989_v22 = vshll.u32 %v8293_v39, 16  ;;  %v5764_v19 = vld [vmem:[%s7068_s21 + $0x78] sm:$0xe] }
 0x10b   : > { %v3993_v33 = vshrl.u32 %v8293_v39, 16  ;;  %v8310_v0 = vsel %vm7320_vm7, %v5776_v1, %v4439_v29  ;;  %v4441_v38 = vrot.slane %v4439_v29, 4  ;;  %v9117_v59 = vcombine.low %v8049_v36, %v9116_v23  ;;  %v9121_v23 = vld [vmem:[#allocation16_spill] sm:$0xff] }
 0x10c   : > { %v8317_v24 = vcombine.low %v3944_v6, %v3954_v62  ;;  %v8321_v15 = vsel %vm7320_vm7, %v5777_v52, %v4446_v54  ;;  %v5778_v61 = vrot.slane %v5762_v4, 9  ;;  %v4453_v20 = vrot.slane %v9118_v18, 5  ;;  %v6678_v6 = vld [vmem:[%s7068_s21 + $0xc] sm:$0xff]  }
 0x10d   : > { %v8327_v36 = vsel %vm7320_vm7, %v4441_v38, %v4442_v26  ;;  %v4456_v51 = vrot.slane %v9119_v31, 5  ;;  %v5779_v37 = vrot.slane %v5763_v53, 9  ;;  %v4460_v11 = vrot.slane %v9120_v9, 5 }
 0x10e   : > { %6263 = vmatmul.mubr.msk.bf16.gmra.mrb[8].mxu0 %vm742_vm3, %v8095_v30  ;;  %v4448_v30 = vrot.slane %v4446_v54, 4  ;;  %v5793_v10 = vcombine.low %v8310_v0, %v8327_v36  ;;  %v4463_v46 = vrot.slane %v8145_v45, 5  ;;  %v8351_v14 = vsel %vm7320_vm7, %v5778_v61, %v4453_v20 }
 0x10f   : > { %6109 = vmatmul.mubr.msk.bf16.gmra.mrb[24].mxu1 %vm742_vm3, %v9117_v59  ;;  %6266 = vmatprep.mubr.msk.bf16.mxu0 %vm742_vm3, %v5730_v40  ;;  %v4455_v28 = vrot.slane %v4453_v20, 4  ;;  %v8353_v21 = vrot.slane %v3980_v55, 4  ;;  %v4004_v47 = vshrl.u32 %v5717_v63, 16  ;;  %v8357_v45 = vsel %vm7320_vm7, %v5779_v37, %v4460_v11  ;;  %v5491_v55 = vld [vmem:[%s7068_s21 + $0x78] sm:$0xf]  ;;  %v9122_v59 = vld [vmem:[#allocation19_spill] sm:$0xff] }
 0x110   : > { %6112 = vmatprep.mubr.msk.bf16.mxu1 %vm742_vm3, %v5381_v12  ;;  %v8335_v60 = vsel %vm7320_vm7, %v4448_v30, %v4449_v27  ;;  %v8339_v12 = vrot.slane %v3962_v8, 4  ;;  %v4462_v1 = vrot.slane %v4460_v11, 4  ;;  %v8361_v8 = vrot.slane %v3972_v50, 4 }
 0x111   : > { %v5794_v40 = vcombine.low %v8321_v15, %v8335_v60  ;;  %v8363_v62 = vrot.slane %v3983_v49, 5  ;;  %v4007_v29 = vshll.u32 %v5717_v63, 16  ;;  %v8367_v26 = vsel %vm7320_vm7, %v4455_v28, %v4456_v51  ;;  %v9125_v28 = vld [vmem:[#allocation17_spill] sm:$0xff]  ;;  %v6869_v60 = vld [vmem:[%s7068_s21 + $0xa0] sm:$0xf] }
 0x112   : > { %v8370_v4 = vrot.slane %v3989_v22, 5  ;;  %v8372_v52 = vrot.slane %v3993_v33, 4  ;;  %v5795_v54 = vcombine.low %v8351_v14, %v8367_v26  ;;  %v8378_v27 = vsel %vm7320_vm7, %v4462_v1, %v4463_v46  ;;  %v5765_v33 = vld [vmem:[%s7068_s21 + $0x84] sm:$0xe]  ;;  %v6679_v1 = vld [vmem:[%s7068_s21 + $0x18] sm:$0xff]  }
 0x113   : > { %v3999_v49 = vshll.u32 %v8342_v35, 16  ;;  %v4013_v50 = vshll.u32 %v8345_v58, 16  ;;  %v5796_v53 = vcombine.low %v8357_v45, %v8378_v27  ;;  %v5780_v22 = vrot.slane %v5764_v19, 9  ;;  %v6873_v27 = vld [vmem:[%s7068_s21 + $0xac] sm:$0xf] }
 0x114   : > { %v4006_v38 = vrot.slane %v4004_v47, 4  ;;  %v4470_v30 = vrot.slane %v9122_v59, 5  ;;  %v2329_v61 = vshrl.u32 %v5491_v55, 16  ;;  %v4009_v63 = vrot.slane %v4007_v29, 5  ;;  %v5720_v29 = vld [vmem:[%s7068_s21 + $0xcc] sm:$0xf] }
 0x115   : > { %v4017_v18 = vshrl.u32 %v8345_v58, 16  ;;  %v2332_v43 = vshll.u32 %v5491_v55, 16  ;;  %v5781_v37 = vrot.slane %v5765_v33, 9  ;;  %v3968_v9 = vsel %vm7094_vm4, %v8339_v12, %v8278_v42  ;;  %v8421_v55 = vld [vmem:[%s7068_s21 + $0xd0] sm:$0xf] }
 0x116   : > { %6267 = vmatmul.mubr.msk.bf16.gmra.mrb[12].mxu0 %vm742_vm3, %v8276_v44  ;;  %v4467_v44 = vrot.slane %v9121_v23, 5  ;;  %v2331_v51 = vrot.slane %v2329_v61, 4  ;;  %v3986_v11 = vor.u32 %v8363_v62, %v8353_v21  ;;  %v4474_v47 = vrot.slane %v9125_v28, 5  ;;  %v6680_v21 = vld [vmem:[%s7068_s21 + $0x24] sm:$0xff]  }
 0x117   : > { %6113 = vmatmul.mubr.msk.bf16.gmra.mrb[28].mxu1 %vm742_vm3, %v5382_v56  ;;  %6270 = vmatprep.mubr.msk.bf16.mxu0 %vm742_vm3, %v8280_v41  ;;  %v9124_v56 = vld [vmem:[#allocation8_spill] sm:$0xff]  ;;  %v2334_v46 = vrot.slane %v2332_v43, 5  ;;  %v3978_v19 = vsel %vm7094_vm4, %v8361_v8, %v8290_v17  ;;  %v4477_v12 = vrot.slane %v8173_v2, 5  ;;  %v8429_v62 = vrot.slane %v4013_v50, 5  ;;  %v5766_v8 = vld [vmem:[%s7068_s21 + $0x90] sm:$0xe] }
 0x118   : > { %6118 = vmatprep.mubr.msk.bf16.mxu1 %vm742_vm3, %v6678_v6  ;;  %v2351_v41 = vsel %vm7094_vm4, %v9124_v56, %v9123_v16  ;;  %v8403_v20 = vsel %vm7320_vm7, %v5780_v22, %v4467_v44  ;;  %v4469_v31 = vrot.slane %v4467_v44, 4  ;;  %v3996_v6 = vor.u32 %v8372_v52, %v8370_v4  ;;  %v8435_v52 = vld [vmem:[%s7068_s21 + $0xc8] sm:$0x1]  ;;  %v9127_v16 = vld [vmem:[#allocation5_spill] sm:$0xff] }
 0x119   : > { %v4019_v22 = vrot.slane %v4017_v18, 4  ;;  %v2335_v17 = vor.u32 %v2334_v46, %v2331_v51  ;;  %v4001_v23 = vrot.slane %v3999_v49, 5  ;;  %v4010_v44 = vor.u32 %v4009_v63, %v4006_v38  ;;  %v9128_v51 = vld [vmem:[#allocation6_spill] sm:$0xff] }
 0x11a   : > { %v8425_v42 = vsel %vm7320_vm7, %v4469_v31, %v4470_v30  ;;  %v8439_v59 = vsel %vm7320_vm7, %v5781_v37, %v4474_v47  ;;  %v4476_v30 = vrot.slane %v4474_v47, 4  ;;  %v4028_v2 = vshrl.u32 %v5720_v29, 16 }
 0x11b   : > { %v5797_v33 = vcombine.low %v8403_v20, %v8425_v42  ;;  %v4031_v50 = vshll.u32 %v5720_v29, 16  ;;  %v4037_v61 = vshll.u32 %v8421_v55, 16  ;;  %v2336_v18 = vrot.slane %v2335_v17, 4  ;;  %v6681_v29 = vld [vmem:[%s7068_s21 + $0x30] sm:$0xff]  }
 0x11c   : > { %v4041_v49 = vshrl.u32 %v8421_v55, 16  ;;  %v8450_v38 = vsel %vm7320_vm7, %v4476_v30, %v4477_v12  ;;  %v5782_v63 = vrot.slane %v5766_v8, 9  ;;  %v4020_v56 = vor.u32 %v4019_v22, %v8429_v62 }
 0x11d   : > { %v4023_v31 = vshll.u32 %v8435_v52, 16  ;;  %v5798_v37 = vcombine.low %v8439_v59, %v8450_v38  ;;  %v5736_v46 = vcombine.low %v3968_v9, %v3978_v19  ;;  %v3987_v28 = vrot.slane %v3986_v11, 4  ;;  %v5767_v11 = vld [vmem:[%s7068_s21 + $0x9c] sm:$0xe] }
 0x11e   : > { %6271 = vmatmul.mubr.msk.bf16.gmra.mrb[16].mxu0 %vm742_vm3, %v8282_v5  ;;  %v9126_v5 = vld [vmem:[#allocation18_spill] sm:$0xff]  ;;  %v3997_v47 = vrot.slane %v3996_v6, 4  ;;  %v4011_v12 = vrot.slane %v4010_v44, 4  ;;  %v4484_v8 = vrot.slane %v8182_v3, 5  ;;  %v4030_v30 = vrot.slane %v4028_v2, 4 }
 0x11f   : > { %6119 = vmatmul.mubr.msk.bf16.vlgmr.msra.gmra.mrb[0].mxu1 %vm742_vm3, %v6679_v1  ;;  %6274 = vmatprep.mubr.msk.bf16.mxu0 %vm742_vm3, %v8284_v7  ;;  %v4481_v43 = vrot.slane %v9126_v5, 5  ;;  %v2341_v7 = vsel %vm7094_vm4, %v2336_v18, %v9128_v51  ;;  %v4033_v18 = vrot.slane %v4031_v50, 5  ;;  %v8473_v5 = vrot.slane %v4037_v61, 5  ;;  %v6682_v19 = vld [vmem:[%s7068_s21 + $0x3c] sm:$0xff]  }
 0x120   : > { %6321 = vmatpush3.bf16.msra.mxu1 %v9127_v16  ;;  %6122 = vmatprep.mubr.msk.bf16.mxu1 %vm742_vm3, %v6680_v21  ;;  %v8462_v1 = vcombine.low %v2341_v7, %v2351_v41  ;;  %v8466_v21 = vld [vmem:[%s7068_s21 + $0xd4] sm:$0x1]  ;;  %v4043_v9 = vrot.slane %v4041_v49, 4  ;;  %v4021_v41 = vrot.slane %v4020_v56, 4  ;;  %v4025_v6 = vrot.slane %v4023_v31, 5 }
 0x121   : > { %v8470_v22 = vsel %vm7320_vm7, %v5782_v63, %v4481_v43  ;;  %v4483_v17 = vrot.slane %v4481_v43, 4  ;;  %v3992_v63 = vsel %vm7094_vm4, %v3987_v28, %v8370_v4  ;;  %v4002_v2 = vsel %vm7094_vm4, %v3997_v47, %v4001_v23  ;;  %v6860_v16 = vld [vmem:[%s7068_s21 + $0x1c] sm:$0xf]  ;;  %v5768_v28 = vld [vmem:[%s7068_s21 + $0xa8] sm:$0xe] }
 0x122   : > { %v4047_v50 = vshll.u32 %v8466_v21, 16  ;;  %v5783_v61 = vrot.slane %v5767_v11, 9  ;;  %v4488_v49 = vrot.slane %v8170_v25, 5  ;;  %v4016_v4 = vsel %vm7094_vm4, %v4011_v12, %v8429_v62  ;;  %v5756_v62 = vld [vmem:[%s7068_s21 + $0x18] sm:$0xe]  ;;  %v6683_v47 = vld [vmem:[%s7068_s21 + $0x48] sm:$0xff]  }
 0x123   : > { %v8479_v44 = vsel %vm7320_vm7, %v4483_v17, %v4484_v8  ;;  %v4044_v43 = vor.u32 %v4043_v9, %v8473_v5  ;;  %v4491_v23 = vrot.slane %v8215_v57, 5  ;;  %v4026_v25 = vsel %vm7094_vm4, %v4021_v41, %v4025_v6  ;;  %v6861_v11 = vld [vmem:[%s7068_s21 + $0x20] sm:$0x1] }
 0x124   : > { %v5799_v3 = vcombine.low %v8470_v22, %v8479_v44  ;;  %v4411_v56 = vrot.slane %v6860_v16, 5  ;;  %v8505_v31 = vsel %vm7320_vm7, %v5783_v61, %v4488_v49  ;;  %v4490_v51 = vrot.slane %v4488_v49, 4  ;;  %v5769_v49 = vld [vmem:[%s7068_s21 + $0xb4] sm:$0xe] }
 0x125   : > { %v5737_v7 = vcombine.low %v3992_v63, %v4002_v2  ;;  %v4045_v17 = vrot.slane %v4044_v43, 4  ;;  %v5784_v41 = vrot.slane %v5768_v28, 9  ;;  %v4495_v6 = vrot.slane %v8218_v34, 5  ;;  %v5757_v2 = vld [vmem:[%s7068_s21 + $0x24] sm:$0xe] }
 0x126   : > { %6275 = vmatmul.mubr.msk.bf16.gmra.mrb[20].mxu0 %vm742_vm3, %v8317_v24  ;;  %v4034_v24 = vor.u32 %v4033_v18, %v4030_v30  ;;  %v8510_v57 = vsel %vm7320_vm7, %v4490_v51, %v4491_v23  ;;  %v6684_v30 = vld [vmem:[%s7068_s21 + $0x54] sm:$0xff]   ;;  %v5772_v18 = vrot.slane %v5756_v62, 9  ;;  %v4413_v9 = vrot.slane %v4411_v56, 4  ;;  %v6864_v28 = vld [vmem:[%s7068_s21 + $0x2c] sm:$0x1] }
 0x127   : > { %6123 = vmatmul.mubr.msk.bf16.gmra.mrb[4].mxu1 %vm742_vm3, %v6681_v29  ;;  %6278 = vmatprep.mubr.msk.bf16.mxu0 %vm742_vm3, %v5736_v46  ;;  %v4049_v46 = vrot.slane %v4047_v50, 5  ;;  %v5738_v29 = vcombine.low %v4016_v4, %v4026_v25  ;;  %v5800_v8 = vcombine.low %v8505_v31, %v8510_v57  ;;  %v4498_v63 = vrot.slane %v8228_v48, 5  ;;  %v6862_v50 = vld [vmem:[%s7068_s21 + $0x28] sm:$0xf]  ;;  %v5758_v25 = vld [vmem:[%s7068_s21 + $0x30] sm:$0xe] }
 0x128   : > { %6126 = vmatprep.mubr.msk.bf16.mxu1 %vm742_vm3, %v6682_v19  ;;  %v4035_v12 = vrot.slane %v4034_v24, 4  ;;  %v4414_v19 = vrot.slane %v6861_v11, 5  ;;  %v4418_v61 = vrot.slane %v6862_v50, 5  ;;  %v8533_v48 = vsel %vm7320_vm7, %v5784_v41, %v4495_v6  ;;  %v6686_v11 = vld [vmem:[%s7068_s21 + $0x6c] sm:$0xff]   ;;  %v5770_v50 = vld [vmem:[%s7068_s21 + $0xc0] sm:$0xe] }
 0x129   : > { %v4050_v34 = vsel %vm7094_vm4, %v4045_v17, %v4049_v46  ;;  %v4497_v24 = vrot.slane %v4495_v6, 4  ;;  %v4412_v43 = vsel %vm7320_vm7, %v5772_v18, %v4411_v56  ;;  %v5773_v51 = vrot.slane %v5757_v2, 9  ;;  %v9129_v41 = vld [vmem:[#allocation9_spill] sm:$0xff]  ;;  %v6878_v31 = vld [vmem:[%s7068_s21 + $0xc8] sm:$0x1] }
 0x12a   : > { %v4040_v4 = vsel %vm7094_vm4, %v4035_v12, %v8473_v5  ;;  %v4415_v23 = vsel %vm7320_vm7, %v4413_v9, %v4414_v19  ;;  %v6863_v5 = vld [vmem:[%s7068_s21 + $0x34] sm:$0xf]  ;;  %v6685_v12 = vld [vmem:[%s7068_s21 + $0x60] sm:$0xff]   ;;  %v5774_v18 = vrot.slane %v5758_v25, 9  ;;  %v4505_v9 = vrot.slane %v8342_v35, 5 }
 0x12b   : > { %v4425_v16 = vrot.slane %v6863_v5, 5  ;;  %v8544_v62 = vsel %vm7320_vm7, %v4497_v24, %v4498_v63  ;;  %v5739_v46 = vcombine.low %v4040_v4, %v4050_v34  ;;  %v5789_v17 = vcombine.low %v4412_v43, %v4415_v23  ;;  %v5759_v24 = vld [vmem:[%s7068_s21 + $0x3c] sm:$0xe] }
 0x12c   : > { %v5801_v56 = vcombine.low %v8533_v48, %v8544_v62  ;;  %v4428_v6 = vrot.slane %v9129_v41, 5  ;;  %v4419_v35 = vsel %vm7320_vm7, %v5773_v51, %v4418_v61  ;;  %v5786_v5 = vrot.slane %v5770_v50, 9 }
 0x12d   : > { %v4427_v19 = vrot.slane %v4425_v16, 4  ;;  %v4426_v23 = vsel %vm7320_vm7, %v5774_v18, %v4425_v16  ;;  %v4512_v51 = vrot.slane %v8435_v52, 5  ;;  %v2492_v57 = vshll.u32 %v6878_v31, 16 }
 0x12e   : > { %6279 = vmatmul.mubr.msk.bf16.gmra.mrb[24].mxu0 %vm742_vm3, %v5737_v7  ;;  %v5785_v7 = vrot.slane %v5769_v49, 9 }
 0x12f   : > { %6127 = vmatmul.mubr.msk.bf16.gmra.mrb[8].mxu1 %vm742_vm3, %v6683_v47  ;;  %6282 = vmatprep.mubr.msk.bf16.mxu0 %vm742_vm3, %v5738_v29  ;;  %v4421_v47 = vrot.slane %v6864_v28, 5  ;;  %v4502_v29 = vrot.slane %v8293_v39, 5  ;;  %v9130_v39 = vld [vmem:[#allocation10_spill] sm:$0xff]  ;;  %v4429_v25 = vsel %vm7320_vm7, %v4427_v19, %v4428_v6  ;;  %v5775_v28 = vrot.slane %v5759_v24, 9 }
 0x130   : > { %6130 = vmatprep.mubr.msk.bf16.mxu1 %vm742_vm3, %v6684_v30  ;;  %v4420_v30 = vrot.slane %v4418_v61, 4  ;;  %v4432_v49 = vrot.slane %v9130_v39, 5  ;;  %v4509_v61 = vrot.slane %v8345_v58, 5  ;;  %v6865_v39 = vld [vmem:[%s7068_s21 + $0x70] sm:$0xf]  ;;  %v4516_v24 = vrot.slane %v8421_v55, 5 }
 0x131   : > { %v8556_v63 = vsel %vm7320_vm7, %v5785_v7, %v4502_v29  ;;  %v4504_v2 = vrot.slane %v4502_v29, 4  ;;  %v5488_v7 = vld [vmem:[%s7068_s21 + $0x6c] sm:$0xf]  ;;  %v9131_v29 = vld [vmem:[#allocation11_spill] sm:$0xff] }
 0x132   : > { %v4422_v34 = vsel %vm7320_vm7, %v4420_v30, %v4421_v47  ;;  %v4434_v47 = vrot.slane %v4432_v49, 4  ;;  %v6687_v30 = vld [vmem:[%s7068_s21 + $0x78] sm:$0xff]   ;;  %v8587_v16 = vsel %vm7320_vm7, %v5786_v5, %v4509_v61  ;;  %v4511_v18 = vrot.slane %v4509_v61, 4 }
 0x133   : > { %v8563_v4 = vsel %vm7320_vm7, %v4504_v2, %v4505_v9  ;;  %v5791_v9 = vcombine.low %v4426_v23, %v4429_v25  ;;  %v2305_v19 = vshrl.u32 %v5488_v7, 16  ;;  %v2308_v41 = vshll.u32 %v5488_v7, 16 }
 0x134   : > { %v5802_v43 = vcombine.low %v8556_v63, %v8563_v4  ;;  %v8592_v58 = vsel %vm7320_vm7, %v4511_v18, %v4512_v51  ;;  %v4433_v6 = vsel %vm7320_vm7, %v5775_v28, %v4432_v49  ;;  %v4519_v49 = vrot.slane %v8466_v21, 5  ;;  %v6689_v51 = vld [vmem:[%s7068_s21 + $0x90] sm:$0xff]   ;;  %v6690_v21 = vld [vmem:[%s7068_s21 + $0x9c] sm:$0xff]  }
 0x135   : > { %v5803_v50 = vcombine.low %v8587_v16, %v8592_v58  ;;  %v2307_v23 = vrot.slane %v2305_v19, 4  ;;  %v2310_v25 = vrot.slane %v2308_v41, 5  ;;  %v4518_v7 = vrot.slane %v4516_v24, 4 }
 0x136   : > { %6283 = vmatmul.mubr.msk.bf16.gmra.mrb[28].mxu0 %vm742_vm3, %v5739_v46  ;;  %v5790_v46 = vcombine.low %v4419_v35, %v4422_v34  ;;  %v2314_v35 = vshll.u32 %v6865_v39, 16  ;;  %v2318_v34 = vshrl.u32 %v6865_v39, 16 }
 0x137   : > { %6131 = vmatmul.mubr.msk.bf16.gmra.mrb[12].mxu1 %vm742_vm3, %v6685_v12  ;;  %6288 = vmatprep.mubr.msk.bf16.mxu0 %vm742_vm3, %v5789_v17  ;;  %v4435_v12 = vrot.slane %v9131_v29, 5  ;;  %v5771_v17 = vld [vmem:[%s7068_s21 + $0xcc] sm:$0xe]  ;;  %v8614_v55 = vsel %vm7320_vm7, %v4518_v7, %v4519_v49 }
 0x138   : > { %6134 = vmatprep.mubr.msk.bf16.mxu1 %vm742_vm3, %v6686_v11  ;;  %v6688_v11 = vld [vmem:[%s7068_s21 + $0x84] sm:$0xff]   ;;  %v5787_v52 = vrot.slane %v5771_v17, 9  ;;  %v2320_v28 = vrot.slane %v2318_v34, 4  ;;  %v6866_v17 = vld [vmem:[%s7068_s21 + $0x74] sm:$0x1] }
 0x139   : > { %v4436_v2 = vsel %vm7320_vm7, %v4434_v47, %v4435_v12  ;;  %v5494_v47 = vld [vmem:[%s7068_s21 + $0x84] sm:$0xf]  ;;  %v2311_v12 = vor.u32 %v2310_v25, %v2307_v23  ;;  %v6692_v34 = vld [vmem:[%s7068_s21 + $0xb4] sm:$0xff]  }
 0x13a   : > { %v8609_v5 = vsel %vm7320_vm7, %v5787_v52, %v4516_v24  ;;  %v5792_v61 = vcombine.low %v4433_v6, %v4436_v2  ;;  %v2356_v18 = vshll.u32 %v5494_v47, 16  ;;  %v5497_v6 = vld [vmem:[%s7068_s21 + $0x90] sm:$0xf]  ;;  %v6691_v2 = vld [vmem:[%s7068_s21 + $0xa8] sm:$0xff]  }
 0x13b   : > { %v5804_v29 = vcombine.low %v8609_v5, %v8614_v55  ;;  %v2312_v52 = vrot.slane %v2311_v12, 4  ;;  %v2377_v23 = vshrl.u32 %v5497_v6, 16  ;;  %v2380_v25 = vshll.u32 %v5497_v6, 16 }
 0x13c   : > { %v2410_v12 = vshll.u32 %v6869_v60, 16 }
 0x13d   : > { %v2382_v14 = vrot.slane %v2380_v25, 5  ;;  %v6872_v25 = vld [vmem:[%s7068_s21 + $0xa4] sm:$0x1] }
 0x13e   : > { %6289 = vmatmul.mubr.msk.bf16.vlgmr.msra.gmra.mrb[0].mxu0 %vm742_vm3, %v5790_v46  ;;  %v2316_v46 = vrot.slane %v2314_v35, 5  ;;  %v5500_v35 = vld [vmem:[%s7068_s21 + $0x9c] sm:$0xf]  ;;  %v8656_v6 = vrot.slane %v2410_v12, 5 }
 0x13f   : > { %6135 = vmatmul.mubr.msk.bf16.gmra.mrb[16].mxu1 %vm742_vm3, %v6687_v30  ;;  %6292 = vmatprep.mubr.msk.bf16.mxu0 %vm742_vm3, %v5791_v9  ;;  %v2324_v30 = vshll.u32 %v6866_v17, 16  ;;  %v2353_v9 = vshrl.u32 %v5494_v47, 16  ;;  %v2404_v47 = vshll.u32 %v5500_v35, 16  ;;  %v6870_v17 = vld [vmem:[%s7068_s21 + $0x8c] sm:$0x1] }
 0x140   : > { %6138 = vmatprep.mubr.msk.bf16.mxu1 %vm742_vm3, %v6688_v11  ;;  %v2321_v13 = vor.u32 %v2320_v28, %v2316_v46  ;;  %v6867_v11 = vld [vmem:[%s7068_s21 + $0x88] sm:$0xf]  ;;  %v2317_v7 = vsel %vm7094_vm4, %v2312_v52, %v2316_v46 }
 0x141   : > { %v2362_v19 = vshll.u32 %v6867_v11, 16  ;;  %v2366_v41 = vshrl.u32 %v6867_v11, 16  ;;  %v2326_v0 = vrot.slane %v2324_v30, 5  ;;  %v2355_v36 = vrot.slane %v2353_v9, 4 }
 0x142   : > { %v2322_v39 = vrot.slane %v2321_v13, 4  ;;  %v2372_v30 = vshll.u32 %v6870_v17, 16  ;;  %v2379_v9 = vrot.slane %v2377_v23, 4  ;;  %v2406_v11 = vrot.slane %v2404_v47, 5 }
 0x143   : > { %v8633_v24 = vrot.slane %v2362_v19, 5  ;;  %v2368_v49 = vrot.slane %v2366_v41, 4  ;;  %v6693_v19 = vld [vmem:[%s7068_s21 + $0xc0] sm:$0xff]  }
 0x144   : > { %v2327_v46 = vsel %vm7094_vm4, %v2322_v39, %v2326_v0  ;;  %v5503_v39 = vld [vmem:[%s7068_s21 + $0xa8] sm:$0xf] }
 0x145   : > { %v2369_v13 = vor.u32 %v2368_v49, %v8633_v24  ;;  %v5521_v41 = vcombine.low %v2317_v7, %v2327_v46  ;;  %v2420_v7 = vshll.u32 %v6872_v25, 16  ;;  %v2428_v45 = vshll.u32 %v5503_v39, 16 }
 0x146   : > { %6293 = vmatmul.mubr.msk.bf16.gmra.mrb[4].mxu0 %vm742_vm3, %v5792_v61  ;;  %v6868_v61 = vld [vmem:[%s7068_s21 + $0x94] sm:$0xf] }
 0x147   : > { %6139 = vmatmul.mubr.msk.bf16.gmra.mrb[20].mxu1 %vm742_vm3, %v6689_v51  ;;  %6296 = vmatprep.mubr.msk.bf16.mxu0 %vm742_vm3, %v5793_v10  ;;  %v2358_v10 = vrot.slane %v2356_v18, 5  ;;  %v2386_v51 = vshll.u32 %v6868_v61, 16  ;;  %v2390_v28 = vshrl.u32 %v6868_v61, 16  ;;  %v2370_v0 = vrot.slane %v2369_v13, 4 }
 0x148   : > { %6142 = vmatprep.mubr.msk.bf16.mxu1 %vm742_vm3, %v6690_v21  ;;  %v2401_v21 = vshrl.u32 %v5500_v35, 16  ;;  %v6871_v35 = vld [vmem:[%s7068_s21 + $0x98] sm:$0x1]  ;;  %v2425_v61 = vshrl.u32 %v5503_v39, 16  ;;  %v5509_v39 = vld [vmem:[%s7068_s21 + $0xc0] sm:$0xf] }
 0x149   : > { %v2359_v15 = vor.u32 %v2358_v10, %v2355_v36  ;;  %v8653_v26 = vrot.slane %v2386_v51, 5  ;;  %v2374_v36 = vrot.slane %v2372_v30, 5  ;;  %v2383_v10 = vor.u32 %v2382_v14, %v2379_v9  ;;  %v5506_v51 = vld [vmem:[%s7068_s21 + $0xb4] sm:$0xf] }
 0x14a   : > { %v2403_v18 = vrot.slane %v2401_v21, 4  ;;  %v2438_v21 = vshrl.u32 %v6873_v27, 16  ;;  %v2449_v20 = vshrl.u32 %v5506_v51, 16  ;;  %v2452_v42 = vshll.u32 %v5506_v51, 16 }
 0x14b   : > { %v2360_v52 = vrot.slane %v2359_v15, 4  ;;  %v2375_v46 = vsel %vm7094_vm4, %v2370_v0, %v2374_v36  ;;  %v2384_v15 = vrot.slane %v2383_v10, 4  ;;  %v2422_v30 = vrot.slane %v2420_v7, 5 }
 0x14c   : > { %v2407_v23 = vor.u32 %v2406_v11, %v2403_v18  ;;  %v2427_v9 = vrot.slane %v2425_v61, 4  ;;  %v2440_v11 = vrot.slane %v2438_v21, 4  ;;  %v6877_v61 = vld [vmem:[%s7068_s21 + $0xbc] sm:$0x1] }
 0x14d   : > { %v2365_v47 = vsel %vm7094_vm4, %v2360_v52, %v8633_v24  ;;  %v2389_v0 = vsel %vm7094_vm4, %v2384_v15, %v8653_v26  ;;  %v2468_v22 = vshll.u32 %v6877_v61, 16 }
 0x14e   : > { %6297 = vmatmul.mubr.msk.bf16.gmra.mrb[8].mxu0 %vm742_vm3, %v5794_v40  ;;  %v2414_v40 = vshrl.u32 %v6869_v60, 16  ;;  %v2408_v17 = vrot.slane %v2407_v23, 4  ;;  %v5523_v24 = vcombine.low %v2365_v47, %v2375_v46 }
 0x14f   : > { %6143 = vmatmul.mubr.msk.bf16.gmra.mrb[24].mxu1 %vm742_vm3, %v6691_v2  ;;  %6300 = vmatprep.mubr.msk.bf16.mxu0 %vm742_vm3, %v5795_v54  ;;  %v2392_v54 = vrot.slane %v2390_v28, 4 }
 0x150   : > { %6146 = vmatprep.mubr.msk.bf16.mxu1 %vm742_vm3, %v6692_v34  ;;  %v2416_v2 = vrot.slane %v2414_v40, 4  ;;  %v2396_v34 = vshll.u32 %v6871_v35, 16  ;;  %v2413_v10 = vsel %vm7094_vm4, %v2408_v17, %v8656_v6  ;;  %v2494_v17 = vrot.slane %v2492_v57, 5 }
 0x151   : > { %v2393_v49 = vor.u32 %v2392_v54, %v8653_v26  ;;  %v2430_v54 = vrot.slane %v2428_v45, 5  ;;  %v6875_v26 = vld [vmem:[%s7068_s21 + $0xb0] sm:$0x1] }
 0x152   : > { %v2417_v28 = vor.u32 %v2416_v2, %v8656_v6  ;;  %v2398_v60 = vrot.slane %v2396_v34, 5  ;;  %v2444_v35 = vshll.u32 %v6875_v26, 16  ;;  %v2473_v34 = vshrl.u32 %v5509_v39, 16 }
 0x153   : > { %v2394_v13 = vrot.slane %v2393_v49, 4  ;;  %v2431_v38 = vor.u32 %v2430_v54, %v2427_v9  ;;  %v2476_v6 = vshll.u32 %v5509_v39, 16  ;;  %v6876_v49 = vld [vmem:[%s7068_s21 + $0xc4] sm:$0xf] }
 0x154   : > { %v2418_v14 = vrot.slane %v2417_v28, 4  ;;  %v2482_v23 = vshll.u32 %v6876_v49, 16  ;;  %v2486_v25 = vshrl.u32 %v6876_v49, 16  ;;  %v2446_v45 = vrot.slane %v2444_v35, 5 }
 0x155   : > { %v2399_v36 = vsel %vm7094_vm4, %v2394_v13, %v2398_v60  ;;  %v2432_v51 = vrot.slane %v2431_v38, 4  ;;  %v2470_v60 = vrot.slane %v2468_v22, 5 }
 0x156   : > { %6301 = vmatmul.mubr.msk.bf16.gmra.mrb[12].mxu0 %vm742_vm3, %v5796_v53  ;;  %v2434_v53 = vshll.u32 %v6873_v27, 16  ;;  %v2423_v59 = vsel %vm7094_vm4, %v2418_v14, %v2422_v30  ;;  %v5524_v44 = vcombine.low %v2389_v0, %v2399_v36  ;;  %v2475_v27 = vrot.slane %v2473_v34, 4  ;;  %v8762_v36 = vld [vmem:[%s9061_s3] ss:$0 sm:$0xff] }
 0x157   : > { %6147 = vmatmul.mubr.msk.bf16.gmra.mrb[28].mxu1 %vm742_vm3, %v6693_v19  ;;  %6304 = vmatprep.mubr.msk.bf16.mxu0 %vm742_vm3, %v5797_v33  ;;  %v6874_v33 = vld [vmem:[%s7068_s21 + $0xb8] sm:$0xf]  ;;  %v2451_v19 = vrot.slane %v2449_v20, 4  ;;  %v2484_v21 = vrot.slane %v2482_v23, 5  ;;  %v2488_v47 = vrot.slane %v2486_v25, 4 }
 0x158   : > { %6168 = vmatprep.mubr.msk.bf16.mxu1 %vm742_vm3, %v5521_v41  ;;  %v2458_v12 = vshll.u32 %v6874_v33, 16  ;;  %v2462_v40 = vshrl.u32 %v6874_v33, 16  ;;  %v2436_v18 = vrot.slane %v2434_v53, 5  ;;  %v2454_v41 = vrot.slane %v2452_v42, 5 }
 0x159   : > { %v2478_v53 = vrot.slane %v2476_v6, 5 }
 0x15a   : > { %v2460_v52 = vrot.slane %v2458_v12, 5  ;;  %v2464_v2 = vrot.slane %v2462_v40, 4  ;;  %v2437_v20 = vsel %vm7094_vm4, %v2432_v51, %v2436_v18  ;;  %v2489_v12 = vor.u32 %v2488_v47, %v2484_v21 }
 0x15b   : > { %v2479_v33 = vor.u32 %v2478_v53, %v2475_v27 }
 0x15c   : > { %v2465_v7 = vor.u32 %v2464_v2, %v2460_v52  ;;  %v2490_v13 = vrot.slane %v2489_v12, 4  ;;  %v8757_v2 = vld [vmem:[%s9060_s2] ss:$0 sm:$0xff] }
 0x15d   : > { %v2480_v40 = vrot.slane %v2479_v33, 4 }
 0x15e   : > { %6305 = vmatmul.mubr.msk.bf16.gmra.mrb[16].mxu0 %vm742_vm3, %v5798_v37  ;;  %v2441_v37 = vor.u32 %v2440_v11, %v2436_v18  ;;  %v2466_v15 = vrot.slane %v2465_v7, 4  ;;  %v2495_v9 = vsel %vm7094_vm4, %v2490_v13, %v2494_v17 }
 0x15f   : > { %6169 = vmatmul.mubr.msk.bf16.vlgmr.msra.gmra.mrb[16].mxu1 %vm742_vm3, %v8462_v1  ;;  %6308 = vmatprep.mubr.msk.bf16.mxu0 %vm742_vm3, %v5799_v3  ;;  %v2455_v1 = vor.u32 %v2454_v41, %v2451_v19  ;;  %v5525_v3 = vcombine.low %v2413_v10, %v2423_v59  ;;  %v2485_v30 = vsel %vm7094_vm4, %v2480_v40, %v2484_v21 }
 0x160   : > { %6172 = vmatprep.mubr.msk.bf16.mxu1 %vm742_vm3, %v5523_v24  ;;  %v2442_v28 = vrot.slane %v2441_v37, 4  ;;  %v2471_v48 = vsel %vm7094_vm4, %v2466_v15, %v2470_v60  ;;  %v5528_v14 = vcombine.low %v2485_v30, %v2495_v9 }
 0x161   : > { %v2456_v46 = vrot.slane %v2455_v1, 4 }
 0x162   : > { %v2447_v42 = vsel %vm7094_vm4, %v2442_v28, %v2446_v45 }
 0x163   : > { %v5526_v62 = vcombine.low %v2437_v20, %v2447_v42 }
 0x166   : > { %6309 = vmatmul.mubr.msk.bf16.gmra.mrb[20].mxu0 %vm742_vm3, %v5800_v8  ;;  %v2461_v8 = vsel %vm7094_vm4, %v2456_v46, %v2460_v52 }
 0x167   : > { %6173 = vmatmul.mubr.msk.bf16.gmra.mrb[20].mxu1 %vm742_vm3, %v5524_v44  ;;  %6312 = vmatprep.mubr.msk.bf16.mxu0 %vm742_vm3, %v5801_v56  ;;  %v5527_v56 = vcombine.low %v2461_v8, %v2471_v48 }
 0x168   : > { %6176 = vmatprep.mubr.msk.bf16.mxu1 %vm742_vm3, %v5525_v3 }
 0x16e   : > { %6313 = vmatmul.mubr.msk.bf16.gmra.mrb[24].mxu0 %vm742_vm3, %v5802_v43 }
 0x16f   : > { %6177 = vmatmul.mubr.msk.bf16.gmra.mrb[24].mxu1 %vm742_vm3, %v5526_v62  ;;  %6316 = vmatprep.mubr.msk.bf16.mxu0 %vm742_vm3, %v5803_v50 }
 0x170   : > { %6180 = vmatprep.mubr.msk.bf16.mxu1 %vm742_vm3, %v5527_v56 }
 0x176   : > { %6317 = vmatmul.mubr.msk.bf16.gmra.mrb[28].mxu0 %vm742_vm3, %v5804_v29 }
 0x177   : > { %6181 = vmatmul.mubr.msk.bf16.gmra.mrb[28].mxu1 %vm742_vm3, %v5528_v14 }
 0x1f2   : > { %v6120_v63 = vpop.f32.mrb[0].mxu1 }
 0x1f3   : > { %v1905_v4 = vpop.f32.mrb[1].mxu1 }
 0x1f4   : > { %v6121_v43 = vpop.f32.mrb[2].mxu1 }
 0x1f5   : > { %v1908_v16 = vpop.f32.mrb[3].mxu1 }
 0x1fa   : > { %v6124_v58 = vpop.f32.mrb[4].mxu1 }
 0x1fb   : > { %v1921_v50 = vpop.f32.mrb[5].mxu1 }
 0x1fc   : > { %v6125_v54 = vpop.f32.mrb[6].mxu1 }
 0x1fd   : > { %v1924_v18 = vpop.f32.mrb[7].mxu1 }
 0x202   : > { %v6128_v11 = vpop.f32.mrb[8].mxu1 }
 0x203   : > { %v1937_v24 = vpop.f32.mrb[9].mxu1 }
 0x204   : > { %v6129_v32 = vpop.f32.mrb[10].mxu1 }
 0x205   : > { %v8744_v19 = vpop.f32.mrb[11].mxu1 }
 0x20a   : > { %v8746_v41 = vpop.f32.mrb[12].mxu1 }
 0x20b   : > { %v8748_v5 = vpop.f32.mrb[13].mxu1 }
 0x20c   : > { %v8750_v55 = vpop.f32.mrb[14].mxu1 }
 0x20d   : > { %v8752_v29 = vpop.f32.mrb[15].mxu1 }
 0x211   : > { %v6290_v52 = vpop.f32.mrb[0].mxu0 }
 0x212   : > { %v6322_v39 = vadd.f32 %v6290_v52, %v6120_v63  ;;  %v4656_v0 = vpop.f32.mrb[1].mxu0 }
 0x213   : > { %v6323_v10 = vadd.f32 %v4656_v0, %v1905_v4  ;;  %v6291_v59 = vpop.f32.mrb[2].mxu0 }
 0x214   : > { %v4824_v38 = vmul.f32 %v6322_v39, %v8757_v2  ;;  %v6324_v37 = vadd.f32 %v6291_v59, %v6121_v43  ;;  %v4659_v26 = vpop.f32.mrb[3].mxu0 }
 0x215   : > { %v4822_v35 = vmul.f32 %v6323_v10, %v8757_v2  ;;  %v6325_v34 = vadd.f32 %v4659_v26, %v1908_v16 }
 0x216   : > { %v8767_v6 = vadd.f32 %v8762_v36, %v4824_v38  ;;  %v4825_v49 = vmul.f32 %v6324_v37, %v8757_v2 }
 0x217   : > { %v8771_v23 = vadd.f32 %v8762_v36, %v4822_v35  ;;  %v4823_v25 = vmul.f32 %v6325_v34, %v8757_v2 }
 0x218   : > { %v5825_v1 = vmul.f32 -1.442695, %v8767_v6  ;;  %v8776_v7 = vadd.f32 %v8762_v36, %v4825_v49 }
 0x219   : > { %v5823_v61 = vmul.f32 -1.442695, %v8771_v23  ;;  %v8780_v22 = vadd.f32 %v8762_v36, %v4823_v25  ;;  %v6294_v44 = vpop.f32.mrb[4].mxu0 }
 0x21a   : > { %6694 = vpow2.f32 %v5825_v1  ;;  %v5826_v3 = vmul.f32 -1.442695, %v8776_v7  ;;  %v6326_v51 = vadd.f32 %v6294_v44, %v6124_v58  ;;  %v4672_v28 = vpop.f32.mrb[5].mxu0 }
 0x21b   : > { %6696 = vpow2.f32 %v5823_v61  ;;  %v5824_v45 = vmul.f32 -1.442695, %v8780_v22  ;;  %v6327_v27 = vadd.f32 %v4672_v28, %v1921_v50  ;;  %v6295_v53 = vpop.f32.mrb[6].mxu0 }
 0x21c   : > { %6698 = vpow2.f32 %v5826_v3  ;;  %v4828_v21 = vmul.f32 %v6326_v51, %v8757_v2  ;;  %v6328_v47 = vadd.f32 %v6295_v53, %v6125_v54  ;;  %v4675_v46 = vpop.f32.mrb[7].mxu0 }
 0x21d   : > { %6700 = vpow2.f32 %v5824_v45  ;;  %v4826_v15 = vmul.f32 %v6327_v27, %v8757_v2  ;;  %v6329_v60 = vadd.f32 %v4675_v46, %v1924_v18 }
 0x21e   : > { %v8787_v20 = vadd.f32 %v8762_v36, %v4828_v21  ;;  %v4829_v42 = vmul.f32 %v6328_v47, %v8757_v2 }
 0x21f   : > { %v8791_v33 = vadd.f32 %v8762_v36, %v4826_v15  ;;  %v4827_v12 = vmul.f32 %v6329_v60, %v8757_v2 }
 0x220   : > { %v5829_v31 = vmul.f32 -1.442695, %v8787_v20  ;;  %v8796_v57 = vadd.f32 %v8762_v36, %v4829_v42 }
 0x221   : > { %v5827_v8 = vmul.f32 -1.442695, %v8791_v33  ;;  %v8800_v48 = vadd.f32 %v8762_v36, %v4827_v12  ;;  %v6298_v62 = vpop.f32.mrb[8].mxu0 }
 0x222   : > { %6702 = vpow2.f32 %v5829_v31  ;;  %v5830_v56 = vmul.f32 -1.442695, %v8796_v57  ;;  %v6330_v40 = vadd.f32 %v6298_v62, %v6128_v11  ;;  %v4688_v13 = vpop.f32.mrb[9].mxu0 }
 0x223   : > { %6704 = vpow2.f32 %v5827_v8  ;;  %v5828_v17 = vmul.f32 -1.442695, %v8800_v48  ;;  %v6331_v30 = vadd.f32 %v4688_v13, %v1937_v24  ;;  %v6299_v9 = vpop.f32.mrb[10].mxu0 }
 0x224   : > { %v6695_v14 = vpop.eup %6694  ;;  %6706 = vpow2.f32 %v5830_v56  ;;  %v4832_v63 = vmul.f32 %v6330_v40, %v8757_v2  ;;  %v6332_v4 = vadd.f32 %v6299_v9, %v6129_v32  ;;  %v4691_v43 = vpop.f32.mrb[11].mxu0 }
 0x225   : > { %v6697_v16 = vpop.eup %6696  ;;  %v4991_v58 = vadd.f32 1.0, %v6695_v14  ;;  %6708 = vpow2.f32 %v5828_v17  ;;  %v4830_v50 = vmul.f32 %v6331_v30, %v8757_v2  ;;  %v6333_v54 = vadd.f32 %v4691_v43, %v8744_v19 }
 0x226   : > { %v6699_v18 = vpop.eup %6698  ;;  %v4989_v11 = vadd.f32 1.0, %v6697_v16  ;;  %v8808_v52 = vadd.f32 %v8762_v36, %v4832_v63  ;;  %v4833_v24 = vmul.f32 %v6332_v4, %v8757_v2 }
 0x227   : > { %v6701_v39 = vpop.eup %6700  ;;  %6710 = vrcp.f32 %v4991_v58  ;;  %v4992_v0 = vadd.f32 1.0, %v6699_v18  ;;  %v8812_v32 = vadd.f32 %v8762_v36, %v4830_v50  ;;  %v4831_v10 = vmul.f32 %v6333_v54, %v8757_v2 }
 0x228   : > { %6712 = vrcp.f32 %v4989_v11  ;;  %v4990_v59 = vadd.f32 1.0, %v6701_v39  ;;  %v5833_v19 = vmul.f32 -1.442695, %v8808_v52  ;;  %v8817_v38 = vadd.f32 %v8762_v36, %v4833_v24 }
 0x229   : > { %6714 = vrcp.f32 %v4992_v0  ;;  %v5831_v37 = vmul.f32 -1.442695, %v8812_v32  ;;  %v8821_v26 = vadd.f32 %v8762_v36, %v4831_v10  ;;  %v6302_v35 = vpop.f32.mrb[12].mxu0 }
 0x22a   : > { %6716 = vrcp.f32 %v4990_v59  ;;  %v5834_v34 = vmul.f32 -1.442695, %v8817_v38  ;;  %v6334_v49 = vadd.f32 %v6302_v35, %v8746_v41  ;;  %v4704_v25 = vpop.f32.mrb[13].mxu0 }
 0x22b   : > { %6718 = vpow2.f32 %v5833_v19  ;;  %v5832_v1 = vmul.f32 -1.442695, %v8821_v26  ;;  %v6335_v61 = vadd.f32 %v4704_v25, %v8748_v5  ;;  %v6303_v44 = vpop.f32.mrb[14].mxu0 }
 0x22c   : > { %v6703_v3 = vpop.eup %6702  ;;  %6720 = vpow2.f32 %v5831_v37  ;;  %v4836_v51 = vmul.f32 %v6334_v49, %v8757_v2  ;;  %v6336_v28 = vadd.f32 %v6303_v44, %v8750_v55  ;;  %v4707_v45 = vpop.f32.mrb[15].mxu0 }
 0x22d   : > { %v6705_v27 = vpop.eup %6704  ;;  %v4995_v53 = vadd.f32 1.0, %v6703_v3  ;;  %6722 = vpow2.f32 %v5834_v34  ;;  %v4834_v41 = vmul.f32 %v6335_v61, %v8757_v2  ;;  %v6337_v21 = vadd.f32 %v4707_v45, %v8752_v29 }
 0x22e   : > { %v6707_v47 = vpop.eup %6706  ;;  %v4993_v5 = vadd.f32 1.0, %v6705_v27  ;;  %6724 = vpow2.f32 %v5832_v1  ;;  %v8837_v46 = vadd.f32 %v8762_v36, %v4836_v51  ;;  %v4837_v15 = vmul.f32 %v6336_v28, %v8757_v2 }
 0x22f   : > { %v6709_v55 = vpop.eup %6708  ;;  %6726 = vrcp.f32 %v4995_v53  ;;  %v4996_v60 = vadd.f32 1.0, %v6707_v47  ;;  %v8841_v42 = vadd.f32 %v8762_v36, %v4834_v41  ;;  %v4835_v12 = vmul.f32 %v6337_v21, %v8757_v2 }
 0x230   : > { %6728 = vrcp.f32 %v4993_v5  ;;  %v4994_v29 = vadd.f32 1.0, %v6709_v55  ;;  %v5837_v31 = vmul.f32 -1.442695, %v8837_v46  ;;  %v8846_v8 = vadd.f32 %v8762_v36, %v4837_v15 }
 0x231   : > { %v6711_v62 = vpop.eup %6710  ;;  %6730 = vrcp.f32 %v4996_v60  ;;  %v5835_v56 = vmul.f32 -1.442695, %v8841_v42  ;;  %v8850_v40 = vadd.f32 %v8762_v36, %v4835_v12  ;;  %v6306_v13 = vpop.f32.mrb[16].mxu0 }
 0x232   : > { %v6713_v17 = vpop.eup %6712  ;;  %v5087_v30 = vmul.f32 %v6711_v62, %v8767_v6  ;;  %6732 = vrcp.f32 %v4994_v29  ;;  %v5838_v9 = vmul.f32 -1.442695, %v8846_v8  ;;  %v6170_v14 = vpop.f32.mrb[16].mxu1 }
 0x233   : > { %v4720_v63 = vpop.f32.mrb[17].mxu0  ;;  %v6715_v4 = vpop.eup %6714  ;;  %v5085_v43 = vmul.f32 %v6713_v17, %v8771_v23  ;;  %6734 = vpow2.f32 %v5837_v31  ;;  %v5836_v16 = vmul.f32 -1.442695, %v8850_v40  ;;  %v6338_v58 = vadd.f32 %v6306_v13, %v6170_v14 }
 0x234   : > { %v2695_v50 = vpop.f32.mrb[17].mxu1  ;;  %v6307_v54 = vpop.f32.mrb[18].mxu0  ;;  %5119 = vst [vmem:[%s8857_s30 + $0x10] sm:$0xff] %v5087_v30  ;;  %v5088_v6 = vmul.f32 %v6715_v4, %v8776_v7  ;;  %6736 = vpow2.f32 %v5835_v56 }
 0x235   : > { %v6717_v18 = vpop.eup %6716  ;;  %v6339_v11 = vadd.f32 %v4720_v63, %v2695_v50  ;;  %v6171_v24 = vpop.f32.mrb[18].mxu1  ;;  %5117 = vst [vmem:[%s8857_s30] sm:$0xff] %v5085_v43  ;;  %6738 = vpow2.f32 %v5838_v9  ;;  %v4840_v10 = vmul.f32 %v6338_v58, %v8757_v2 }
 0x236   : > { %v4723_v23 = vpop.f32.mrb[19].mxu0  ;;  %v6719_v39 = vpop.eup %6718  ;;  %v5086_v0 = vmul.f32 %v6717_v18, %v8780_v22  ;;  %v6340_v59 = vadd.f32 %v6307_v54, %v6171_v24  ;;  %5120 = vst [vmem:[%s8857_s30 + $0x18] sm:$0xff] %v5088_v6  ;;  %6740 = vpow2.f32 %v5836_v16 }
 0x237   : > { %v2698_v19 = vpop.f32.mrb[19].mxu1  ;;  %v6721_v37 = vpop.eup %6720  ;;  %v4999_v35 = vadd.f32 1.0, %v6719_v39  ;;  %v4838_v7 = vmul.f32 %v6339_v11, %v8757_v2  ;;  %v8868_v1 = vadd.f32 %v8762_v36, %v4840_v10 }
 0x238   : > { %v6341_v34 = vadd.f32 %v4723_v23, %v2698_v19  ;;  %v6723_v49 = vpop.eup %6722  ;;  %5118 = vst [vmem:[%s8857_s30 + $0x8] sm:$0xff] %v5086_v0  ;;  %v4997_v25 = vadd.f32 1.0, %v6721_v37  ;;  %v4841_v22 = vmul.f32 %v6340_v59, %v8757_v2 }
 0x239   : > { %v6725_v61 = vpop.eup %6724  ;;  %6742 = vrcp.f32 %v4999_v35  ;;  %v5000_v44 = vadd.f32 1.0, %v6723_v49  ;;  %v8872_v3 = vadd.f32 %v8762_v36, %v4838_v7  ;;  %v5841_v27 = vmul.f32 -1.442695, %v8868_v1  ;;  %v6310_v41 = vpop.f32.mrb[20].mxu0 }
 0x23a   : > { %v4839_v51 = vmul.f32 %v6341_v34, %v8757_v2  ;;  %v6727_v28 = vpop.eup %6726  ;;  %6744 = vrcp.f32 %v4997_v25  ;;  %v4998_v45 = vadd.f32 1.0, %v6725_v61  ;;  %v8877_v53 = vadd.f32 %v8762_v36, %v4841_v22  ;;  %v6174_v55 = vpop.f32.mrb[20].mxu1 }
 0x23b   : > { %v6729_v21 = vpop.eup %6728  ;;  %v5091_v47 = vmul.f32 %v6727_v28, %v8787_v20  ;;  %6746 = vrcp.f32 %v5000_v44  ;;  %v5839_v5 = vmul.f32 -1.442695, %v8872_v3  ;;  %v4736_v60 = vpop.f32.mrb[21].mxu0  ;;  %v6342_v62 = vadd.f32 %v6310_v41, %v6174_v55 }
 0x23c   : > { %v8882_v15 = vadd.f32 %v8762_v36, %v4839_v51  ;;  %v6731_v12 = vpop.eup %6730  ;;  %v5089_v29 = vmul.f32 %v6729_v21, %v8791_v33  ;;  %6748 = vrcp.f32 %v4998_v45  ;;  %v5842_v31 = vmul.f32 -1.442695, %v8877_v53  ;;  %v2711_v56 = vpop.f32.mrb[21].mxu1 }
 0x23d   : > { %v6311_v13 = vpop.f32.mrb[22].mxu0  ;;  %v6733_v17 = vpop.eup %6732  ;;  %5123 = vst [vmem:[%s8857_s30 + $0x30] sm:$0xff] %v5091_v47  ;;  %v5092_v20 = vmul.f32 %v6731_v12, %v8796_v57  ;;  %6750 = vpow2.f32 %v5841_v27  ;;  %v6343_v9 = vadd.f32 %v4736_v60, %v2711_v56  ;;  %v4844_v43 = vmul.f32 %v6342_v62, %v8757_v2 }
 0x23e   : > { %v5840_v30 = vmul.f32 -1.442695, %v8882_v15  ;;  %v6175_v14 = vpop.f32.mrb[22].mxu1  ;;  %v4739_v63 = vpop.f32.mrb[23].mxu0  ;;  %5121 = vst [vmem:[%s8857_s30 + $0x20] sm:$0xff] %v5089_v29  ;;  %v5090_v33 = vmul.f32 %v6733_v17, %v8800_v48  ;;  %6752 = vpow2.f32 %v5839_v5 }
 0x23f   : > { %v6735_v4 = vpop.eup %6734  ;;  %v6344_v16 = vadd.f32 %v6311_v13, %v6175_v14  ;;  %v2714_v58 = vpop.f32.mrb[23].mxu1  ;;  %5124 = vst [vmem:[%s8857_s30 + $0x38] sm:$0xff] %v5092_v20  ;;  %6754 = vpow2.f32 %v5842_v31  ;;  %v4842_v57 = vmul.f32 %v6343_v9, %v8757_v2  ;;  %v8896_v24 = vadd.f32 %v8762_v36, %v4844_v43 }
 0x240   : > { %v6737_v50 = vpop.eup %6736  ;;  %v5003_v54 = vadd.f32 1.0, %v6735_v4  ;;  %v6345_v18 = vadd.f32 %v4739_v63, %v2714_v58  ;;  %5122 = vst [vmem:[%s8857_s30 + $0x28] sm:$0xff] %v5090_v33  ;;  %6756 = vpow2.f32 %v5840_v30 }
 0x241   : > { %v6739_v6 = vpop.eup %6738  ;;  %v5001_v11 = vadd.f32 1.0, %v6737_v50  ;;  %v4845_v48 = vmul.f32 %v6344_v16, %v8757_v2  ;;  %v8900_v0 = vadd.f32 %v8762_v36, %v4842_v57  ;;  %v5845_v19 = vmul.f32 -1.442695, %v8896_v24  ;;  %v6314_v35 = vpop.f32.mrb[24].mxu0 }
 0x242   : > { %v6741_v23 = vpop.eup %6740  ;;  %6758 = vrcp.f32 %v5003_v54  ;;  %v5004_v39 = vadd.f32 1.0, %v6739_v6  ;;  %v4843_v10 = vmul.f32 %v6345_v18, %v8757_v2  ;;  %v6178_v25 = vpop.f32.mrb[24].mxu1 }
 0x243   : > { %6760 = vrcp.f32 %v5001_v11  ;;  %v5002_v59 = vadd.f32 1.0, %v6741_v23  ;;  %v8905_v37 = vadd.f32 %v8762_v36, %v4845_v48  ;;  %v6743_v7 = vpop.eup %6742  ;;  %v5843_v34 = vmul.f32 -1.442695, %v8900_v0  ;;  %v4752_v22 = vpop.f32.mrb[25].mxu0 }
 0x244   : > { %6762 = vrcp.f32 %v5004_v39  ;;  %v8909_v49 = vadd.f32 %v8762_v36, %v4843_v10  ;;  %v6745_v61 = vpop.eup %6744  ;;  %v5095_v44 = vmul.f32 %v6743_v7, %v8808_v52  ;;  %v6346_v28 = vadd.f32 %v6314_v35, %v6178_v25  ;;  %v2727_v45 = vpop.f32.mrb[25].mxu1 }
 0x245   : > { %6764 = vrcp.f32 %v5002_v59  ;;  %v5846_v51 = vmul.f32 -1.442695, %v8905_v37  ;;  %v6315_v27 = vpop.f32.mrb[26].mxu0  ;;  %v6747_v41 = vpop.eup %6746  ;;  %v5093_v21 = vmul.f32 %v6745_v61, %v8812_v32  ;;  %v6347_v5 = vadd.f32 %v4752_v22, %v2727_v45 }
 0x246   : > { %6766 = vpow2.f32 %v5845_v19  ;;  %v5844_v47 = vmul.f32 -1.442695, %v8909_v49  ;;  %v6179_v55 = vpop.f32.mrb[26].mxu1  ;;  %v4755_v60 = vpop.f32.mrb[27].mxu0  ;;  %5127 = vst [vmem:[%s8857_s30 + $0x50] sm:$0xff] %v5095_v44  ;;  %v5096_v52 = vmul.f32 %v6747_v41, %v8817_v38  ;;  %v4848_v29 = vmul.f32 %v6346_v28, %v8757_v2 }
 0x247   : > { %v6749_v12 = vpop.eup %6748  ;;  %6768 = vpow2.f32 %v5843_v34  ;;  %v6348_v31 = vadd.f32 %v6315_v27, %v6179_v55  ;;  %v2730_v62 = vpop.f32.mrb[27].mxu1  ;;  %5125 = vst [vmem:[%s8857_s30 + $0x40] sm:$0xff] %v5093_v21  ;;  %v4846_v13 = vmul.f32 %v6347_v5, %v8757_v2 }
 0x248   : > { %v6751_v56 = vpop.eup %6750  ;;  %v5094_v32 = vmul.f32 %v6749_v12, %v8821_v26  ;;  %6770 = vpow2.f32 %v5846_v51  ;;  %v6349_v17 = vadd.f32 %v4755_v60, %v2730_v62  ;;  %5128 = vst [vmem:[%s8857_s30 + $0x58] sm:$0xff] %v5096_v52  ;;  %v8923_v38 = vadd.f32 %v8762_v36, %v4848_v29 }
 0x249   : > { %v6753_v20 = vpop.eup %6752  ;;  %v5007_v30 = vadd.f32 1.0, %v6751_v56  ;;  %6772 = vpow2.f32 %v5844_v47  ;;  %v4849_v9 = vmul.f32 %v6348_v31, %v8757_v2  ;;  %v8928_v4 = vadd.f32 %v8762_v36, %v4846_v13  ;;  %v6318_v50 = vpop.f32.mrb[28].mxu0 }
 0x24a   : > { %v6755_v14 = vpop.eup %6754  ;;  %5126 = vst [vmem:[%s8857_s30 + $0x48] sm:$0xff] %v5094_v32  ;;  %v5005_v63 = vadd.f32 1.0, %v6753_v20  ;;  %v4847_v26 = vmul.f32 %v6349_v17, %v8757_v2  ;;  %v5849_v16 = vmul.f32 -1.442695, %v8923_v38  ;;  %v6182_v11 = vpop.f32.mrb[28].mxu1 }
 0x24b   : > { %v6757_v33 = vpop.eup %6756  ;;  %6774 = vrcp.f32 %v5007_v30  ;;  %v5008_v43 = vadd.f32 1.0, %v6755_v14  ;;  %v8933_v58 = vadd.f32 %v8762_v36, %v4849_v9  ;;  %v5847_v18 = vmul.f32 -1.442695, %v8928_v4  ;;  %v4768_v48 = vpop.f32.mrb[29].mxu0 }
 0x24c   : > { %v6759_v54 = vpop.eup %6758  ;;  %6776 = vrcp.f32 %v5005_v63  ;;  %v5006_v57 = vadd.f32 1.0, %v6757_v33  ;;  %v8937_v6 = vadd.f32 %v8762_v36, %v4847_v26  ;;  %v6350_v59 = vadd.f32 %v6318_v50, %v6182_v11  ;;  %v2743_v19 = vpop.f32.mrb[29].mxu1 }
 0x24d   : > { %v6761_v23 = vpop.eup %6760  ;;  %v5099_v39 = vmul.f32 %v6759_v54, %v8837_v46  ;;  %6778 = vrcp.f32 %v5008_v43  ;;  %v5850_v10 = vmul.f32 -1.442695, %v8933_v58  ;;  %v6319_v35 = vpop.f32.mrb[30].mxu0  ;;  %v6351_v22 = vadd.f32 %v4768_v48, %v2743_v19 }
 0x24e   : > { %v6763_v7 = vpop.eup %6762  ;;  %v5097_v34 = vmul.f32 %v6761_v23, %v8841_v42  ;;  %6780 = vrcp.f32 %v5006_v57  ;;  %v5848_v25 = vmul.f32 -1.442695, %v8937_v6  ;;  %v6183_v61 = vpop.f32.mrb[30].mxu1  ;;  %v4852_v28 = vmul.f32 %v6350_v59, %v8757_v2 }
 0x24f   : > { %v4771_v44 = vpop.f32.mrb[31].mxu0  ;;  %v6765_v51 = vpop.eup %6764  ;;  %5131 = vst [vmem:[%s8857_s30 + $0x70] sm:$0xff] %v5099_v39  ;;  %v5100_v46 = vmul.f32 %v6763_v7, %v8846_v8  ;;  %6782 = vpow2.f32 %v5849_v16  ;;  %v6352_v45 = vadd.f32 %v6319_v35, %v6183_v61  ;;  %v4850_v21 = vmul.f32 %v6351_v22, %v8757_v2 }
 0x250   : > { %v2746_v27 = vpop.f32.mrb[31].mxu1  ;;  %v6767_v41 = vpop.eup %6766  ;;  %5129 = vst [vmem:[%s8857_s30 + $0x60] sm:$0xff] %v5097_v34  ;;  %v5098_v42 = vmul.f32 %v6765_v51, %v8850_v40  ;;  %6784 = vpow2.f32 %v5847_v18  ;;  %v8951_v8 = vadd.f32 %v8762_v36, %v4852_v28 }
 0x251   : > { %v6353_v47 = vadd.f32 %v4771_v44, %v2746_v27  ;;  %v6769_v5 = vpop.eup %6768  ;;  %5132 = vst [vmem:[%s8857_s30 + $0x78] sm:$0xff] %v5100_v46  ;;  %v5011_v55 = vadd.f32 1.0, %v6767_v41  ;;  %6786 = vpow2.f32 %v5850_v10  ;;  %v4853_v60 = vmul.f32 %v6352_v45, %v8757_v2 }
 0x252   : > { %v6771_v12 = vpop.eup %6770  ;;  %5130 = vst [vmem:[%s8857_s30 + $0x68] sm:$0xff] %v5098_v42  ;;  %v5009_v52 = vadd.f32 1.0, %v6769_v5  ;;  %6788 = vpow2.f32 %v5848_v25  ;;  %v8956_v29 = vadd.f32 %v8762_v36, %v4850_v21  ;;  %v5853_v56 = vmul.f32 -1.442695, %v8951_v8 }
 0x253   : > { %v4851_v40 = vmul.f32 %v6353_v47, %v8757_v2  ;;  %v6773_v31 = vpop.eup %6772  ;;  %6790 = vrcp.f32 %v5011_v55  ;;  %v5012_v62 = vadd.f32 1.0, %v6771_v12  ;;  %v8961_v32 = vadd.f32 %v8762_v36, %v4853_v60 }
 0x254   : > { %6792 = vrcp.f32 %v5009_v52  ;;  %v5010_v13 = vadd.f32 1.0, %v6773_v31  ;;  %v5851_v17 = vmul.f32 -1.442695, %v8956_v29 }
 0x255   : > { %v8965_v20 = vadd.f32 %v8762_v36, %v4851_v40  ;;  %v6775_v30 = vpop.eup %6774  ;;  %6794 = vrcp.f32 %v5012_v62  ;;  %v5854_v2 = vmul.f32 -1.442695, %v8961_v32 }
 0x256   : > { %v6777_v9 = vpop.eup %6776  ;;  %v5103_v14 = vmul.f32 %v6775_v30, %v8868_v1  ;;  %6796 = vrcp.f32 %v5010_v13 }
 0x257   : > { %v5852_v63 = vmul.f32 -1.442695, %v8965_v20  ;;  %v6779_v26 = vpop.eup %6778  ;;  %v5101_v33 = vmul.f32 %v6777_v9, %v8872_v3  ;;  %6798 = vpow2.f32 %v5853_v56 }
 0x258   : > { %v6781_v43 = vpop.eup %6780  ;;  %5135 = vst [vmem:[%s8857_s30 + $0x90] sm:$0xff] %v5103_v14  ;;  %v5104_v36 = vmul.f32 %v6779_v26, %v8877_v53  ;;  %6800 = vpow2.f32 %v5851_v17 }
 0x259   : > { %v6783_v16 = vpop.eup %6782  ;;  %5133 = vst [vmem:[%s8857_s30 + $0x80] sm:$0xff] %v5101_v33  ;;  %v5102_v50 = vmul.f32 %v6781_v43, %v8882_v15  ;;  %6802 = vpow2.f32 %v5854_v2 }
 0x25a   : > { %v6785_v54 = vpop.eup %6784  ;;  %5136 = vst [vmem:[%s8857_s30 + $0x98] sm:$0xff] %v5104_v36  ;;  %v5015_v1 = vadd.f32 1.0, %v6783_v16  ;;  %6804 = vpow2.f32 %v5852_v63 }
 0x25b   : > { %v6787_v57 = vpop.eup %6786  ;;  %5134 = vst [vmem:[%s8857_s30 + $0x88] sm:$0xff] %v5102_v50  ;;  %v5013_v18 = vadd.f32 1.0, %v6785_v54 }
 0x25c   : > { %v6789_v3 = vpop.eup %6788  ;;  %6806 = vrcp.f32 %v5015_v1  ;;  %v5016_v11 = vadd.f32 1.0, %v6787_v57 }
 0x25d   : > { %v6791_v48 = vpop.eup %6790  ;;  %6808 = vrcp.f32 %v5013_v18  ;;  %v5014_v53 = vadd.f32 1.0, %v6789_v3 }
 0x25e   : > { %v6793_v23 = vpop.eup %6792  ;;  %v5107_v15 = vmul.f32 %v6791_v48, %v8896_v24  ;;  %6810 = vrcp.f32 %v5016_v11 }
 0x25f   : > { %v6795_v39 = vpop.eup %6794  ;;  %v5105_v10 = vmul.f32 %v6793_v23, %v8900_v0  ;;  %6812 = vrcp.f32 %v5014_v53 }
 0x260   : > { %v6797_v59 = vpop.eup %6796  ;;  %5139 = vst [vmem:[%s8857_s30 + $0xb0] sm:$0xff] %v5107_v15  ;;  %v5108_v19 = vmul.f32 %v6795_v39, %v8905_v37 }
 0x261   : > { %v6799_v35 = vpop.eup %6798  ;;  %5137 = vst [vmem:[%s8857_s30 + $0xa0] sm:$0xff] %v5105_v10  ;;  %v5106_v7 = vmul.f32 %v6797_v59, %v8909_v49 }
 0x262   : > { %v6801_v34 = vpop.eup %6800  ;;  %5140 = vst [vmem:[%s8857_s30 + $0xb8] sm:$0xff] %v5108_v19  ;;  %v5019_v25 = vadd.f32 1.0, %v6799_v35 }
 0x263   : > { %v6803_v22 = vpop.eup %6802  ;;  %5138 = vst [vmem:[%s8857_s30 + $0xa8] sm:$0xff] %v5106_v7  ;;  %v5017_v24 = vadd.f32 1.0, %v6801_v34 }
 0x264   : > { %v6805_v61 = vpop.eup %6804  ;;  %6814 = vrcp.f32 %v5019_v25  ;;  %v5020_v0 = vadd.f32 1.0, %v6803_v22 }
 0x265   : > { %6816 = vrcp.f32 %v5017_v24  ;;  %v5018_v44 = vadd.f32 1.0, %v6805_v61 }
 0x266   : > { %v6807_v37 = vpop.eup %6806  ;;  %6818 = vrcp.f32 %v5020_v0 }
 0x267   : > { %v6809_v49 = vpop.eup %6808  ;;  %v5111_v51 = vmul.f32 %v6807_v37, %v8923_v38  ;;  %6820 = vrcp.f32 %v5018_v44 }
 0x268   : > { %v6811_v46 = vpop.eup %6810  ;;  %v5109_v28 = vmul.f32 %v6809_v49, %v8928_v4 }
 0x269   : > { %v6813_v45 = vpop.eup %6812  ;;  %5143 = vst [vmem:[%s8857_s30 + $0xd0] sm:$0xff] %v5111_v51  ;;  %v5112_v27 = vmul.f32 %v6811_v46, %v8933_v58 }
 0x26a   : > { %5141 = vst [vmem:[%s8857_s30 + $0xc0] sm:$0xff] %v5109_v28  ;;  %v5110_v41 = vmul.f32 %v6813_v45, %v8937_v6 }
 0x26b   : > { %5144 = vst [vmem:[%s8857_s30 + $0xd8] sm:$0xff] %v5112_v27 }
 0x26c   : > { %5142 = vst [vmem:[%s8857_s30 + $0xc8] sm:$0xff] %v5110_v41 }
 0x26e   : > { %v6815_v42 = vpop.eup %6814 }
 0x26f   : > { %v6817_v38 = vpop.eup %6816  ;;  %v5115_v4 = vmul.f32 %v6815_v42, %v8951_v8 }
 0x270   : > { %v6819_v21 = vpop.eup %6818  ;;  %v5113_v47 = vmul.f32 %v6817_v38, %v8956_v29 }
 0x271   : > { %v6821_v58 = vpop.eup %6820  ;;  %5147 = vst [vmem:[%s8857_s30 + $0xf0] sm:$0xff] %v5115_v4  ;;  %v5116_v5 = vmul.f32 %v6819_v21, %v8961_v32 }
 0x272   : > { %5145 = vst [vmem:[%s8857_s30 + $0xe0] sm:$0xff] %v5113_v47  ;;  %v5114_v6 = vmul.f32 %v6821_v58, %v8965_v20 }
 0x273   : > { %5148 = vst [vmem:[%s8857_s30 + $0xf8] sm:$0xff] %v5116_v5 }
 0x274   : > { %5146 = vst [vmem:[%s8857_s30 + $0xe8] sm:$0xff] %v5114_v6 }
 0x275   : > { %6892 = shalt.err (!%p6889_p5)
}
 0x276   : > { %s6893_s14 = scalar_lea.hbm %s9002_s9, 4096  ;;  %s6897_s24 = scalar_lea.hbm %s9062_s4, 8192 }
 0x277   : > { %p6894_p6 = scmp.ne.s32.totalorder %s9002_s9, %s6893_s14  ;;  %p6898_p10 = scmp.lt.u32.totalorder %s9002_s9, %s9062_s4 }
 0x278   : > { %p6899_p11 = scmp.lt.u32.totalorder %s6897_s24, %s6893_s14  ;;  %p6901_p13 = scmp.lt.u32.totalorder %s6893_s14, %s9002_s9 }
 0x279   : > { %p6895_p7 = pnand %p6894_p6, %p7027_p4 }
 0x27a   : > { %p6900_p12 = por %p6899_p11, %p6898_p10 }
 0x27b   : > { %p6896_p9 = pneg %p6895_p7 }
 0x27c   : > { %p6902_p0 = por %p6901_p13, %p6900_p12 }
 0x27e   : > { %p6903_p1 = pnand %p6902_p0, %p6896_p9 }
 0x280   : > { %6906 = shalt.err (!%p6903_p1)
}
 0x281   : > { %s6960_s30 = smov 128   ;;  %s6961_s5 = smov 8  }
 0x282   : > { %6589 = dma.vmem_to_hbm [thread:$0]  (%p7027_p4), %s9004_s6, 4096, %s9002_s9, %s9012_s18, %s6960_s30, %s6960_s30, %s6961_s5  }
 0x283 PF: > { %p6595_p2 = scmp.ge.s32.totalorder %s6957_s20, 2  ;;  %s5179_s7 = sand.u32 1, %s6937_s15  }
 0x284   : > { %s5180_s8 = scalar_lea.sflag [#allocation3], %s5179_s7 }
 0x285   : > { %p6592_p3 = pnand %p6595_p2, %p7034_p8 }
 0x287   : > { %6932 = dma.done.wait (!%p6592_p3), %s5180_s8, 4096  }
 0x288   : > { %6934 = vsyncadd (!%p6592_p3), %s5180_s8, 4294963200  ;;  %s17_s20 = sadd.s32 1, %s6957_s20   ;;  %s9132_s15 = smov %s6941_s16 }
 0x289   : > { %p14_p5 = scmp.ge.s32.totalorder %s17_s20, 4   ;;  %s9133_s16 = smov %s6945_s17 }
 0x28a   : > { %s9134_s17 = smov %s7040_s28  ;;  %s9135_s18 = smov %s6953_s19 }
 0x28b   : > { %s9136_s19 = smov %s9138_s23  ;;  %16 = sbr.rel (!%p14_p5) target bundleno = 4 (0x4), region = 90 }
 0x292   :  { %5185 = vsyncpa [#allocation3], 1 }
 0x293   :  { %5187 = vsyncpa [#allocation3 + $0x1], 1 }

</bundles_post_ra>
